<compile_context>
chip_gen: v6e
topology: v6e:2x2x1
jax: 0.10.0
libtpu: 0.0.40
codegen_flags: <defaults>
</compile_context>

<pallas_src>
import functools
import inspect

import jax
import jax.numpy as jnp
from jax.experimental import pallas as pl
from jax.experimental.pallas import tpu as pltpu


D_MODEL = 64           # module default d_model
NHEAD = 4              # module default nhead
DIM_FF = 128           # module default dim_feedforward
LN_EPS = 1e-5          # PyTorch LayerNorm default eps
NEG_INF = -1e30        # additive attention-mask value


# ---------------------------------------------------------------------------
# Kernel
# ---------------------------------------------------------------------------
def _masked_mha(rows, bias, wqkv_ref, bqkv_ref, wo_ref, bo_ref, nhead):
    """Multi-head self-attention over `rows`, restricted by additive `bias`.

    rows: (R, D) f32 tokens.  bias: (R, R) f32 -- 0 where attention is allowed
    (same-n rows for the temporal attention, same-m rows for the spatial one),
    -1e30 elsewhere.  Exactly equivalent to PyTorch's per-group
    nn.MultiheadAttention: the masked logits underflow to exp(.) == 0.
    Returns rows + out_proj(attention(rows))  (residual included).
    """
    r, d = rows.shape
    dh = d // nhead
    scale = 1.0 / (dh ** 0.5)
    bf16, f32 = jnp.bfloat16, jnp.float32

    qkv = jnp.dot(rows.astype(bf16), wqkv_ref[...],
                  preferred_element_type=f32) + bqkv_ref[...]            # (R, 3D) f32

    heads = []
    for h in range(nhead):                                   # static unroll (nhead=4)
        q = qkv[:, h * dh:(h + 1) * dh] * scale
        k = qkv[:, d + h * dh:d + (h + 1) * dh]
        v = qkv[:, 2 * d + h * dh:2 * d + (h + 1) * dh]
        s = jnp.einsum("qd,kd->qk", q.astype(bf16), k.astype(bf16),
                       preferred_element_type=f32) + bias                # (R, R) f32
        s = s - jnp.max(s, axis=-1, keepdims=True)
        p = jnp.exp(s)
        p = p / jnp.sum(p, axis=-1, keepdims=True)
        heads.append(jnp.dot(p.astype(bf16), v.astype(bf16),
                             preferred_element_type=f32))                # (R, dh) f32
    attn = jnp.concatenate(heads, axis=-1)                                # (R, D)
    proj = jnp.dot(attn.astype(bf16), wo_ref[...],
                   preferred_element_type=f32) + bo_ref[...]
    return rows + proj


def ewma_smooth_kernel(
    x_ref, scale_ref, pos_ref, bias_t_ref, bias_s_ref,
    w_emb_ref, b_emb_ref,
    wqkv_t_ref, bqkv_t_ref, wo_t_ref, bo_t_ref,
    wqkv_s_ref, bqkv_s_ref, wo_s_ref, bo_s_ref,
    wg_t_ref, wg_s_ref, bg_ref,
    w1_ref, b1_ref, w2_ref, b2_ref,
    ln_g_ref, ln_b_ref, w_out_ref, b_out_ref,
    out_ref,
    *, nhead,
):
    bf16, f32 = jnp.bfloat16, jnp.float32

    x_col = x_ref[0]                                  # (R, 1) raw series values
    trend = x_col * scale_ref[...]                    # EWMA trend (fused weights/cumsum scale)

    # Linear(1, d) embedding + (time_pos[m] + space_pos[n]) positional sum.
    emb = trend * w_emb_ref[...] + b_emb_ref[...] + pos_ref[...]          # (R, D) f32

    # Temporal and spatial multi-head attentions (each with residual).
    time_out = _masked_mha(emb, bias_t_ref[...], wqkv_t_ref, bqkv_t_ref,
                           wo_t_ref, bo_t_ref, nhead)
    space_out = _masked_mha(emb, bias_s_ref[...], wqkv_s_ref, bqkv_s_ref,
                            wo_s_ref, bo_s_ref, nhead)

    # Sigmoid gate over cat([time_out, space_out]) -- done as two matmuls.
    gate_logits = (jnp.dot(time_out.astype(bf16), wg_t_ref[...], preferred_element_type=f32)
                   + jnp.dot(space_out.astype(bf16), wg_s_ref[...], preferred_element_type=f32)
                   + bg_ref[...])
    gate = 1.0 / (1.0 + jnp.exp(-gate_logits))
    fused = gate * time_out + (1.0 - gate) * space_out

    # FFN (Linear -> ReLU -> Linear) + residual.  (Dropout = identity in eval.)
    hid = jnp.maximum(jnp.dot(fused.astype(bf16), w1_ref[...],
                              preferred_element_type=f32) + b1_ref[...], 0.0)
    fused = fused + (jnp.dot(hid.astype(bf16), w2_ref[...],
                             preferred_element_type=f32) + b2_ref[...])

    # LayerNorm(d), f32.
    mu = jnp.mean(fused, axis=-1, keepdims=True)
    var = jnp.mean((fused - mu) * (fused - mu), axis=-1, keepdims=True)
    fused = (fused - mu) * jax.lax.rsqrt(var + LN_EPS) * ln_g_ref[...] + ln_b_ref[...]

    # Linear(d, 1) output head + residual with the raw input series.
    proj = jnp.sum(fused * w_out_ref[...], axis=-1, keepdims=True) + b_out_ref[...]
    out_ref[0] = (proj + x_col).astype(out_ref.dtype)


# ---------------------------------------------------------------------------
# Wrapper
# ---------------------------------------------------------------------------
def _supports_single_buffering():
    try:
        return (hasattr(pl, "Buffered")
                and "pipeline_mode" in inspect.signature(pl.BlockSpec).parameters)
    except (TypeError, ValueError):
        return False


_SINGLE_BUFFER_CONSTANTS = _supports_single_buffering()


def _const_spec(shape):
    # Grid-constant parameter block (index map never changes); single-buffer it
    # when supported to halve the resident constant VMEM footprint.
    if _SINGLE_BUFFER_CONSTANTS:
        return pl.BlockSpec(shape, lambda b: (0, 0), pipeline_mode=pl.Buffered(1))
    return pl.BlockSpec(shape, lambda b: (0, 0))


@jax.jit
def ewma_smooth_forward(x, params):
    """x: (B, N, M) f32 -> (B, N, M) f32, matching EWMA_Smooth.forward in eval."""
    B, N, M = x.shape
    D = params["w_emb"].shape[1]
    FF = params["w1"].shape[1]
    R = N * M
    dh = D // NHEAD
    f32, bf16 = jnp.float32, jnp.bfloat16

    # TODO(synk): the M-length EWMA weight prep (sigmoid/cumprod/roll/cumsum) is a
    # sequential prefix scan over M scalars; it stays in plain JAX here.
    j = jnp.arange(M - 1, -1, -1, dtype=f32)
    alphas = jax.nn.sigmoid(params["beta"] * j)
    w = jnp.cumprod(1.0 - alphas)
    w = jnp.roll(w, 1).at[0].set(1.0)
    ewma_scale = w / jnp.maximum(jnp.cumsum(w), 1e-7)                     # (M,)
    scale_col = jnp.tile(ewma_scale, (N,)).reshape(R, 1)                  # per-row scale

    # Positional sum time_pos[m] + space_pos[n], flattened to (R, D) in (n, m) order.
    pos = (params["time_pos"][0][None, :, :]
           + params["space_pos"][:, 0, :][:, None, :]).reshape(R, D)

    # Additive attention masks: same-n rows (temporal) / same-m rows (spatial).
    # TODO(synk): for large N*M, replace the dense masked attention with a grouped
    # (batched per-n / per-m) attention to avoid the O((N*M)^2) score cost.
    rid = jnp.arange(R)
    bias_t = jnp.where((rid[:, None] // M) == (rid[None, :] // M), 0.0, NEG_INF).astype(f32)
    bias_s = jnp.where((rid[:, None] % M) == (rid[None, :] % M), 0.0, NEG_INF).astype(f32)

    x_col = x.reshape(B, R, 1)
    wg_t, wg_s = params["wg"][:D], params["wg"][D:]

    consts = [
        scale_col, pos, bias_t, bias_s,
        params["w_emb"], params["b_emb"],
        params["wqkv_t"].astype(bf16), params["bqkv_t"],
        params["wo_t"].astype(bf16), params["bo_t"],
        params["wqkv_s"].astype(bf16), params["bqkv_s"],
        params["wo_s"].astype(bf16), params["bo_s"],
        wg_t.astype(bf16), wg_s.astype(bf16), params["bg"],
        params["w1"].astype(bf16), params["b1"],
        params["w2"].astype(bf16), params["b2"],
        params["ln_g"], params["ln_b"], params["w_out"], params["b_out"],
    ]

    in_specs = [pl.BlockSpec((1, R, 1), lambda b: (b, 0, 0))]
    in_specs += [_const_spec(tuple(a.shape)) for a in consts]
    out_spec = pl.BlockSpec((1, R, 1), lambda b: (b, 0, 0))

    # Advisory cost estimate (MXU flops / EUP transcendentals / HBM bytes).
    flops = B * (2 * 2 * R * D * 3 * D            # QKV projections (time + space)
                 + 2 * NHEAD * 4 * R * R * dh      # scores + attn @ V
                 + 2 * 2 * R * D * D               # attention output projections
                 + 2 * 2 * R * D * D               # gate (two DxD matmuls)
                 + 2 * 2 * R * D * FF)             # FFN
    transcendentals = B * (2 * NHEAD * R * R + R * D + R)
    bytes_accessed = int(sum(a.size * a.dtype.itemsize for a in consts) + 2 * B * R * 4)

    out_col = pl.pallas_call(
        functools.partial(ewma_smooth_kernel, nhead=NHEAD),
        out_shape=jax.ShapeDtypeStruct((B, R, 1), f32),
        grid_spec=pltpu.PrefetchScalarGridSpec(
            num_scalar_prefetch=0,
            grid=(B,),                             # one grid step == one batch element
            in_specs=in_specs,
            out_specs=out_spec,
        ),
        compiler_params=pltpu.CompilerParams(
            dimension_semantics=("parallel",),
            vmem_limit_bytes=32 * 1024 * 1024,     # explicit; actual use is ~1 MiB
        ),
        cost_estimate=pl.CostEstimate(flops=flops,
                                      transcendentals=transcendentals,
                                      bytes_accessed=bytes_accessed),
    )(x_col, *consts)

    return out_col.reshape(B, N, M)


# ---------------------------------------------------------------------------
# Parameter init (weights stored as (in_features, out_features) for x @ W)
# ---------------------------------------------------------------------------
def init_params(key, N, M, d_model=D_MODEL, dim_feedforward=DIM_FF):
    D, FF = d_model, dim_feedforward
    ks = jax.random.split(key, 16)

    def unif(k, shape, bound):
        return jax.random.uniform(k, shape, jnp.float32, -bound, bound)

    bd = 1.0 / D ** 0.5
    return {
        "beta": jnp.asarray(0.9, jnp.float32),
        "time_pos": jax.random.normal(ks[0], (1, M, D), jnp.float32),
        "space_pos": jax.random.normal(ks[1], (N, 1, D), jnp.float32),
        "w_emb": unif(ks[2], (1, D), 1.0),              # Linear(1, d): fan_in = 1
        "b_emb": unif(ks[3], (1, D), 1.0),
        "wqkv_t": unif(ks[4], (D, 3 * D), bd), "bqkv_t": jnp.zeros((1, 3 * D), jnp.float32),
        "wo_t": unif(ks[5], (D, D), bd), "bo_t": jnp.zeros((1, D), jnp.float32),
        "wqkv_s": unif(ks[6], (D, 3 * D), bd), "bqkv_s": jnp.zeros((1, 3 * D), jnp.float32),
        "wo_s": unif(ks[7], (D, D), bd), "bo_s": jnp.zeros((1, D), jnp.float32),
        "wg": unif(ks[8], (2 * D, D), 1.0 / (2 * D) ** 0.5),
        "bg": unif(ks[9], (1, D), 1.0 / (2 * D) ** 0.5),
        "w1": unif(ks[10], (D, FF), bd), "b1": unif(ks[11], (1, FF), bd),
        "w2": unif(ks[12], (FF, D), 1.0 / FF ** 0.5),
        "b2": unif(ks[13], (1, D), 1.0 / FF ** 0.5),
        "ln_g": jnp.ones((1, D), jnp.float32),
        "ln_b": jnp.zeros((1, D), jnp.float32),
        "w_out": unif(ks[14], (1, D), bd),
        "b_out": unif(ks[15], (1, 1), bd),
    }


# ---------------------------------------------------------------------------
# Pure-JAX reference (grouped attention, no masking trick).  Matmul operands
# are cast to bf16 with f32 accumulation exactly like the kernel, so the check
# validates structure/semantics rather than bf16-vs-f32 precision.
# ---------------------------------------------------------------------------
def ewma_smooth_reference(x, params):
    B, N, M = x.shape
    D = params["w_emb"].shape[1]
    dh = D // NHEAD
    f32, bf16 = jnp.float32, jnp.bfloat16
    scale = 1.0 / (dh ** 0.5)

    j = jnp.arange(M - 1, -1, -1, dtype=f32)
    alphas = jax.nn.sigmoid(params["beta"] * j)
    w = jnp.cumprod(1.0 - alphas)
    w = jnp.roll(w, 1).at[0].set(1.0)
    trend = x * (w / jnp.maximum(jnp.cumsum(w), 1e-7))

    emb = (trend[..., None] * params["w_emb"][0] + params["b_emb"][0]
           + params["time_pos"][None] + params["space_pos"][None])          # (B,N,M,D)

    def mm(a, b):
        return jnp.einsum("...d,de->...e", a.astype(bf16), b.astype(bf16),
                          preferred_element_type=f32)

    def attention(h, wqkv, bqkv, wo, bo, over_time):
        qkv = mm(h, wqkv) + bqkv[0]
        q = qkv[..., :D].reshape(B, N, M, NHEAD, dh) * scale
        k = qkv[..., D:2 * D].reshape(B, N, M, NHEAD, dh)
        v = qkv[..., 2 * D:].reshape(B, N, M, NHEAD, dh)
        if over_time:    # attend over m within each (b, n)
            s = jnp.einsum("bnqhd,bnkhd->bnhqk", q.astype(bf16), k.astype(bf16),
                           preferred_element_type=f32)
            p = jax.nn.softmax(s, axis=-1)
            o = jnp.einsum("bnhqk,bnkhd->bnqhd", p.astype(bf16), v.astype(bf16),
                           preferred_element_type=f32)
        else:            # attend over n within each (b, m)
            s = jnp.einsum("bqmhd,bkmhd->bmhqk", q.astype(bf16), k.astype(bf16),
                           preferred_element_type=f32)
            p = jax.nn.softmax(s, axis=-1)
            o = jnp.einsum("bmhqk,bkmhd->bqmhd", p.astype(bf16), v.astype(bf16),
                           preferred_element_type=f32)
        o = o.reshape(B, N, M, D)
        return h + mm(o, wo) + bo[0]

    time_out = attention(emb, params["wqkv_t"], params["bqkv_t"],
                         params["wo_t"], params["bo_t"], over_time=True)
    space_out = attention(emb, params["wqkv_s"], params["bqkv_s"],
                          params["wo_s"], params["bo_s"], over_time=False)

    wg_t, wg_s = params["wg"][:D], params["wg"][D:]
    gate = jax.nn.sigmoid(mm(time_out, wg_t) + mm(space_out, wg_s) + params["bg"][0])
    fused = gate * time_out + (1.0 - gate) * space_out

    hid = jax.nn.relu(mm(fused, params["w1"]) + params["b1"][0])
    fused = fused + mm(hid, params["w2"]) + params["b2"][0]

    mu = jnp.mean(fused, axis=-1, keepdims=True)
    var = jnp.mean((fused - mu) ** 2, axis=-1, keepdims=True)
    fused = (fused - mu) / jnp.sqrt(var + LN_EPS) * params["ln_g"][0] + params["ln_b"][0]

    out = jnp.sum(fused * params["w_out"][0], axis=-1) + params["b_out"][0, 0]
    return out + x


if __name__ == "__main__":
    # Small shapes consistent with the module: x is (B, N spatial points, M time steps).
    B, N, M = 2, 8, 8
    key = jax.random.PRNGKey(0)
    kx, kp = jax.random.split(key)
    x = jax.random.normal(kx, (B, N, M), jnp.float32)
    params = init_params(kp, N, M)

    out = jax.block_until_ready(ewma_smooth_forward(x, params))
    ref = jax.block_until_ready(ewma_smooth_reference(x, params))

    assert out.shape == (B, N, M), out.shape
    max_err = float(jnp.max(jnp.abs(out - ref)))
    assert jnp.allclose(out, ref, atol=2e-2, rtol=2e-2), max_err
    print("KERNEL_OK")
</pallas_src>

<mosaic_0001>
module attributes {stable_mosaic.version = 11 : i64} {
  func.func @ewma_smooth_kernel(%arg0: i32, %arg1: memref<1x64x1xf32, #tpu.memory_space<vmem>>, %arg2: memref<64x1xf32, #tpu.memory_space<vmem>>, %arg3: memref<64x64xf32, #tpu.memory_space<vmem>>, %arg4: memref<64x64xf32, #tpu.memory_space<vmem>>, %arg5: memref<64x64xf32, #tpu.memory_space<vmem>>, %arg6: memref<1x64xf32, #tpu.memory_space<vmem>>, %arg7: memref<1x64xf32, #tpu.memory_space<vmem>>, %arg8: memref<64x192xbf16, #tpu.memory_space<vmem>>, %arg9: memref<1x192xf32, #tpu.memory_space<vmem>>, %arg10: memref<64x64xbf16, #tpu.memory_space<vmem>>, %arg11: memref<1x64xf32, #tpu.memory_space<vmem>>, %arg12: memref<64x192xbf16, #tpu.memory_space<vmem>>, %arg13: memref<1x192xf32, #tpu.memory_space<vmem>>, %arg14: memref<64x64xbf16, #tpu.memory_space<vmem>>, %arg15: memref<1x64xf32, #tpu.memory_space<vmem>>, %arg16: memref<64x64xbf16, #tpu.memory_space<vmem>>, %arg17: memref<64x64xbf16, #tpu.memory_space<vmem>>, %arg18: memref<1x64xf32, #tpu.memory_space<vmem>>, %arg19: memref<64x128xbf16, #tpu.memory_space<vmem>>, %arg20: memref<1x128xf32, #tpu.memory_space<vmem>>, %arg21: memref<128x64xbf16, #tpu.memory_space<vmem>>, %arg22: memref<1x64xf32, #tpu.memory_space<vmem>>, %arg23: memref<1x64xf32, #tpu.memory_space<vmem>>, %arg24: memref<1x64xf32, #tpu.memory_space<vmem>>, %arg25: memref<1x64xf32, #tpu.memory_space<vmem>>, %arg26: memref<1x1xf32, #tpu.memory_space<vmem>>, %arg27: memref<1x64x1xf32, #tpu.memory_space<vmem>>) attributes {dimension_semantics = [#tpu.dimension_semantics<parallel>], iteration_bounds = array<i64: 2>, scalar_prefetch = 0 : i64, scratch_operands = 0 : i64, tpu.core_type = #tpu.core_type<tc>, window_params = [{transform_indices = @transform_0, window_bounds = array<i64: 1, 64, 1>}, {pipeline_mode = #tpu.pipeline_mode<synchronous>, transform_indices = @transform_1, window_bounds = array<i64: 64, 1>}, {pipeline_mode = #tpu.pipeline_mode<synchronous>, transform_indices = @transform_2, window_bounds = array<i64: 64, 64>}, {pipeline_mode = #tpu.pipeline_mode<synchronous>, transform_indices = @transform_3, window_bounds = array<i64: 64, 64>}, {pipeline_mode = #tpu.pipeline_mode<synchronous>, transform_indices = @transform_4, window_bounds = array<i64: 64, 64>}, {pipeline_mode = #tpu.pipeline_mode<synchronous>, transform_indices = @transform_5, window_bounds = array<i64: 1, 64>}, {pipeline_mode = #tpu.pipeline_mode<synchronous>, transform_indices = @transform_6, window_bounds = array<i64: 1, 64>}, {pipeline_mode = #tpu.pipeline_mode<synchronous>, transform_indices = @transform_7, window_bounds = array<i64: 64, 192>}, {pipeline_mode = #tpu.pipeline_mode<synchronous>, transform_indices = @transform_8, window_bounds = array<i64: 1, 192>}, {pipeline_mode = #tpu.pipeline_mode<synchronous>, transform_indices = @transform_9, window_bounds = array<i64: 64, 64>}, {pipeline_mode = #tpu.pipeline_mode<synchronous>, transform_indices = @transform_10, window_bounds = array<i64: 1, 64>}, {pipeline_mode = #tpu.pipeline_mode<synchronous>, transform_indices = @transform_11, window_bounds = array<i64: 64, 192>}, {pipeline_mode = #tpu.pipeline_mode<synchronous>, transform_indices = @transform_12, window_bounds = array<i64: 1, 192>}, {pipeline_mode = #tpu.pipeline_mode<synchronous>, transform_indices = @transform_13, window_bounds = array<i64: 64, 64>}, {pipeline_mode = #tpu.pipeline_mode<synchronous>, transform_indices = @transform_14, window_bounds = array<i64: 1, 64>}, {pipeline_mode = #tpu.pipeline_mode<synchronous>, transform_indices = @transform_15, window_bounds = array<i64: 64, 64>}, {pipeline_mode = #tpu.pipeline_mode<synchronous>, transform_indices = @transform_16, window_bounds = array<i64: 64, 64>}, {pipeline_mode = #tpu.pipeline_mode<synchronous>, transform_indices = @transform_17, window_bounds = array<i64: 1, 64>}, {pipeline_mode = #tpu.pipeline_mode<synchronous>, transform_indices = @transform_18, window_bounds = array<i64: 64, 128>}, {pipeline_mode = #tpu.pipeline_mode<synchronous>, transform_indices = @transform_19, window_bounds = array<i64: 1, 128>}, {pipeline_mode = #tpu.pipeline_mode<synchronous>, transform_indices = @transform_20, window_bounds = array<i64: 128, 64>}, {pipeline_mode = #tpu.pipeline_mode<synchronous>, transform_indices = @transform_21, window_bounds = array<i64: 1, 64>}, {pipeline_mode = #tpu.pipeline_mode<synchronous>, transform_indices = @transform_22, window_bounds = array<i64: 1, 64>}, {pipeline_mode = #tpu.pipeline_mode<synchronous>, transform_indices = @transform_23, window_bounds = array<i64: 1, 64>}, {pipeline_mode = #tpu.pipeline_mode<synchronous>, transform_indices = @transform_24, window_bounds = array<i64: 1, 64>}, {pipeline_mode = #tpu.pipeline_mode<synchronous>, transform_indices = @transform_25, window_bounds = array<i64: 1, 1>}, {transform_indices = @transform_26, window_bounds = array<i64: 1, 64, 1>}]} {
    %c0 = arith.constant 0 : index
    %c0_0 = arith.constant 0 : index
    %c0_1 = arith.constant 0 : index
    %0 = vector.load %arg1[%c0, %c0_0, %c0_1] : memref<1x64x1xf32, #tpu.memory_space<vmem>>, vector<1x64x1xf32>
    %1 = vector.shape_cast %0 : vector<1x64x1xf32> to vector<64x1xf32>
    %c0_2 = arith.constant 0 : index
    %c0_3 = arith.constant 0 : index
    %2 = vector.load %arg2[%c0_2, %c0_3] : memref<64x1xf32, #tpu.memory_space<vmem>>, vector<64x1xf32>
    %3 = arith.mulf %1, %2 : vector<64x1xf32>
    %c0_4 = arith.constant 0 : index
    %c0_5 = arith.constant 0 : index
    %4 = vector.load %arg6[%c0_4, %c0_5] : memref<1x64xf32, #tpu.memory_space<vmem>>, vector<1x64xf32>
    %5 = vector.broadcast %3 : vector<64x1xf32> to vector<64x64xf32>
    %6 = vector.broadcast %4 : vector<1x64xf32> to vector<64x64xf32>
    %7 = arith.mulf %5, %6 : vector<64x64xf32>
    %c0_6 = arith.constant 0 : index
    %c0_7 = arith.constant 0 : index
    %8 = vector.load %arg7[%c0_6, %c0_7] : memref<1x64xf32, #tpu.memory_space<vmem>>, vector<1x64xf32>
    %9 = vector.broadcast %8 : vector<1x64xf32> to vector<64x64xf32>
    %10 = arith.addf %7, %9 : vector<64x64xf32>
    %c0_8 = arith.constant 0 : index
    %c0_9 = arith.constant 0 : index
    %11 = vector.load %arg3[%c0_8, %c0_9] : memref<64x64xf32, #tpu.memory_space<vmem>>, vector<64x64xf32>
    %12 = arith.addf %10, %11 : vector<64x64xf32>
    %c0_10 = arith.constant 0 : index
    %c0_11 = arith.constant 0 : index
    %13 = vector.load %arg4[%c0_10, %c0_11] : memref<64x64xf32, #tpu.memory_space<vmem>>, vector<64x64xf32>
    %14 = arith.truncf %12 : vector<64x64xf32> to vector<64x64xbf16>
    %c0_12 = arith.constant 0 : index
    %c0_13 = arith.constant 0 : index
    %15 = vector.load %arg8[%c0_12, %c0_13] : memref<64x192xbf16, #tpu.memory_space<vmem>>, vector<64x192xbf16>
    %cst = arith.constant dense<0.000000e+00> : vector<64x192xf32>
    %16 = tpu.matmul %14, %15, %cst {dimension_numbers = #tpu.dot_dimension_numbers<[1], [0], [0], [1], [0, 0, 1, 1], [], []>} : vector<64x64xbf16>, vector<64x192xbf16>, vector<64x192xf32> -> vector<64x192xf32>
    %c0_14 = arith.constant 0 : index
    %c0_15 = arith.constant 0 : index
    %17 = vector.load %arg9[%c0_14, %c0_15] : memref<1x192xf32, #tpu.memory_space<vmem>>, vector<1x192xf32>
    %18 = vector.broadcast %17 : vector<1x192xf32> to vector<64x192xf32>
    %19 = arith.addf %16, %18 : vector<64x192xf32>
    %20 = vector.extract_strided_slice %19 {offsets = [0, 0], sizes = [64, 16], strides = [1, 1]} : vector<64x192xf32> to vector<64x16xf32>
    %cst_16 = arith.constant 2.500000e-01 : f32
    %21 = vector.broadcast %cst_16 : f32 to vector<64x16xf32>
    %22 = arith.mulf %20, %21 : vector<64x16xf32>
    %23 = vector.extract_strided_slice %19 {offsets = [0, 64], sizes = [64, 16], strides = [1, 1]} : vector<64x192xf32> to vector<64x16xf32>
    %24 = vector.extract_strided_slice %19 {offsets = [0, 128], sizes = [64, 16], strides = [1, 1]} : vector<64x192xf32> to vector<64x16xf32>
    %25 = arith.truncf %22 : vector<64x16xf32> to vector<64x16xbf16>
    %26 = arith.truncf %23 : vector<64x16xf32> to vector<64x16xbf16>
    "tpu.trace_start"() <{level = 10 : i32, message = "qd,kd->qk"}> : () -> ()
    %cst_17 = arith.constant dense<0.000000e+00> : vector<64x64xf32>
    %27 = tpu.matmul %25, %26, %cst_17 {dimension_numbers = #tpu.dot_dimension_numbers<[1], [1], [0], [0], [0, 0, 1, 0], [], []>} : vector<64x16xbf16>, vector<64x16xbf16>, vector<64x64xf32> -> vector<64x64xf32>
    "tpu.trace_stop"() : () -> ()
    %28 = arith.addf %27, %13 : vector<64x64xf32>
    %cst_18 = arith.constant dense<0xFF800000> : vector<64xf32>
    %29 = vector.multi_reduction <maximumf>, %28, %cst_18 [1] : vector<64x64xf32> to vector<64xf32>
    %30 = vector.shape_cast %29 : vector<64xf32> to vector<64x1xf32>
    %31 = vector.broadcast %30 : vector<64x1xf32> to vector<64x64xf32>
    %32 = arith.subf %28, %31 : vector<64x64xf32>
    %33 = math.exp %32 : vector<64x64xf32>
    %cst_19 = arith.constant dense<0.000000e+00> : vector<64xf32>
    %34 = vector.multi_reduction <add>, %33, %cst_19 [1] : vector<64x64xf32> to vector<64xf32>
    %35 = vector.shape_cast %34 : vector<64xf32> to vector<64x1xf32>
    %36 = vector.broadcast %35 : vector<64x1xf32> to vector<64x64xf32>
    %37 = arith.divf %33, %36 : vector<64x64xf32>
    %38 = arith.truncf %37 : vector<64x64xf32> to vector<64x64xbf16>
    %39 = arith.truncf %24 : vector<64x16xf32> to vector<64x16xbf16>
    %cst_20 = arith.constant dense<0.000000e+00> : vector<64x16xf32>
    %40 = tpu.matmul %38, %39, %cst_20 {dimension_numbers = #tpu.dot_dimension_numbers<[1], [0], [0], [1], [0, 0, 1, 1], [], []>} : vector<64x64xbf16>, vector<64x16xbf16>, vector<64x16xf32> -> vector<64x16xf32>
    %41 = vector.extract_strided_slice %19 {offsets = [0, 16], sizes = [64, 16], strides = [1, 1]} : vector<64x192xf32> to vector<64x16xf32>
    %cst_21 = arith.constant 2.500000e-01 : f32
    %42 = vector.broadcast %cst_21 : f32 to vector<64x16xf32>
    %43 = arith.mulf %41, %42 : vector<64x16xf32>
    %44 = vector.extract_strided_slice %19 {offsets = [0, 80], sizes = [64, 16], strides = [1, 1]} : vector<64x192xf32> to vector<64x16xf32>
    %45 = vector.extract_strided_slice %19 {offsets = [0, 144], sizes = [64, 16], strides = [1, 1]} : vector<64x192xf32> to vector<64x16xf32>
    %46 = arith.truncf %43 : vector<64x16xf32> to vector<64x16xbf16>
    %47 = arith.truncf %44 : vector<64x16xf32> to vector<64x16xbf16>
    "tpu.trace_start"() <{level = 10 : i32, message = "qd,kd->qk"}> : () -> ()
    %cst_22 = arith.constant dense<0.000000e+00> : vector<64x64xf32>
    %48 = tpu.matmul %46, %47, %cst_22 {dimension_numbers = #tpu.dot_dimension_numbers<[1], [1], [0], [0], [0, 0, 1, 0], [], []>} : vector<64x16xbf16>, vector<64x16xbf16>, vector<64x64xf32> -> vector<64x64xf32>
    "tpu.trace_stop"() : () -> ()
    %49 = arith.addf %48, %13 : vector<64x64xf32>
    %cst_23 = arith.constant dense<0xFF800000> : vector<64xf32>
    %50 = vector.multi_reduction <maximumf>, %49, %cst_23 [1] : vector<64x64xf32> to vector<64xf32>
    %51 = vector.shape_cast %50 : vector<64xf32> to vector<64x1xf32>
    %52 = vector.broadcast %51 : vector<64x1xf32> to vector<64x64xf32>
    %53 = arith.subf %49, %52 : vector<64x64xf32>
    %54 = math.exp %53 : vector<64x64xf32>
    %cst_24 = arith.constant dense<0.000000e+00> : vector<64xf32>
    %55 = vector.multi_reduction <add>, %54, %cst_24 [1] : vector<64x64xf32> to vector<64xf32>
    %56 = vector.shape_cast %55 : vector<64xf32> to vector<64x1xf32>
    %57 = vector.broadcast %56 : vector<64x1xf32> to vector<64x64xf32>
    %58 = arith.divf %54, %57 : vector<64x64xf32>
    %59 = arith.truncf %58 : vector<64x64xf32> to vector<64x64xbf16>
    %60 = arith.truncf %45 : vector<64x16xf32> to vector<64x16xbf16>
    %cst_25 = arith.constant dense<0.000000e+00> : vector<64x16xf32>
    %61 = tpu.matmul %59, %60, %cst_25 {dimension_numbers = #tpu.dot_dimension_numbers<[1], [0], [0], [1], [0, 0, 1, 1], [], []>} : vector<64x64xbf16>, vector<64x16xbf16>, vector<64x16xf32> -> vector<64x16xf32>
    %62 = vector.extract_strided_slice %19 {offsets = [0, 32], sizes = [64, 16], strides = [1, 1]} : vector<64x192xf32> to vector<64x16xf32>
    %cst_26 = arith.constant 2.500000e-01 : f32
    %63 = vector.broadcast %cst_26 : f32 to vector<64x16xf32>
    %64 = arith.mulf %62, %63 : vector<64x16xf32>
    %65 = vector.extract_strided_slice %19 {offsets = [0, 96], sizes = [64, 16], strides = [1, 1]} : vector<64x192xf32> to vector<64x16xf32>
    %66 = vector.extract_strided_slice %19 {offsets = [0, 160], sizes = [64, 16], strides = [1, 1]} : vector<64x192xf32> to vector<64x16xf32>
    %67 = arith.truncf %64 : vector<64x16xf32> to vector<64x16xbf16>
    %68 = arith.truncf %65 : vector<64x16xf32> to vector<64x16xbf16>
    "tpu.trace_start"() <{level = 10 : i32, message = "qd,kd->qk"}> : () -> ()
    %cst_27 = arith.constant dense<0.000000e+00> : vector<64x64xf32>
    %69 = tpu.matmul %67, %68, %cst_27 {dimension_numbers = #tpu.dot_dimension_numbers<[1], [1], [0], [0], [0, 0, 1, 0], [], []>} : vector<64x16xbf16>, vector<64x16xbf16>, vector<64x64xf32> -> vector<64x64xf32>
    "tpu.trace_stop"() : () -> ()
    %70 = arith.addf %69, %13 : vector<64x64xf32>
    %cst_28 = arith.constant dense<0xFF800000> : vector<64xf32>
    %71 = vector.multi_reduction <maximumf>, %70, %cst_28 [1] : vector<64x64xf32> to vector<64xf32>
    %72 = vector.shape_cast %71 : vector<64xf32> to vector<64x1xf32>
    %73 = vector.broadcast %72 : vector<64x1xf32> to vector<64x64xf32>
    %74 = arith.subf %70, %73 : vector<64x64xf32>
    %75 = math.exp %74 : vector<64x64xf32>
    %cst_29 = arith.constant dense<0.000000e+00> : vector<64xf32>
    %76 = vector.multi_reduction <add>, %75, %cst_29 [1] : vector<64x64xf32> to vector<64xf32>
    %77 = vector.shape_cast %76 : vector<64xf32> to vector<64x1xf32>
    %78 = vector.broadcast %77 : vector<64x1xf32> to vector<64x64xf32>
    %79 = arith.divf %75, %78 : vector<64x64xf32>
    %80 = arith.truncf %79 : vector<64x64xf32> to vector<64x64xbf16>
    %81 = arith.truncf %66 : vector<64x16xf32> to vector<64x16xbf16>
    %cst_30 = arith.constant dense<0.000000e+00> : vector<64x16xf32>
    %82 = tpu.matmul %80, %81, %cst_30 {dimension_numbers = #tpu.dot_dimension_numbers<[1], [0], [0], [1], [0, 0, 1, 1], [], []>} : vector<64x64xbf16>, vector<64x16xbf16>, vector<64x16xf32> -> vector<64x16xf32>
    %83 = vector.extract_strided_slice %19 {offsets = [0, 48], sizes = [64, 16], strides = [1, 1]} : vector<64x192xf32> to vector<64x16xf32>
    %cst_31 = arith.constant 2.500000e-01 : f32
    %84 = vector.broadcast %cst_31 : f32 to vector<64x16xf32>
    %85 = arith.mulf %83, %84 : vector<64x16xf32>
    %86 = vector.extract_strided_slice %19 {offsets = [0, 112], sizes = [64, 16], strides = [1, 1]} : vector<64x192xf32> to vector<64x16xf32>
    %87 = vector.extract_strided_slice %19 {offsets = [0, 176], sizes = [64, 16], strides = [1, 1]} : vector<64x192xf32> to vector<64x16xf32>
    %88 = arith.truncf %85 : vector<64x16xf32> to vector<64x16xbf16>
    %89 = arith.truncf %86 : vector<64x16xf32> to vector<64x16xbf16>
    "tpu.trace_start"() <{level = 10 : i32, message = "qd,kd->qk"}> : () -> ()
    %cst_32 = arith.constant dense<0.000000e+00> : vector<64x64xf32>
    %90 = tpu.matmul %88, %89, %cst_32 {dimension_numbers = #tpu.dot_dimension_numbers<[1], [1], [0], [0], [0, 0, 1, 0], [], []>} : vector<64x16xbf16>, vector<64x16xbf16>, vector<64x64xf32> -> vector<64x64xf32>
    "tpu.trace_stop"() : () -> ()
    %91 = arith.addf %90, %13 : vector<64x64xf32>
    %cst_33 = arith.constant dense<0xFF800000> : vector<64xf32>
    %92 = vector.multi_reduction <maximumf>, %91, %cst_33 [1] : vector<64x64xf32> to vector<64xf32>
    %93 = vector.shape_cast %92 : vector<64xf32> to vector<64x1xf32>
    %94 = vector.broadcast %93 : vector<64x1xf32> to vector<64x64xf32>
    %95 = arith.subf %91, %94 : vector<64x64xf32>
    %96 = math.exp %95 : vector<64x64xf32>
    %cst_34 = arith.constant dense<0.000000e+00> : vector<64xf32>
    %97 = vector.multi_reduction <add>, %96, %cst_34 [1] : vector<64x64xf32> to vector<64xf32>
    %98 = vector.shape_cast %97 : vector<64xf32> to vector<64x1xf32>
    %99 = vector.broadcast %98 : vector<64x1xf32> to vector<64x64xf32>
    %100 = arith.divf %96, %99 : vector<64x64xf32>
    %101 = arith.truncf %100 : vector<64x64xf32> to vector<64x64xbf16>
    %102 = arith.truncf %87 : vector<64x16xf32> to vector<64x16xbf16>
    %cst_35 = arith.constant dense<0.000000e+00> : vector<64x16xf32>
    %103 = tpu.matmul %101, %102, %cst_35 {dimension_numbers = #tpu.dot_dimension_numbers<[1], [0], [0], [1], [0, 0, 1, 1], [], []>} : vector<64x64xbf16>, vector<64x16xbf16>, vector<64x16xf32> -> vector<64x16xf32>
    %104 = tpu.concatenate %40, %61, %82, %103 in 1 : vector<64x16xf32>, vector<64x16xf32>, vector<64x16xf32>, vector<64x16xf32> -> vector<64x64xf32>
    %105 = arith.truncf %104 : vector<64x64xf32> to vector<64x64xbf16>
    %c0_36 = arith.constant 0 : index
    %c0_37 = arith.constant 0 : index
    %106 = vector.load %arg10[%c0_36, %c0_37] : memref<64x64xbf16, #tpu.memory_space<vmem>>, vector<64x64xbf16>
    %cst_38 = arith.constant dense<0.000000e+00> : vector<64x64xf32>
    %107 = tpu.matmul %105, %106, %cst_38 {dimension_numbers = #tpu.dot_dimension_numbers<[1], [0], [0], [1], [0, 0, 1, 1], [], []>} : vector<64x64xbf16>, vector<64x64xbf16>, vector<64x64xf32> -> vector<64x64xf32>
    %c0_39 = arith.constant 0 : index
    %c0_40 = arith.constant 0 : index
    %108 = vector.load %arg11[%c0_39, %c0_40] : memref<1x64xf32, #tpu.memory_space<vmem>>, vector<1x64xf32>
    %109 = vector.broadcast %108 : vector<1x64xf32> to vector<64x64xf32>
    %110 = arith.addf %107, %109 : vector<64x64xf32>
    %111 = arith.addf %12, %110 : vector<64x64xf32>
    %c0_41 = arith.constant 0 : index
    %c0_42 = arith.constant 0 : index
    %112 = vector.load %arg5[%c0_41, %c0_42] : memref<64x64xf32, #tpu.memory_space<vmem>>, vector<64x64xf32>
    %113 = arith.truncf %12 : vector<64x64xf32> to vector<64x64xbf16>
    %c0_43 = arith.constant 0 : index
    %c0_44 = arith.constant 0 : index
    %114 = vector.load %arg12[%c0_43, %c0_44] : memref<64x192xbf16, #tpu.memory_space<vmem>>, vector<64x192xbf16>
    %cst_45 = arith.constant dense<0.000000e+00> : vector<64x192xf32>
    %115 = tpu.matmul %113, %114, %cst_45 {dimension_numbers = #tpu.dot_dimension_numbers<[1], [0], [0], [1], [0, 0, 1, 1], [], []>} : vector<64x64xbf16>, vector<64x192xbf16>, vector<64x192xf32> -> vector<64x192xf32>
    %c0_46 = arith.constant 0 : index
    %c0_47 = arith.constant 0 : index
    %116 = vector.load %arg13[%c0_46, %c0_47] : memref<1x192xf32, #tpu.memory_space<vmem>>, vector<1x192xf32>
    %117 = vector.broadcast %116 : vector<1x192xf32> to vector<64x192xf32>
    %118 = arith.addf %115, %117 : vector<64x192xf32>
    %119 = vector.extract_strided_slice %118 {offsets = [0, 0], sizes = [64, 16], strides = [1, 1]} : vector<64x192xf32> to vector<64x16xf32>
    %cst_48 = arith.constant 2.500000e-01 : f32
    %120 = vector.broadcast %cst_48 : f32 to vector<64x16xf32>
    %121 = arith.mulf %119, %120 : vector<64x16xf32>
    %122 = vector.extract_strided_slice %118 {offsets = [0, 64], sizes = [64, 16], strides = [1, 1]} : vector<64x192xf32> to vector<64x16xf32>
    %123 = vector.extract_strided_slice %118 {offsets = [0, 128], sizes = [64, 16], strides = [1, 1]} : vector<64x192xf32> to vector<64x16xf32>
    %124 = arith.truncf %121 : vector<64x16xf32> to vector<64x16xbf16>
    %125 = arith.truncf %122 : vector<64x16xf32> to vector<64x16xbf16>
    "tpu.trace_start"() <{level = 10 : i32, message = "qd,kd->qk"}> : () -> ()
    %cst_49 = arith.constant dense<0.000000e+00> : vector<64x64xf32>
    %126 = tpu.matmul %124, %125, %cst_49 {dimension_numbers = #tpu.dot_dimension_numbers<[1], [1], [0], [0], [0, 0, 1, 0], [], []>} : vector<64x16xbf16>, vector<64x16xbf16>, vector<64x64xf32> -> vector<64x64xf32>
    "tpu.trace_stop"() : () -> ()
    %127 = arith.addf %126, %112 : vector<64x64xf32>
    %cst_50 = arith.constant dense<0xFF800000> : vector<64xf32>
    %128 = vector.multi_reduction <maximumf>, %127, %cst_50 [1] : vector<64x64xf32> to vector<64xf32>
    %129 = vector.shape_cast %128 : vector<64xf32> to vector<64x1xf32>
    %130 = vector.broadcast %129 : vector<64x1xf32> to vector<64x64xf32>
    %131 = arith.subf %127, %130 : vector<64x64xf32>
    %132 = math.exp %131 : vector<64x64xf32>
    %cst_51 = arith.constant dense<0.000000e+00> : vector<64xf32>
    %133 = vector.multi_reduction <add>, %132, %cst_51 [1] : vector<64x64xf32> to vector<64xf32>
    %134 = vector.shape_cast %133 : vector<64xf32> to vector<64x1xf32>
    %135 = vector.broadcast %134 : vector<64x1xf32> to vector<64x64xf32>
    %136 = arith.divf %132, %135 : vector<64x64xf32>
    %137 = arith.truncf %136 : vector<64x64xf32> to vector<64x64xbf16>
    %138 = arith.truncf %123 : vector<64x16xf32> to vector<64x16xbf16>
    %cst_52 = arith.constant dense<0.000000e+00> : vector<64x16xf32>
    %139 = tpu.matmul %137, %138, %cst_52 {dimension_numbers = #tpu.dot_dimension_numbers<[1], [0], [0], [1], [0, 0, 1, 1], [], []>} : vector<64x64xbf16>, vector<64x16xbf16>, vector<64x16xf32> -> vector<64x16xf32>
    %140 = vector.extract_strided_slice %118 {offsets = [0, 16], sizes = [64, 16], strides = [1, 1]} : vector<64x192xf32> to vector<64x16xf32>
    %cst_53 = arith.constant 2.500000e-01 : f32
    %141 = vector.broadcast %cst_53 : f32 to vector<64x16xf32>
    %142 = arith.mulf %140, %141 : vector<64x16xf32>
    %143 = vector.extract_strided_slice %118 {offsets = [0, 80], sizes = [64, 16], strides = [1, 1]} : vector<64x192xf32> to vector<64x16xf32>
    %144 = vector.extract_strided_slice %118 {offsets = [0, 144], sizes = [64, 16], strides = [1, 1]} : vector<64x192xf32> to vector<64x16xf32>
    %145 = arith.truncf %142 : vector<64x16xf32> to vector<64x16xbf16>
    %146 = arith.truncf %143 : vector<64x16xf32> to vector<64x16xbf16>
    "tpu.trace_start"() <{level = 10 : i32, message = "qd,kd->qk"}> : () -> ()
    %cst_54 = arith.constant dense<0.000000e+00> : vector<64x64xf32>
    %147 = tpu.matmul %145, %146, %cst_54 {dimension_numbers = #tpu.dot_dimension_numbers<[1], [1], [0], [0], [0, 0, 1, 0], [], []>} : vector<64x16xbf16>, vector<64x16xbf16>, vector<64x64xf32> -> vector<64x64xf32>
    "tpu.trace_stop"() : () -> ()
    %148 = arith.addf %147, %112 : vector<64x64xf32>
    %cst_55 = arith.constant dense<0xFF800000> : vector<64xf32>
    %149 = vector.multi_reduction <maximumf>, %148, %cst_55 [1] : vector<64x64xf32> to vector<64xf32>
    %150 = vector.shape_cast %149 : vector<64xf32> to vector<64x1xf32>
    %151 = vector.broadcast %150 : vector<64x1xf32> to vector<64x64xf32>
    %152 = arith.subf %148, %151 : vector<64x64xf32>
    %153 = math.exp %152 : vector<64x64xf32>
    %cst_56 = arith.constant dense<0.000000e+00> : vector<64xf32>
    %154 = vector.multi_reduction <add>, %153, %cst_56 [1] : vector<64x64xf32> to vector<64xf32>
    %155 = vector.shape_cast %154 : vector<64xf32> to vector<64x1xf32>
    %156 = vector.broadcast %155 : vector<64x1xf32> to vector<64x64xf32>
    %157 = arith.divf %153, %156 : vector<64x64xf32>
    %158 = arith.truncf %157 : vector<64x64xf32> to vector<64x64xbf16>
    %159 = arith.truncf %144 : vector<64x16xf32> to vector<64x16xbf16>
    %cst_57 = arith.constant dense<0.000000e+00> : vector<64x16xf32>
    %160 = tpu.matmul %158, %159, %cst_57 {dimension_numbers = #tpu.dot_dimension_numbers<[1], [0], [0], [1], [0, 0, 1, 1], [], []>} : vector<64x64xbf16>, vector<64x16xbf16>, vector<64x16xf32> -> vector<64x16xf32>
    %161 = vector.extract_strided_slice %118 {offsets = [0, 32], sizes = [64, 16], strides = [1, 1]} : vector<64x192xf32> to vector<64x16xf32>
    %cst_58 = arith.constant 2.500000e-01 : f32
    %162 = vector.broadcast %cst_58 : f32 to vector<64x16xf32>
    %163 = arith.mulf %161, %162 : vector<64x16xf32>
    %164 = vector.extract_strided_slice %118 {offsets = [0, 96], sizes = [64, 16], strides = [1, 1]} : vector<64x192xf32> to vector<64x16xf32>
    %165 = vector.extract_strided_slice %118 {offsets = [0, 160], sizes = [64, 16], strides = [1, 1]} : vector<64x192xf32> to vector<64x16xf32>
    %166 = arith.truncf %163 : vector<64x16xf32> to vector<64x16xbf16>
    %167 = arith.truncf %164 : vector<64x16xf32> to vector<64x16xbf16>
    "tpu.trace_start"() <{level = 10 : i32, message = "qd,kd->qk"}> : () -> ()
    %cst_59 = arith.constant dense<0.000000e+00> : vector<64x64xf32>
    %168 = tpu.matmul %166, %167, %cst_59 {dimension_numbers = #tpu.dot_dimension_numbers<[1], [1], [0], [0], [0, 0, 1, 0], [], []>} : vector<64x16xbf16>, vector<64x16xbf16>, vector<64x64xf32> -> vector<64x64xf32>
    "tpu.trace_stop"() : () -> ()
    %169 = arith.addf %168, %112 : vector<64x64xf32>
    %cst_60 = arith.constant dense<0xFF800000> : vector<64xf32>
    %170 = vector.multi_reduction <maximumf>, %169, %cst_60 [1] : vector<64x64xf32> to vector<64xf32>
    %171 = vector.shape_cast %170 : vector<64xf32> to vector<64x1xf32>
    %172 = vector.broadcast %171 : vector<64x1xf32> to vector<64x64xf32>
    %173 = arith.subf %169, %172 : vector<64x64xf32>
    %174 = math.exp %173 : vector<64x64xf32>
    %cst_61 = arith.constant dense<0.000000e+00> : vector<64xf32>
    %175 = vector.multi_reduction <add>, %174, %cst_61 [1] : vector<64x64xf32> to vector<64xf32>
    %176 = vector.shape_cast %175 : vector<64xf32> to vector<64x1xf32>
    %177 = vector.broadcast %176 : vector<64x1xf32> to vector<64x64xf32>
    %178 = arith.divf %174, %177 : vector<64x64xf32>
    %179 = arith.truncf %178 : vector<64x64xf32> to vector<64x64xbf16>
    %180 = arith.truncf %165 : vector<64x16xf32> to vector<64x16xbf16>
    %cst_62 = arith.constant dense<0.000000e+00> : vector<64x16xf32>
    %181 = tpu.matmul %179, %180, %cst_62 {dimension_numbers = #tpu.dot_dimension_numbers<[1], [0], [0], [1], [0, 0, 1, 1], [], []>} : vector<64x64xbf16>, vector<64x16xbf16>, vector<64x16xf32> -> vector<64x16xf32>
    %182 = vector.extract_strided_slice %118 {offsets = [0, 48], sizes = [64, 16], strides = [1, 1]} : vector<64x192xf32> to vector<64x16xf32>
    %cst_63 = arith.constant 2.500000e-01 : f32
    %183 = vector.broadcast %cst_63 : f32 to vector<64x16xf32>
    %184 = arith.mulf %182, %183 : vector<64x16xf32>
    %185 = vector.extract_strided_slice %118 {offsets = [0, 112], sizes = [64, 16], strides = [1, 1]} : vector<64x192xf32> to vector<64x16xf32>
    %186 = vector.extract_strided_slice %118 {offsets = [0, 176], sizes = [64, 16], strides = [1, 1]} : vector<64x192xf32> to vector<64x16xf32>
    %187 = arith.truncf %184 : vector<64x16xf32> to vector<64x16xbf16>
    %188 = arith.truncf %185 : vector<64x16xf32> to vector<64x16xbf16>
    "tpu.trace_start"() <{level = 10 : i32, message = "qd,kd->qk"}> : () -> ()
    %cst_64 = arith.constant dense<0.000000e+00> : vector<64x64xf32>
    %189 = tpu.matmul %187, %188, %cst_64 {dimension_numbers = #tpu.dot_dimension_numbers<[1], [1], [0], [0], [0, 0, 1, 0], [], []>} : vector<64x16xbf16>, vector<64x16xbf16>, vector<64x64xf32> -> vector<64x64xf32>
    "tpu.trace_stop"() : () -> ()
    %190 = arith.addf %189, %112 : vector<64x64xf32>
    %cst_65 = arith.constant dense<0xFF800000> : vector<64xf32>
    %191 = vector.multi_reduction <maximumf>, %190, %cst_65 [1] : vector<64x64xf32> to vector<64xf32>
    %192 = vector.shape_cast %191 : vector<64xf32> to vector<64x1xf32>
    %193 = vector.broadcast %192 : vector<64x1xf32> to vector<64x64xf32>
    %194 = arith.subf %190, %193 : vector<64x64xf32>
    %195 = math.exp %194 : vector<64x64xf32>
    %cst_66 = arith.constant dense<0.000000e+00> : vector<64xf32>
    %196 = vector.multi_reduction <add>, %195, %cst_66 [1] : vector<64x64xf32> to vector<64xf32>
    %197 = vector.shape_cast %196 : vector<64xf32> to vector<64x1xf32>
    %198 = vector.broadcast %197 : vector<64x1xf32> to vector<64x64xf32>
    %199 = arith.divf %195, %198 : vector<64x64xf32>
    %200 = arith.truncf %199 : vector<64x64xf32> to vector<64x64xbf16>
    %201 = arith.truncf %186 : vector<64x16xf32> to vector<64x16xbf16>
    %cst_67 = arith.constant dense<0.000000e+00> : vector<64x16xf32>
    %202 = tpu.matmul %200, %201, %cst_67 {dimension_numbers = #tpu.dot_dimension_numbers<[1], [0], [0], [1], [0, 0, 1, 1], [], []>} : vector<64x64xbf16>, vector<64x16xbf16>, vector<64x16xf32> -> vector<64x16xf32>
    %203 = tpu.concatenate %139, %160, %181, %202 in 1 : vector<64x16xf32>, vector<64x16xf32>, vector<64x16xf32>, vector<64x16xf32> -> vector<64x64xf32>
    %204 = arith.truncf %203 : vector<64x64xf32> to vector<64x64xbf16>
    %c0_68 = arith.constant 0 : index
    %c0_69 = arith.constant 0 : index
    %205 = vector.load %arg14[%c0_68, %c0_69] : memref<64x64xbf16, #tpu.memory_space<vmem>>, vector<64x64xbf16>
    %cst_70 = arith.constant dense<0.000000e+00> : vector<64x64xf32>
    %206 = tpu.matmul %204, %205, %cst_70 {dimension_numbers = #tpu.dot_dimension_numbers<[1], [0], [0], [1], [0, 0, 1, 1], [], []>} : vector<64x64xbf16>, vector<64x64xbf16>, vector<64x64xf32> -> vector<64x64xf32>
    %c0_71 = arith.constant 0 : index
    %c0_72 = arith.constant 0 : index
    %207 = vector.load %arg15[%c0_71, %c0_72] : memref<1x64xf32, #tpu.memory_space<vmem>>, vector<1x64xf32>
    %208 = vector.broadcast %207 : vector<1x64xf32> to vector<64x64xf32>
    %209 = arith.addf %206, %208 : vector<64x64xf32>
    %210 = arith.addf %12, %209 : vector<64x64xf32>
    %211 = arith.truncf %111 : vector<64x64xf32> to vector<64x64xbf16>
    %c0_73 = arith.constant 0 : index
    %c0_74 = arith.constant 0 : index
    %212 = vector.load %arg16[%c0_73, %c0_74] : memref<64x64xbf16, #tpu.memory_space<vmem>>, vector<64x64xbf16>
    %cst_75 = arith.constant dense<0.000000e+00> : vector<64x64xf32>
    %213 = tpu.matmul %211, %212, %cst_75 {dimension_numbers = #tpu.dot_dimension_numbers<[1], [0], [0], [1], [0, 0, 1, 1], [], []>} : vector<64x64xbf16>, vector<64x64xbf16>, vector<64x64xf32> -> vector<64x64xf32>
    %214 = arith.truncf %210 : vector<64x64xf32> to vector<64x64xbf16>
    %c0_76 = arith.constant 0 : index
    %c0_77 = arith.constant 0 : index
    %215 = vector.load %arg17[%c0_76, %c0_77] : memref<64x64xbf16, #tpu.memory_space<vmem>>, vector<64x64xbf16>
    %cst_78 = arith.constant dense<0.000000e+00> : vector<64x64xf32>
    %216 = tpu.matmul %214, %215, %cst_78 {dimension_numbers = #tpu.dot_dimension_numbers<[1], [0], [0], [1], [0, 0, 1, 1], [], []>} : vector<64x64xbf16>, vector<64x64xbf16>, vector<64x64xf32> -> vector<64x64xf32>
    %217 = arith.addf %213, %216 : vector<64x64xf32>
    %c0_79 = arith.constant 0 : index
    %c0_80 = arith.constant 0 : index
    %218 = vector.load %arg18[%c0_79, %c0_80] : memref<1x64xf32, #tpu.memory_space<vmem>>, vector<1x64xf32>
    %219 = vector.broadcast %218 : vector<1x64xf32> to vector<64x64xf32>
    %220 = arith.addf %217, %219 : vector<64x64xf32>
    %cst_81 = arith.constant 0.000000e+00 : f32
    %221 = vector.broadcast %cst_81 : f32 to vector<64x64xf32>
    %222 = arith.subf %221, %220 : vector<64x64xf32>
    %223 = math.exp %222 : vector<64x64xf32>
    %cst_82 = arith.constant 1.000000e+00 : f32
    %224 = vector.broadcast %cst_82 : f32 to vector<64x64xf32>
    %225 = arith.addf %224, %223 : vector<64x64xf32>
    %cst_83 = arith.constant 1.000000e+00 : f32
    %226 = vector.broadcast %cst_83 : f32 to vector<64x64xf32>
    %227 = arith.divf %226, %225 : vector<64x64xf32>
    %228 = arith.mulf %227, %111 : vector<64x64xf32>
    %cst_84 = arith.constant 1.000000e+00 : f32
    %229 = vector.broadcast %cst_84 : f32 to vector<64x64xf32>
    %230 = arith.subf %229, %227 : vector<64x64xf32>
    %231 = arith.mulf %230, %210 : vector<64x64xf32>
    %232 = arith.addf %228, %231 : vector<64x64xf32>
    %233 = arith.truncf %232 : vector<64x64xf32> to vector<64x64xbf16>
    %c0_85 = arith.constant 0 : index
    %c0_86 = arith.constant 0 : index
    %234 = vector.load %arg19[%c0_85, %c0_86] : memref<64x128xbf16, #tpu.memory_space<vmem>>, vector<64x128xbf16>
    %cst_87 = arith.constant dense<0.000000e+00> : vector<64x128xf32>
    %235 = tpu.matmul %233, %234, %cst_87 {dimension_numbers = #tpu.dot_dimension_numbers<[1], [0], [0], [1], [0, 0, 1, 1], [], []>} : vector<64x64xbf16>, vector<64x128xbf16>, vector<64x128xf32> -> vector<64x128xf32>
    %c0_88 = arith.constant 0 : index
    %c0_89 = arith.constant 0 : index
    %236 = vector.load %arg20[%c0_88, %c0_89] : memref<1x128xf32, #tpu.memory_space<vmem>>, vector<1x128xf32>
    %237 = vector.broadcast %236 : vector<1x128xf32> to vector<64x128xf32>
    %238 = arith.addf %235, %237 : vector<64x128xf32>
    %cst_90 = arith.constant 0.000000e+00 : f32
    %239 = vector.broadcast %cst_90 : f32 to vector<64x128xf32>
    %240 = arith.maximumf %238, %239 : vector<64x128xf32>
    %241 = arith.truncf %240 : vector<64x128xf32> to vector<64x128xbf16>
    %c0_91 = arith.constant 0 : index
    %c0_92 = arith.constant 0 : index
    %242 = vector.load %arg21[%c0_91, %c0_92] : memref<128x64xbf16, #tpu.memory_space<vmem>>, vector<128x64xbf16>
    %cst_93 = arith.constant dense<0.000000e+00> : vector<64x64xf32>
    %243 = tpu.matmul %241, %242, %cst_93 {dimension_numbers = #tpu.dot_dimension_numbers<[1], [0], [0], [1], [0, 0, 1, 1], [], []>} : vector<64x128xbf16>, vector<128x64xbf16>, vector<64x64xf32> -> vector<64x64xf32>
    %c0_94 = arith.constant 0 : index
    %c0_95 = arith.constant 0 : index
    %244 = vector.load %arg22[%c0_94, %c0_95] : memref<1x64xf32, #tpu.memory_space<vmem>>, vector<1x64xf32>
    %245 = vector.broadcast %244 : vector<1x64xf32> to vector<64x64xf32>
    %246 = arith.addf %243, %245 : vector<64x64xf32>
    %247 = arith.addf %232, %246 : vector<64x64xf32>
    %cst_96 = arith.constant dense<0.000000e+00> : vector<64xf32>
    %248 = vector.multi_reduction <add>, %247, %cst_96 [1] : vector<64x64xf32> to vector<64xf32>
    %249 = vector.shape_cast %248 : vector<64xf32> to vector<64x1xf32>
    %cst_97 = arith.constant 6.400000e+01 : f32
    %250 = vector.broadcast %cst_97 : f32 to vector<64x1xf32>
    %251 = arith.divf %249, %250 : vector<64x1xf32>
    %252 = vector.broadcast %251 : vector<64x1xf32> to vector<64x64xf32>
    %253 = arith.subf %247, %252 : vector<64x64xf32>
    %254 = vector.broadcast %251 : vector<64x1xf32> to vector<64x64xf32>
    %255 = arith.subf %247, %254 : vector<64x64xf32>
    %256 = arith.mulf %253, %255 : vector<64x64xf32>
    %cst_98 = arith.constant dense<0.000000e+00> : vector<64xf32>
    %257 = vector.multi_reduction <add>, %256, %cst_98 [1] : vector<64x64xf32> to vector<64xf32>
    %258 = vector.shape_cast %257 : vector<64xf32> to vector<64x1xf32>
    %cst_99 = arith.constant 6.400000e+01 : f32
    %259 = vector.broadcast %cst_99 : f32 to vector<64x1xf32>
    %260 = arith.divf %258, %259 : vector<64x1xf32>
    %261 = vector.broadcast %251 : vector<64x1xf32> to vector<64x64xf32>
    %262 = arith.subf %247, %261 : vector<64x64xf32>
    %cst_100 = arith.constant 9.99999974E-6 : f32
    %263 = vector.broadcast %cst_100 : f32 to vector<64x1xf32>
    %264 = arith.addf %260, %263 : vector<64x1xf32>
    %265 = math.rsqrt %264 : vector<64x1xf32>
    %266 = vector.broadcast %265 : vector<64x1xf32> to vector<64x64xf32>
    %267 = arith.mulf %262, %266 : vector<64x64xf32>
    %c0_101 = arith.constant 0 : index
    %c0_102 = arith.constant 0 : index
    %268 = vector.load %arg23[%c0_101, %c0_102] : memref<1x64xf32, #tpu.memory_space<vmem>>, vector<1x64xf32>
    %269 = vector.broadcast %268 : vector<1x64xf32> to vector<64x64xf32>
    %270 = arith.mulf %267, %269 : vector<64x64xf32>
    %c0_103 = arith.constant 0 : index
    %c0_104 = arith.constant 0 : index
    %271 = vector.load %arg24[%c0_103, %c0_104] : memref<1x64xf32, #tpu.memory_space<vmem>>, vector<1x64xf32>
    %272 = vector.broadcast %271 : vector<1x64xf32> to vector<64x64xf32>
    %273 = arith.addf %270, %272 : vector<64x64xf32>
    %c0_105 = arith.constant 0 : index
    %c0_106 = arith.constant 0 : index
    %274 = vector.load %arg25[%c0_105, %c0_106] : memref<1x64xf32, #tpu.memory_space<vmem>>, vector<1x64xf32>
    %275 = vector.broadcast %274 : vector<1x64xf32> to vector<64x64xf32>
    %276 = arith.mulf %273, %275 : vector<64x64xf32>
    %cst_107 = arith.constant dense<0.000000e+00> : vector<64xf32>
    %277 = vector.multi_reduction <add>, %276, %cst_107 [1] : vector<64x64xf32> to vector<64xf32>
    %278 = vector.shape_cast %277 : vector<64xf32> to vector<64x1xf32>
    %c0_108 = arith.constant 0 : index
    %c0_109 = arith.constant 0 : index
    %279 = vector.load %arg26[%c0_108, %c0_109] : memref<1x1xf32, #tpu.memory_space<vmem>>, vector<1x1xf32>
    %280 = vector.broadcast %279 : vector<1x1xf32> to vector<64x1xf32>
    %281 = arith.addf %278, %280 : vector<64x1xf32>
    %282 = arith.addf %281, %1 : vector<64x1xf32>
    %c0_110 = arith.constant 0 : index
    %c0_111 = arith.constant 0 : index
    %c0_112 = arith.constant 0 : index
    %283 = vector.load %arg27[%c0_110, %c0_111, %c0_112] : memref<1x64x1xf32, #tpu.memory_space<vmem>>, vector<1x64x1xf32>
    %284 = vector.shape_cast %283 : vector<1x64x1xf32> to vector<64x1xf32>
    %285 = vector.shape_cast %282 : vector<64x1xf32> to vector<1x64x1xf32>
    tpu.vector_store %arg27[%c0_110, %c0_111, %c0_112], %285 {strides = array<i32>} : memref<1x64x1xf32, #tpu.memory_space<vmem>>, vector<1x64x1xf32>,
    return
  }
  func.func @transform_0(%arg0: i32) -> (i32, i32, i32) {
    %c0_i32 = arith.constant 0 : i32
    %c0_i32_0 = arith.constant 0 : i32
    %c0_i32_1 = arith.constant 0 : i32
    return %arg0, %c0_i32, %c0_i32_0 : i32, i32, i32
  }
  func.func @transform_1(%arg0: i32) -> (i32, i32) {
    %c0_i32 = arith.constant 0 : i32
    %c0_i32_0 = arith.constant 0 : i32
    %c0_i32_1 = arith.constant 0 : i32
    return %c0_i32, %c0_i32_0 : i32, i32
  }
  func.func @transform_2(%arg0: i32) -> (i32, i32) {
    %c0_i32 = arith.constant 0 : i32
    %c0_i32_0 = arith.constant 0 : i32
    %c0_i32_1 = arith.constant 0 : i32
    return %c0_i32, %c0_i32_0 : i32, i32
  }
  func.func @transform_3(%arg0: i32) -> (i32, i32) {
    %c0_i32 = arith.constant 0 : i32
    %c0_i32_0 = arith.constant 0 : i32
    %c0_i32_1 = arith.constant 0 : i32
    return %c0_i32, %c0_i32_0 : i32, i32
  }
  func.func @transform_4(%arg0: i32) -> (i32, i32) {
    %c0_i32 = arith.constant 0 : i32
    %c0_i32_0 = arith.constant 0 : i32
    %c0_i32_1 = arith.constant 0 : i32
    return %c0_i32, %c0_i32_0 : i32, i32
  }
  func.func @transform_5(%arg0: i32) -> (i32, i32) {
    %c0_i32 = arith.constant 0 : i32
    %c0_i32_0 = arith.constant 0 : i32
    %c0_i32_1 = arith.constant 0 : i32
    return %c0_i32, %c0_i32_0 : i32, i32
  }
  func.func @transform_6(%arg0: i32) -> (i32, i32) {
    %c0_i32 = arith.constant 0 : i32
    %c0_i32_0 = arith.constant 0 : i32
    %c0_i32_1 = arith.constant 0 : i32
    return %c0_i32, %c0_i32_0 : i32, i32
  }
  func.func @transform_7(%arg0: i32) -> (i32, i32) {
    %c0_i32 = arith.constant 0 : i32
    %c0_i32_0 = arith.constant 0 : i32
    %c0_i32_1 = arith.constant 0 : i32
    return %c0_i32, %c0_i32_0 : i32, i32
  }
  func.func @transform_8(%arg0: i32) -> (i32, i32) {
    %c0_i32 = arith.constant 0 : i32
    %c0_i32_0 = arith.constant 0 : i32
    %c0_i32_1 = arith.constant 0 : i32
    return %c0_i32, %c0_i32_0 : i32, i32
  }
  func.func @transform_9(%arg0: i32) -> (i32, i32) {
    %c0_i32 = arith.constant 0 : i32
    %c0_i32_0 = arith.constant 0 : i32
    %c0_i32_1 = arith.constant 0 : i32
    return %c0_i32, %c0_i32_0 : i32, i32
  }
  func.func @transform_10(%arg0: i32) -> (i32, i32) {
    %c0_i32 = arith.constant 0 : i32
    %c0_i32_0 = arith.constant 0 : i32
    %c0_i32_1 = arith.constant 0 : i32
    return %c0_i32, %c0_i32_0 : i32, i32
  }
  func.func @transform_11(%arg0: i32) -> (i32, i32) {
    %c0_i32 = arith.constant 0 : i32
    %c0_i32_0 = arith.constant 0 : i32
    %c0_i32_1 = arith.constant 0 : i32
    return %c0_i32, %c0_i32_0 : i32, i32
  }
  func.func @transform_12(%arg0: i32) -> (i32, i32) {
    %c0_i32 = arith.constant 0 : i32
    %c0_i32_0 = arith.constant 0 : i32
    %c0_i32_1 = arith.constant 0 : i32
    return %c0_i32, %c0_i32_0 : i32, i32
  }
  func.func @transform_13(%arg0: i32) -> (i32, i32) {
    %c0_i32 = arith.constant 0 : i32
    %c0_i32_0 = arith.constant 0 : i32
    %c0_i32_1 = arith.constant 0 : i32
    return %c0_i32, %c0_i32_0 : i32, i32
  }
  func.func @transform_14(%arg0: i32) -> (i32, i32) {
    %c0_i32 = arith.constant 0 : i32
    %c0_i32_0 = arith.constant 0 : i32
    %c0_i32_1 = arith.constant 0 : i32
    return %c0_i32, %c0_i32_0 : i32, i32
  }
  func.func @transform_15(%arg0: i32) -> (i32, i32) {
    %c0_i32 = arith.constant 0 : i32
    %c0_i32_0 = arith.constant 0 : i32
    %c0_i32_1 = arith.constant 0 : i32
    return %c0_i32, %c0_i32_0 : i32, i32
  }
  func.func @transform_16(%arg0: i32) -> (i32, i32) {
    %c0_i32 = arith.constant 0 : i32
    %c0_i32_0 = arith.constant 0 : i32
    %c0_i32_1 = arith.constant 0 : i32
    return %c0_i32, %c0_i32_0 : i32, i32
  }
  func.func @transform_17(%arg0: i32) -> (i32, i32) {
    %c0_i32 = arith.constant 0 : i32
    %c0_i32_0 = arith.constant 0 : i32
    %c0_i32_1 = arith.constant 0 : i32
    return %c0_i32, %c0_i32_0 : i32, i32
  }
  func.func @transform_18(%arg0: i32) -> (i32, i32) {
    %c0_i32 = arith.constant 0 : i32
    %c0_i32_0 = arith.constant 0 : i32
    %c0_i32_1 = arith.constant 0 : i32
    return %c0_i32, %c0_i32_0 : i32, i32
  }
  func.func @transform_19(%arg0: i32) -> (i32, i32) {
    %c0_i32 = arith.constant 0 : i32
    %c0_i32_0 = arith.constant 0 : i32
    %c0_i32_1 = arith.constant 0 : i32
    return %c0_i32, %c0_i32_0 : i32, i32
  }
  func.func @transform_20(%arg0: i32) -> (i32, i32) {
    %c0_i32 = arith.constant 0 : i32
    %c0_i32_0 = arith.constant 0 : i32
    %c0_i32_1 = arith.constant 0 : i32
    return %c0_i32, %c0_i32_0 : i32, i32
  }
  func.func @transform_21(%arg0: i32) -> (i32, i32) {
    %c0_i32 = arith.constant 0 : i32
    %c0_i32_0 = arith.constant 0 : i32
    %c0_i32_1 = arith.constant 0 : i32
    return %c0_i32, %c0_i32_0 : i32, i32
  }
  func.func @transform_22(%arg0: i32) -> (i32, i32) {
    %c0_i32 = arith.constant 0 : i32
    %c0_i32_0 = arith.constant 0 : i32
    %c0_i32_1 = arith.constant 0 : i32
    return %c0_i32, %c0_i32_0 : i32, i32
  }
  func.func @transform_23(%arg0: i32) -> (i32, i32) {
    %c0_i32 = arith.constant 0 : i32
    %c0_i32_0 = arith.constant 0 : i32
    %c0_i32_1 = arith.constant 0 : i32
    return %c0_i32, %c0_i32_0 : i32, i32
  }
  func.func @transform_24(%arg0: i32) -> (i32, i32) {
    %c0_i32 = arith.constant 0 : i32
    %c0_i32_0 = arith.constant 0 : i32
    %c0_i32_1 = arith.constant 0 : i32
    return %c0_i32, %c0_i32_0 : i32, i32
  }
  func.func @transform_25(%arg0: i32) -> (i32, i32) {
    %c0_i32 = arith.constant 0 : i32
    %c0_i32_0 = arith.constant 0 : i32
    %c0_i32_1 = arith.constant 0 : i32
    return %c0_i32, %c0_i32_0 : i32, i32
  }
  func.func @transform_26(%arg0: i32) -> (i32, i32, i32) {
    %c0_i32 = arith.constant 0 : i32
    %c0_i32_0 = arith.constant 0 : i32
    %c0_i32_1 = arith.constant 0 : i32
    return %arg0, %c0_i32, %c0_i32_0 : i32, i32, i32
  }
}

</mosaic_0001>

<bundles_post_ra>
// kernel: tile.8
= control target key start
LH: loop header
LB: loop body
LE: loop exit
PB: predicated region body
PF: predicated region fallthrough
CT: control target
= control target key end

     0   :  { %s22_s0 = inlined_call_operand.vmem [shape: f32[8], index: 0, kind: input, shape index: {}]   ;;  %s23_s1 = inlined_call_operand.vmem [shape: f32[8,8], index: 1, kind: output, shape index: {}]  }
   0x1   :  { %v4_v0 = vld [vmem:[%s22_s0] ss:$0 sm:$0xff] }
   0x2   :  { %5 = vst [vmem:[%s23_s1] sm:$0xff] %v4_v0 }

// kernel: tile.0
= control target key start
LH: loop header
LB: loop body
LE: loop exit
PB: predicated region body
PF: predicated region fallthrough
CT: control target
= control target key end

     0   :  { %vm3_vm0 = vcmask 7168   ;;  %s84_s8 = smov 125   ;;  %s85_s13 = smov 126   ;;  %s167_s0 = inlined_call_operand.vmem [shape: f32[8,8], index: 0, kind: input, shape index: {}]   ;;  %s168_s1 = inlined_call_operand.vmem [shape: f32[64,1], index: 1, kind: output, shape index: {}]  }
   0x1   :  { %v6_v0 = vld [vmem:[%s167_s0] sm:$0xff]   ;;  %s83_s0 = smov 127   ;;  %s86_s14 = smov 124  }
   0x2   :  { %7 = vrot.lane.b32.xlu0 %v6_v0, %s83_s0  ;;  %23 = vrot.lane.b32.xlu1 %v6_v0, %s84_s8  ;;  %4 = vst.msk [vmem:[%s168_s1] ss:$8 sm:$0xf] %vm3_vm0, %v6_v0   ;;  %5 = vst.msk [vmem:[%s168_s1] ss:$8 sm:$0xf0] %vm3_vm0, %v6_v0  }
   0x3   :  { %s87_s15 = smov 123   ;;  %s88_s16 = smov 122  }
   0x4   :  { %s89_s17 = smov 121  }
   0x6   :  { %15 = vrot.lane.b32.xlu0 %v6_v0, %s85_s13  ;;  %31 = vrot.lane.b32.xlu1 %v6_v0, %s86_s14 }
   0xa   :  { %39 = vrot.lane.b32.xlu0 %v6_v0, %s87_s15  ;;  %47 = vrot.lane.b32.xlu1 %v6_v0, %s88_s16 }
   0xe   :  { %55 = vrot.lane.b32.xlu0 %v6_v0, %s89_s17 }
  0x74   :  { %v8_v1 = vpop.permute.xlu0 %7   ;;  %v24_v2 = vpop.permute.xlu1 %23  }
  0x75   :  { %62 = vst.msk [vmem:[%s168_s1 + $0x1] ss:$8 sm:$0xf] %vm3_vm0, %v8_v1   ;;  %63 = vst.msk [vmem:[%s168_s1 + $0x1] ss:$8 sm:$0xf0] %vm3_vm0, %v8_v1  }
  0x76   :  { %66 = vst.msk [vmem:[%s168_s1 + $0x3] ss:$8 sm:$0xf] %vm3_vm0, %v24_v2   ;;  %67 = vst.msk [vmem:[%s168_s1 + $0x3] ss:$8 sm:$0xf0] %vm3_vm0, %v24_v2  }
  0x78   :  { %v16_v3 = vpop.permute.xlu0 %15   ;;  %v32_v4 = vpop.permute.xlu1 %31  }
  0x79   :  { %64 = vst.msk [vmem:[%s168_s1 + $0x2] ss:$8 sm:$0xf] %vm3_vm0, %v16_v3   ;;  %65 = vst.msk [vmem:[%s168_s1 + $0x2] ss:$8 sm:$0xf0] %vm3_vm0, %v16_v3  }
  0x7a   :  { %68 = vst.msk [vmem:[%s168_s1 + $0x4] ss:$8 sm:$0xf] %vm3_vm0, %v32_v4   ;;  %69 = vst.msk [vmem:[%s168_s1 + $0x4] ss:$8 sm:$0xf0] %vm3_vm0, %v32_v4  }
  0x7c   :  { %v40_v5 = vpop.permute.xlu0 %39   ;;  %v48_v6 = vpop.permute.xlu1 %47  }
  0x7d   :  { %70 = vst.msk [vmem:[%s168_s1 + $0x5] ss:$8 sm:$0xf] %vm3_vm0, %v40_v5   ;;  %71 = vst.msk [vmem:[%s168_s1 + $0x5] ss:$8 sm:$0xf0] %vm3_vm0, %v40_v5  }
  0x7e   :  { %72 = vst.msk [vmem:[%s168_s1 + $0x6] ss:$8 sm:$0xf] %vm3_vm0, %v48_v6   ;;  %73 = vst.msk [vmem:[%s168_s1 + $0x6] ss:$8 sm:$0xf0] %vm3_vm0, %v48_v6  }
  0x80   :  { %v56_v7 = vpop.permute.xlu0 %55  }
  0x81   :  { %74 = vst.msk [vmem:[%s168_s1 + $0x7] ss:$8 sm:$0xf] %vm3_vm0, %v56_v7   ;;  %75 = vst.msk [vmem:[%s168_s1 + $0x7] ss:$8 sm:$0xf0] %vm3_vm0, %v56_v7  }

// kernel: ewma_smooth_forward.1
= control target key start
LH: loop header
LB: loop body
LE: loop exit
PB: predicated region body
PF: predicated region fallthrough
CT: control target
= control target key end

     0   :  { %s8169_s0 = inlined_call_operand.vmem [shape: f32[2,64,1], index: 0, kind: input, shape index: {}]   ;;  %s8170_s1 = inlined_call_operand.vmem [shape: f32[64,1], index: 1, kind: input, shape index: {}]   ;;  %s8171_s2 = inlined_call_operand.vmem [shape: f32[64,64], index: 2, kind: input, shape index: {}]   ;;  %s8172_s3 = inlined_call_operand.vmem [shape: f32[64,64], index: 3, kind: input, shape index: {}]   ;;  %s8173_s4 = inlined_call_operand.vmem [shape: f32[64,64], index: 4, kind: input, shape index: {}]   ;;  %s8174_s5 = inlined_call_operand.vmem [shape: f32[1,64], index: 5, kind: input, shape index: {}]   ;;  %s8175_s6 = inlined_call_operand.vmem [shape: f32[1,64], index: 6, kind: input, shape index: {}]   ;;  %s8176_s7 = inlined_call_operand.vmem [shape: bf16[64,192], index: 7, kind: input, shape index: {}]   ;;  %s8177_s8 = inlined_call_operand.vmem [shape: f32[1,192], index: 8, kind: input, shape index: {}]   ;;  %s8178_s9 = inlined_call_operand.vmem [shape: bf16[64,64], index: 9, kind: input, shape index: {}]   ;;  %s8179_s10 = inlined_call_operand.vmem [shape: f32[1,64], index: 10, kind: input, shape index: {}]   ;;  %s8180_s11 = inlined_call_operand.vmem [shape: bf16[64,192], index: 11, kind: input, shape index: {}]   ;;  %s8181_s12 = inlined_call_operand.vmem [shape: f32[1,192], index: 12, kind: input, shape index: {}]   ;;  %s8182_s13 = inlined_call_operand.vmem [shape: bf16[64,64], index: 13, kind: input, shape index: {}]   ;;  %s8183_s14 = inlined_call_operand.vmem [shape: f32[1,64], index: 14, kind: input, shape index: {}]   ;;  %s8184_s15 = inlined_call_operand.vmem [shape: bf16[64,64], index: 15, kind: input, shape index: {}]   ;;  %s8185_s16 = inlined_call_operand.vmem [shape: bf16[64,64], index: 16, kind: input, shape index: {}]   ;;  %s8186_s17 = inlined_call_operand.vmem [shape: f32[1,64], index: 17, kind: input, shape index: {}]   ;;  %s8187_s18 = inlined_call_operand.vmem [shape: bf16[64,128], index: 18, kind: input, shape index: {}]   ;;  %s8188_s19 = inlined_call_operand.vmem [shape: f32[1,128], index: 19, kind: input, shape index: {}]   ;;  %s8189_s20 = inlined_call_operand.vmem [shape: bf16[128,64], index: 20, kind: input, shape index: {}]   ;;  %s8190_s21 = inlined_call_operand.vmem [shape: f32[1,64], index: 21, kind: input, shape index: {}]   ;;  %s8191_s22 = inlined_call_operand.vmem [shape: f32[1,64], index: 22, kind: input, shape index: {}]   ;;  %s8192_s23 = inlined_call_operand.vmem [shape: f32[1,64], index: 23, kind: input, shape index: {}]   ;;  %s8193_s24 = inlined_call_operand.vmem [shape: f32[1,64], index: 24, kind: input, shape index: {}]   ;;  %s8194_s25 = inlined_call_operand.<no memory space> [shape: f32[1,1], index: 25, kind: input, shape index: {}]   ;;  %s8195_s26 = inlined_call_operand.vmem [shape: f32[2,64,1], index: 26, kind: output, shape index: {}]  }
   0x1   :  { %8241 = sst [smem:[#allocation15_spill]] %s8169_s0  ;;  %v31_v0 = vstv %s8194_s25 }
   0x2   :  { %8242 = sst [smem:[#allocation16_spill]] %s8170_s1  ;;  %32 = vst [vmem:[#allocation2] sm:$0x1] %v31_v0 }
   0x3   :  { %8243 = sst [smem:[#allocation17_spill]] %s8171_s2 }
   0x4   :  { %8244 = sst [smem:[#allocation18_spill]] %s8172_s3 }
   0x5   :  { %8245 = sst [smem:[#allocation19_spill]] %s8173_s4 }
   0x6   :  { %8246 = sst [smem:[#allocation20_spill]] %s8174_s5 }
   0x7   :  { %8247 = sst [smem:[#allocation21_spill]] %s8175_s6 }
   0x8   :  { %8248 = sst [smem:[#allocation22_spill]] %s8176_s7  ;;  %s6277_s7 = smov 0  }
   0x9   :  { %8249 = sst [smem:[#allocation23_spill]] %s8177_s8 }
   0xa   :  { %8250 = sst [smem:[#allocation24_spill]] %s8178_s9 }
   0xb   :  { %8251 = sst [smem:[#allocation25_spill]] %s8179_s10 }
   0xc LB: > { %8252 = sst [smem:[#allocation3_spill]] %s6129_s7  ;;  %s4873_s28 = sadd.s32 4294967295, %s6129_s7   ;;  %s6129_s7 = sphi %s6277_s7, %s38_s7  }
   0xd   : > { %p4877_p0 = scmp.ge.s32.totalorder %s6129_s7, 1  ;;  %p714_p1 = scmp.lt.s32.totalorder %s6129_s7, 3 }
   0xf   : > { %p715_p2 = pnand %p4877_p0, %p714_p1 }
  0x11   : > { %718 = sbr.rel (%p715_p2) target bundleno = 6028 (0x178c), region = 124 }
  0x16   : > { %p784_p3 = scmp.lt.s32.totalorder %s4873_s28, 1  ;;  %v8205_v1 = vmov 0   ;;  %s8253_s4 = sld [smem:[#allocation16_spill]]  ;;  %vm977_vm0 = vcmask 523264   ;;  %vm1091_vm1 = vcmask 130048   ;;  %vm2324_vm2 = vcmask 261120  }
  0x17   : > { %5622 = vset.pattern.permute.xlu1 %v8205_v1  ;;  %5621 = vset.pattern.permute.xlu0 %v8205_v1  ;;  %s8254_s9 = sld [smem:[#allocation22_spill]]  ;;  %s8220_s1 = smov 48   ;;  %vm2333_vm3 = vcmask 392192   ;;  %vm4809_vm4 = vcmask 7168  }
  0x18   : > { %s8312_s28 = smov (!%p784_p3, %s4873_s28), 1  ;;  %1022 = vmatprep.mubr.bf16.mxu0 %v8205_v1  ;;  %s8255_s0 = sld [smem:[#allocation15_spill]] }
  0x19   : > { %s8213_s5 = sshll.u32 %s8312_s28, 6  ;;  %s8256_s30 = sld [smem:[#allocation20_spill]] }
  0x1a   : > { %s8257_s6 = sld [smem:[#allocation21_spill]]  ;;  %s8216_s27 = smov 112  }
  0x1b   : > { %s8258_s3 = sld [smem:[#allocation17_spill]]  ;;  %s8236_s2 = smov 32  }
  0x1c   : > { %v805_v2 = vld [vmem:[%s8253_s4 + $0x10] sm:$0xff]  ;;  %v803_v5 = vld [vmem:[%s8253_s4] sm:$0xff]  ;;  %v806_v6 = vld [vmem:[%s8253_s4 + $0x18] sm:$0xff]  ;;  %s8267_s10 = sld [smem:[#allocation23_spill]]  ;;  %s8222_s25 = smov 16  }
  0x1d   : > { %v5743_v3 = vld [vmem:[%s8254_s9 + $0x34] ss:$8 sps:$4 sm:$0xff]   ;;  %v5745_v4 = vld [vmem:[%s8254_s9 + $0x30] ss:$8 sps:$4 sm:$0xff]   ;;  %v804_v7 = vld [vmem:[%s8253_s4 + $0x8] sm:$0xff]  ;;  %s8268_s29 = sld [smem:[#allocation18_spill]] }
  0x1e   : > { %s6314_s7 = scalar_lea.vmem %s8255_s0, %s8213_s5  ;;  %998 = vmatprep.subr.bf16.mxu0 %v5743_v3  ;;  %v5746_v8 = vld [vmem:[%s8254_s9 + $0x24] ss:$8 sps:$4 sm:$0xff]   ;;  %v5748_v20 = vld [vmem:[%s8254_s9 + $0x20] ss:$8 sps:$4 sm:$0xff]   ;;  %v5749_v22 = vld [vmem:[%s8254_s9 + $0x14] ss:$8 sps:$4 sm:$0xff]  }
  0x1f   : > { %v797_v9 = vld [vmem:[%s6314_s7 + $0x10] sm:$0xff]  ;;  %v795_v10 = vld [vmem:[%s6314_s7] sm:$0xff]  ;;  %v798_v11 = vld [vmem:[%s6314_s7 + $0x18] sm:$0xff]  ;;  %999 = vmatpush1.bf16.msra.mxu0 %v5745_v4  ;;  %s8234_s8 = smov 80   ;;  %s8276_s0 = smov 16  }
  0x20   : > { %v813_v12 = vmul.f32 %v805_v2, %v797_v9  ;;  %v811_v13 = vmul.f32 %v803_v5, %v795_v10  ;;  %v796_v14 = vld [vmem:[%s6314_s7 + $0x8] sm:$0xff]  ;;  %1000 = vmatprep.subr.bf16.mxu0 %v5746_v8  ;;  %v807_v16 = vld [vmem:[%s8253_s4 + $0x20] sm:$0xff]  ;;  %v814_v17 = vmul.f32 %v806_v6, %v798_v11  ;;  %v5751_v23 = vld [vmem:[%s8254_s9 + $0x10] ss:$8 sps:$4 sm:$0xff]   ;;  %s8281_s5 = smov 48  }
  0x21   : > { %v808_v15 = vld [vmem:[%s8253_s4 + $0x28] sm:$0xff]  ;;  %v812_v18 = vmul.f32 %v804_v7, %v796_v14  ;;  %v799_v21 = vld [vmem:[%s6314_s7 + $0x20] sm:$0xff]  ;;  %v802_v24 = vld [vmem:[%s6314_s7 + $0x38] sm:$0xff] }
  0x22   : > { %832 = vperm.xlu1 %5622, %v813_v12   ;;  %822 = vperm.xlu0 %5621, %v811_v13   ;;  %v800_v19 = vld [vmem:[%s6314_s7 + $0x28] sm:$0xff]  ;;  %v810_v25 = vld [vmem:[%s8253_s4 + $0x38] sm:$0xff]  ;;  %v801_v26 = vld [vmem:[%s6314_s7 + $0x30] sm:$0xff]  ;;  %v815_v30 = vmul.f32 %v807_v16, %v799_v21 }
  0x23   : > { %1001 = vmatpush1.bf16.msra.mxu0 %v5748_v20  ;;  %v809_v27 = vld [vmem:[%s8253_s4 + $0x30] sm:$0xff]  ;;  %v5752_v28 = vld [vmem:[%s8254_s9 + $0x4] ss:$8 sps:$4 sm:$0xff]   ;;  %v816_v29 = vmul.f32 %v808_v15, %v800_v19  ;;  %v5754_v31 = vld [vmem:[%s8254_s9] ss:$8 sps:$4 sm:$0xff]   ;;  %v818_v32 = vmul.f32 %v810_v25, %v802_v24  ;;  %s8294_s4 = smov 80  }
  0x24   : > { %1002 = vmatprep.subr.bf16.mxu0 %v5749_v22  ;;  %v817_v33 = vmul.f32 %v809_v27, %v801_v26  ;;  %v4882_v34 = vld [vmem:[%s8256_s30] ss:$0 sm:$0xff]  ;;  %v890_v44 = vld [vmem:[%s8258_s3 + $0x8] sm:$0xff]  ;;  %v891_v53 = vld [vmem:[%s8258_s3 + $0x10] sm:$0xff]  ;;  %s8280_s30 = sld [smem:[#allocation24_spill]] }
  0x25   : > { %v4883_v38 = vld [vmem:[%s8257_s6] ss:$0 sm:$0xff]  ;;  %v892_v54 = vld [vmem:[%s8258_s3 + $0x18] sm:$0xff]  ;;  %v894_v0 = vld [vmem:[%s8258_s3 + $0x28] sm:$0xff]  ;;  %s8218_s6 = smov 64  }
  0x26   : > { %837 = vperm.xlu1 %5622, %v814_v17   ;;  %827 = vperm.xlu0 %5621, %v812_v18   ;;  %v889_v42 = vld [vmem:[%s8258_s3] sm:$0xff]  ;;  %v896_v12 = vld [vmem:[%s8258_s3 + $0x38] sm:$0xff]  ;;  %v895_v13 = vld [vmem:[%s8258_s3 + $0x30] sm:$0xff]  ;;  %v927_v17 = vlaneseq }
  0x27   : > { %1003 = vmatpush1.bf16.msra.mxu0 %v5751_v23  ;;  %v893_v2 = vld [vmem:[%s8258_s3 + $0x20] sm:$0xff] }
  0x28   : > { %1004 = vmatprep.subr.bf16.mxu0 %v5752_v28  ;;  %v6427_v18 = vshrl.u32 %v927_v17, 7  ;;  %v925_v20 = vld [vmem:[%s8267_s10] sm:$0x3]  ;;  %s8214_s10 = smov 96  }
  0x2a   : > { %847 = vperm.xlu1 %5622, %v816_v29   ;;  %842 = vperm.xlu0 %5621, %v815_v30   ;;  %v8204_v19 = vsub.s32 0, %v6427_v18 }
  0x2b   : > { %1005 = vmatpush1.bf16.msra.mxu0 %v5754_v31 }
  0x2c   : > { %v930_v21 = vrot.slane %v925_v20, %v8204_v19 }
  0x2e   : > { %857 = vperm.xlu1 %5622, %v818_v32   ;;  %852 = vperm.xlu0 %5621, %v817_v33  }
  0x9d   : > { %v833_v35 = vpop.permute.xlu1 %832  ;;  %v823_v36 = vpop.permute.xlu0 %822 }
  0x9e   : > { %v866_v37 = vmul.f32 %v4882_v34, %v823_v36  ;;  %v868_v45 = vmul.f32 %v4882_v34, %v833_v35 }
  0xa0   : > { %v881_v40 = vadd.f32 %v4883_v38, %v866_v37  ;;  %v883_v50 = vadd.f32 %v4883_v38, %v868_v45 }
  0xa1   : > { %v828_v39 = vpop.permute.xlu0 %827  ;;  %v838_v43 = vpop.permute.xlu1 %837 }
  0xa2   : > { %v867_v41 = vmul.f32 %v4882_v34, %v828_v39  ;;  %v869_v46 = vmul.f32 %v4882_v34, %v838_v43  ;;  %v6366_v48 = vadd.f32 %v889_v42, %v881_v40  ;;  %v6383_v57 = vadd.f32 %v891_v53, %v883_v50 }
  0xa3   : > { %v8203_v43 = vsub.s32 1, %v6427_v18 }
  0xa4   : > { %v882_v47 = vadd.f32 %v4883_v38, %v867_v41  ;;  %8259 = vst [vmem:[#allocation4_spill] sm:$0xff] %v6366_v48  ;;  %v884_v51 = vadd.f32 %v4883_v38, %v869_v46  ;;  %8261 = vst [vmem:[#allocation6_spill] sm:$0xff] %v6383_v57 }
  0xa5   : > { %v848_v55 = vpop.permute.xlu1 %847  ;;  %v843_v56 = vpop.permute.xlu0 %842 }
  0xa6   : > { %v6368_v49 = vadd.f32 %v890_v44, %v882_v47  ;;  %v6385_v58 = vadd.f32 %v892_v54, %v884_v51  ;;  %v871_v59 = vmul.f32 %v4882_v34, %v848_v55  ;;  %v870_v60 = vmul.f32 %v4882_v34, %v843_v56 }
  0xa7   : > { %v934_v47 = vrot.slane %v925_v20, %v8203_v43 }
  0xa8   : > { %8260 = vst [vmem:[#allocation5_spill] sm:$0xff] %v6368_v49  ;;  %v6372_v52 = vpack.c.bf16 %v6368_v49, %v6366_v48  ;;  %8262 = vst [vmem:[#allocation7_spill] sm:$0xff] %v6385_v58  ;;  %v886_v61 = vadd.f32 %v4883_v38, %v871_v59  ;;  %v885_v62 = vadd.f32 %v4883_v38, %v870_v60 }
  0xa9   : > { %v6389_v63 = vpack.c.bf16 %v6385_v58, %v6383_v57  ;;  %v858_v3 = vpop.permute.xlu1 %857  ;;  %v853_v4 = vpop.permute.xlu0 %852 }
  0xaa   : > { %4892 = vmatmul.mubr.msk.bf16.vlgmr.msra.gmra.mxu0 %vm977_vm0, %v6372_v52  ;;  %v6400_v5 = vadd.f32 %v894_v0, %v886_v61  ;;  %v6402_v6 = vadd.f32 %v893_v2, %v885_v62  ;;  %v873_v7 = vmul.f32 %v4882_v34, %v858_v3  ;;  %v872_v8 = vmul.f32 %v4882_v34, %v853_v4 }
  0xab   : > { %1032 = vmatprep.mubr.bf16.mxu0 %v8205_v1 }
  0xac   : > { %8263 = vst [vmem:[#allocation8_spill] sm:$0xff] %v6400_v5  ;;  %8264 = vst [vmem:[#allocation9_spill] sm:$0xff] %v6402_v6  ;;  %v888_v9 = vadd.f32 %v4883_v38, %v873_v7  ;;  %v887_v10 = vadd.f32 %v4883_v38, %v872_v8  ;;  %v6406_v11 = vpack.c.bf16 %v6400_v5, %v6402_v6 }
  0xae   : > { %v6417_v14 = vadd.f32 %v896_v12, %v888_v9  ;;  %v6419_v15 = vadd.f32 %v895_v13, %v887_v10 }
  0xb0   : > { %8265 = vst [vmem:[#allocation10_spill] sm:$0xff] %v6417_v14  ;;  %8266 = vst [vmem:[#allocation11_spill] sm:$0xff] %v6419_v15  ;;  %v6423_v16 = vpack.c.bf16 %v6417_v14, %v6419_v15 }
  0xb2   : > { %4893 = vmatmul.mubr.msk.bf16.gmra.mxu0 %vm977_vm0, %v6389_v63 }
  0xb3   : > { %1042 = vmatprep.mubr.bf16.mxu0 %v8205_v1 }
  0xba   : > { %4894 = vmatmul.mubr.msk.bf16.gmra.mxu0 %vm977_vm0, %v6406_v11 }
  0xbb   : > { %1052 = vmatprep.mubr.bf16.mxu0 %v8205_v1 }
  0xc2   : > { %4895 = vmatmul.mubr.msk.bf16.gmra.mxu0 %vm977_vm0, %v6423_v16 }
 0x16a   : > { %v1024_v22 = vpop.f32.mrf.mxu0 }
 0x16b   : > { %v1025_v24 = vadd.f32 %v1024_v22, %v930_v21 }
 0x16c   : > { %v1026_v23 = vpop.f32.mrf.mxu0 }
 0x16d   : > { %v1063_v28 = vmul.f32 0.25, %v1025_v24  ;;  %v1027_v20 = vadd.f32 %v1026_v23, %v934_v47 }
 0x16e   : > { %v1028_v25 = vpop.f32.mrf.mxu0 }
 0x16f   : > { %v1029_v26 = vadd.f32 %v1028_v25, %v930_v21 }
 0x170   : > { %v1030_v27 = vpop.f32.mrf.mxu0 }
 0x171   : > { %v1064_v29 = vmul.f32 0.25, %v1029_v26  ;;  %v6444_v45 = vpack.c.bf16 %v1029_v26, %v1025_v24  ;;  %v1031_v10 = vadd.f32 %v1030_v27, %v934_v47 }
 0x172   : > { %v1034_v30 = vpop.f32.mrf.mxu0 }
 0x173   : > { %v6435_v31 = vpack.c.bf16 %v1064_v29, %v1063_v28  ;;  %v1035_v61 = vadd.f32 %v1034_v30, %v930_v21  ;;  %v6479_v22 = vpack.c.bf16 %v1031_v10, %v1027_v20  ;;  %v6553_v10 = vld [vmem:[%s8268_s29 + $0x8] sm:$0xff]  ;;  %v6558_v20 = vld [vmem:[%s8268_s29 + $0x30] sm:$0xff] }
 0x174   : > { %v1036_v32 = vpop.f32.mrf.mxu0 }
 0x175   : > { %5221 = vmatprep.mubr.msk.bf16.mxu1 %vm1091_vm1, %v6435_v31  ;;  %v1065_v8 = vmul.f32 0.25, %v1035_v61  ;;  %v1037_v9 = vadd.f32 %v1036_v32, %v934_v47 }
 0x176   : > { %v1038_v33 = vpop.f32.mrf.mxu0 }
 0x177   : > { %v1039_v53 = vadd.f32 %v1038_v33, %v930_v21 }
 0x178   : > { %v1040_v34 = vpop.f32.mrf.mxu0 }
 0x179   : > { %v1066_v2 = vmul.f32 0.25, %v1039_v53  ;;  %v1041_v3 = vadd.f32 %v1040_v34, %v934_v47  ;;  %v6461_v7 = vpack.c.bf16 %v1039_v53, %v1035_v61 }
 0x17a   : > { %v1044_v35 = vpop.f32.mrf.mxu0 }
 0x17b   : > { %v1045_v38 = vadd.f32 %v1044_v35, %v930_v21  ;;  %v6469_v12 = vpack.c.bf16 %v1066_v2, %v1065_v8  ;;  %v6471_v13 = vpack.c.bf16 %v1041_v3, %v1037_v9  ;;  %v6548_v8 = vld [vmem:[%s8268_s29 + $0x18] sm:$0xff] }
 0x17c   : > { %v1046_v36 = vpop.f32.mrf.mxu0 }
 0x17d   : > { %v1047_v62 = vadd.f32 %v1046_v36, %v934_v47  ;;  %v1067_v25 = vmul.f32 0.25, %v1045_v38 }
 0x17e   : > { %v1048_v37 = vpop.f32.mrf.mxu0 }
 0x17f   : > { %v1049_v39 = vadd.f32 %v1048_v37, %v930_v21 }
 0x180   : > { %v1050_v40 = vpop.f32.mrf.mxu0 }
 0x181   : > { %v6439_v41 = vpack.c.bf16 %v1049_v39, %v1045_v38  ;;  %v1051_v55 = vadd.f32 %v1050_v40, %v934_v47  ;;  %v1068_v23 = vmul.f32 0.25, %v1049_v39 }
 0x182   : > { %v1054_v42 = vpop.f32.mrf.mxu0 }
 0x183   : > { %1087 = vrot.lane.b32.xlu1 %v6439_v41, %s8218_s6  ;;  %v1055_v50 = vadd.f32 %v1054_v42, %v930_v21  ;;  %v6458_v4 = vpack.c.bf16 %v1051_v55, %v1047_v62  ;;  %v6494_v26 = vpack.c.bf16 %v1068_v23, %v1067_v25  ;;  %v6530_v55 = vld [vmem:[%s8268_s29 + $0x10] sm:$0xff] }
 0x184   : > { %v1056_v44 = vpop.f32.mrf.mxu0 }
 0x185   : > { %v1057_v56 = vadd.f32 %v1056_v44, %v934_v47 }
 0x186   : > { %v1058_v46 = vpop.f32.mrf.mxu0 }
 0x187   : > { %v1059_v51 = vadd.f32 %v1058_v46, %v930_v21  ;;  %1083 = vrot.lane.b32.xlu1 %v6444_v45, %s8218_s6  ;;  %v1069_v21 = vmul.f32 0.25, %v1055_v50 }
 0x188   : > { %v1060_v54 = vpop.f32.mrf.mxu0 }
 0x189   : > { %v6450_v59 = vpack.c.bf16 %v1059_v51, %v1055_v50  ;;  %v1061_v60 = vadd.f32 %v1060_v54, %v934_v47  ;;  %v1070_v17 = vmul.f32 0.25, %v1059_v51 }
 0x18b   : > { %v6452_v0 = vpack.c.bf16 %v1061_v60, %v1057_v56  ;;  %1370 = vrot.lane.b32.xlu1 %v6439_v41, %s8220_s1  ;;  %1089 = vrot.lane.b32.xlu0 %v6450_v59, %s8218_s6  ;;  %v6481_v24 = vpack.c.bf16 %v1070_v17, %v1069_v21  ;;  %v6535_v60 = vld [vmem:[%s8268_s29] sm:$0xff] }
 0x18d   : > { %5229 = vmatprep.subr.bf16.mxu0 %v6452_v0 }
 0x18e   : > { %5230 = vmatpush3.bf16.msra.mxu0 %v6452_v0 }
 0x18f   : > { %1366 = vrot.lane.b32.xlu1 %v6444_v45, %s8220_s1  ;;  %5231 = vmatprep.subr.bf16.mxu0 %v6458_v4 }
 0x190   : > { %1085 = vrot.lane.b32.xlu0 %v6461_v7, %s8218_s6 }
 0x192   : > { %5232 = vmatpush3.bf16.msra.mxu0 %v6458_v4 }
 0x193   : > { %1360 = vrot.lane.b32.xlu1 %v6469_v12, %s8216_s27  ;;  %5233 = vmatprep.subr.bf16.mxu0 %v6471_v13 }
 0x194   : > { %1372 = vrot.lane.b32.xlu0 %v6450_v59, %s8220_s1 }
 0x196   : > { %5234 = vmatpush3.bf16.msra.mxu0 %v6471_v13 }
 0x197   : > { %5235 = vmatprep.subr.bf16.mxu0 %v6479_v22  ;;  %1364 = vrot.lane.b32.xlu1 %v6481_v24, %s8216_s27 }
 0x198   : > { %1368 = vrot.lane.b32.xlu0 %v6461_v7, %s8220_s1  ;;  %s8292_s1 = sld [smem:[#allocation19_spill]] }
 0x19a   : > { %5236 = vmatpush3.bf16.msra.mxu0 %v6479_v22 }
 0x19b   : > { %1565 = vrot.lane.b32.xlu1 %v6452_v0, %s8216_s27 }
 0x19c   : > { %1358 = vrot.lane.b32.xlu0 %v6435_v31, %s8216_s27 }
 0x1a0   : > { %1362 = vrot.lane.b32.xlu0 %v6494_v26, %s8216_s27 }
 0x1f5   : > { %v1088_v27 = vpop.permute.xlu1 %1087 }
 0x1f6   : > { %v1111_v35 = vsel %vm1091_vm1, %v1088_v27, 0 }
 0x1f9   : > { %v1084_v28 = vpop.permute.xlu1 %1083 }
 0x1fa   : > { %v1105_v40 = vsel %vm1091_vm1, %v1084_v28, 0 }
 0x1fd   : > { %v1371_v29 = vpop.permute.xlu1 %1370  ;;  %v1090_v30 = vpop.permute.xlu0 %1089 }
 0x1fe   : > { %5573 = vmatprep.subr.msk.bf16.mxu1 %vm1091_vm1, %v1090_v30  ;;  %v1114_v32 = vsel %vm1091_vm1, %v1090_v30, 0  ;;  %v1393_v50 = vsel %vm1091_vm1, %v1371_v29, 0 }
 0x1ff   : > { %5214 = vmatpush3.bf16.xpose.msra.mxu1 %v1114_v32  ;;  %v6576_v32 = vld [vmem:[%s8268_s29 + $0x20] sm:$0xff] }
 0x200   : > { %5574 = vmatprep.subr.msk.bf16.mxu1 %vm1091_vm1, %v1088_v27 }
 0x201   : > { %v1367_v33 = vpop.permute.xlu1 %1366 }
 0x202   : > { %v1086_v36 = vpop.permute.xlu0 %1085  ;;  %v1387_v53 = vsel %vm1091_vm1, %v1367_v33, 0 }
 0x203   : > { %v1108_v39 = vsel %vm1091_vm1, %v1086_v36, 0 }
 0x205   : > { %v1361_v34 = vpop.permute.xlu1 %1360 }
 0x206   : > { %v1373_v42 = vpop.permute.xlu0 %1372 }
 0x207   : > { %5216 = vmatpush3.bf16.xpose.msra.mxu1 %v1111_v35  ;;  %v1396_v44 = vsel %vm1091_vm1, %v1373_v42, 0 }
 0x208   : > { %5575 = vmatprep.subr.msk.bf16.mxu1 %vm1091_vm1, %v1086_v36  ;;  %v6588_v36 = vld [vmem:[%s8268_s29 + $0x28] sm:$0xff] }
 0x209   : > { %v1365_v37 = vpop.permute.xlu1 %1364 }
 0x20a   : > { %v1369_v46 = vpop.permute.xlu0 %1368 }
 0x20b   : > { %v1390_v51 = vsel %vm1091_vm1, %v1369_v46, 0 }
 0x20d   : > { %v6503_v38 = vpop.permute.xlu1 %1565 }
 0x20e   : > { %5261 = vmatprep.subr.bf16.mxu0 %v6503_v38  ;;  %v1359_v47 = vpop.permute.xlu0 %1358 }
 0x20f   : > { %5218 = vmatpush3.bf16.xpose.msra.mxu1 %v1108_v39 }
 0x210   : > { %5576 = vmatprep.subr.msk.bf16.mxu1 %vm1091_vm1, %v1084_v28 }
 0x212   : > { %v1363_v54 = vpop.permute.xlu0 %1362 }
 0x217   : > { %5220 = vmatpush3.bf16.xpose.msra.mxu1 %v1105_v40 }
 0x218   : > { %5577 = vmatprep.subr.msk.bf16.mxu1 %vm1091_vm1, %v1373_v42 }
 0x21e   : > { %5222 = vmatmul.mubr.msk.bf16.vlgmr.msra.gmra.mxu1 %vm1091_vm1, %v6469_v12 }
 0x21f   : > { %5225 = vmatprep.mubr.msk.bf16.mxu1 %vm1091_vm1, %v6494_v26  ;;  %5246 = vmatpush3.bf16.xpose.msra.mxu1 %v1396_v44 }
 0x220   : > { %5578 = vmatprep.subr.msk.bf16.mxu1 %vm1091_vm1, %v1371_v29 }
 0x226   : > { %5226 = vmatmul.mubr.msk.bf16.gmra.mxu1 %vm1091_vm1, %v6481_v24 }
 0x227   : > { %5248 = vmatpush3.bf16.xpose.msra.mxu1 %v1393_v50  ;;  %5253 = vmatprep.mubr.msk.bf16.mxu1 %vm1091_vm1, %v1359_v47 }
 0x228   : > { %5579 = vmatprep.subr.msk.bf16.mxu1 %vm1091_vm1, %v1369_v46 }
 0x22f   : > { %5250 = vmatpush3.bf16.xpose.msra.mxu1 %v1390_v51 }
 0x230   : > { %5580 = vmatprep.subr.msk.bf16.mxu1 %vm1091_vm1, %v1367_v33  ;;  %v6581_v33 = vld [vmem:[%s8268_s29 + $0x38] sm:$0xff] }
 0x237   : > { %5252 = vmatpush3.bf16.xpose.msra.mxu1 %v1387_v53 }
 0x23e   : > { %5254 = vmatmul.mubr.msk.bf16.vlgmr.msra.gmra.mxu1 %vm1091_vm1, %v1361_v34 }
 0x23f   : > { %5257 = vmatprep.mubr.msk.bf16.mxu1 %vm1091_vm1, %v1363_v54 }
 0x246   : > { %5258 = vmatmul.mubr.msk.bf16.gmra.mxu1 %vm1091_vm1, %v1365_v37 }
 0x2de   : > { %v5223_v56 = vpop.f32.mrf.mxu1 }
 0x2df   : > { %v6538_v61 = vadd.f32 %v5223_v56, %v6530_v55 }
 0x2e0   : > { %v1150_v62 = vpop.f32.mrf.mxu1 }
 0x2e1   : > { %v6541_v2 = vadd.f32 %v1150_v62, %v6535_v60  ;;  %v1187_v3 = vsel %vm977_vm0, %v6538_v61, -inf }
 0x2e2   : > { %1188 = vmax.xlane.f32.xlu0 %v1187_v3  ;;  %v5224_v9 = vpop.f32.mrf.mxu1 }
 0x2e3   : > { %v6561_v21 = vadd.f32 %v5224_v9, %v6548_v8  ;;  %v1181_v25 = vsel %vm977_vm0, %v6541_v2, -inf }
 0x2e4   : > { %v1153_v17 = vpop.f32.mrf.mxu1 }
 0x2e5   : > { %v6564_v23 = vadd.f32 %v1153_v17, %v6553_v10  ;;  %v1190_v34 = vsel %vm977_vm0, %v6561_v21, -inf }
 0x2e6   : > { %1182 = vmax.xlane.f32.xlu0 %v1181_v25  ;;  %v5227_v27 = vpop.f32.mrf.mxu1 }
 0x2e7   : > { %v6569_v28 = vadd.f32 %v5227_v27, %v6558_v20  ;;  %v1184_v29 = vsel %vm977_vm0, %v6564_v23, -inf }
 0x2e8   : > { %1185 = vmax.xlane.f32.xlu1 %v1184_v29  ;;  %v1166_v30 = vpop.f32.mrf.mxu1 }
 0x2e9   : > { %v6591_v37 = vadd.f32 %v1166_v30, %v6576_v32  ;;  %v1199_v40 = vsel %vm977_vm0, %v6569_v28, -inf }
 0x2ea   : > { %1191 = vmax.xlane.f32.xlu0 %v1190_v34  ;;  %v5228_v35 = vpop.f32.mrf.mxu1 }
 0x2eb   : > { %v6594_v39 = vadd.f32 %v5228_v35, %v6581_v33  ;;  %v1193_v47 = vsel %vm977_vm0, %v6591_v37, -inf }
 0x2ec   : > { %1200 = vmax.xlane.f32.xlu1 %v1199_v40  ;;  %v1169_v42 = vpop.f32.mrf.mxu1 }
 0x2ed   : > { %v6599_v44 = vadd.f32 %v1169_v42, %v6588_v36  ;;  %v1202_v46 = vsel %vm977_vm0, %v6594_v39, -inf }
 0x2ee   : > { %1203 = vmax.xlane.f32.xlu0 %v1202_v46 }
 0x2ef   : > { %v1196_v50 = vsel %vm977_vm0, %v6599_v44, -inf }
 0x2f0   : > { %1194 = vmax.xlane.f32.xlu1 %v1193_v47 }
 0x2f2   : > { %1197 = vmax.xlane.f32.xlu0 %v1196_v50 }
 0x2fe   : > { %v5255_v51 = vpop.f32.mrf.mxu1 }
 0x2ff   : > { %v6608_v53 = vadd.f32 %v5255_v51, %v6530_v55 }
 0x300   : > { %v1432_v54 = vpop.f32.mrf.mxu1 }
 0x301   : > { %v6611_v56 = vadd.f32 %v1432_v54, %v6535_v60  ;;  %v1469_v62 = vsel %vm977_vm0, %v6608_v53, -inf }
 0x302   : > { %v5256_v3 = vpop.f32.mrf.mxu1  ;;  %1470 = vmax.xlane.f32.xlu1 %v1469_v62 }
 0x303   : > { %v6616_v9 = vadd.f32 %v5256_v3, %v6548_v8  ;;  %v1463_v29 = vsel %vm977_vm0, %v6611_v56, -inf }
 0x304   : > { %v1435_v17 = vpop.f32.mrf.mxu1 }
 0x305   : > { %v6619_v25 = vadd.f32 %v1435_v17, %v6553_v10  ;;  %v1472_v27 = vsel %vm977_vm0, %v6616_v9, -inf }
 0x306   : > { %1473 = vmax.xlane.f32.xlu0 %v1472_v27  ;;  %1464 = vmax.xlane.f32.xlu1 %v1463_v29  ;;  %v5259_v34 = vpop.f32.mrf.mxu1 }
 0x307   : > { %v1466_v30 = vsel %vm977_vm0, %v6619_v25, -inf  ;;  %v6632_v40 = vadd.f32 %v5259_v34, %v6558_v20 }
 0x308   : > { %v1448_v35 = vpop.f32.mrf.mxu1 }
 0x309   : > { %v6635_v46 = vadd.f32 %v1448_v35, %v6576_v32  ;;  %v1481_v50 = vsel %vm977_vm0, %v6632_v40, -inf }
 0x30a   : > { %1467 = vmax.xlane.f32.xlu0 %v1466_v30  ;;  %v5260_v42 = vpop.f32.mrf.mxu1 }
 0x30b   : > { %v6638_v47 = vadd.f32 %v5260_v42, %v6581_v33  ;;  %v1475_v3 = vsel %vm977_vm0, %v6635_v46, -inf }
 0x30c   : > { %v1451_v51 = vpop.f32.mrf.mxu1 }
 0x30d   : > { %v6643_v54 = vadd.f32 %v1451_v51, %v6588_v36  ;;  %v1484_v62 = vsel %vm977_vm0, %v6638_v47, -inf }
 0x30f   : > { %v1478_v17 = vsel %vm977_vm0, %v6643_v54, -inf }
 0x317   : > { %1561 = vrot.lane.b32.xlu1 %v6471_v13, %s8216_s27 }
 0x320   : > { %1563 = vrot.lane.b32.xlu0 %v6458_v4, %s8216_s27 }
 0x33b   : > { %1482 = vmax.xlane.f32.xlu1 %v1481_v50 }
 0x33f   : > { %1485 = vmax.xlane.f32.xlu0 %v1484_v62  ;;  %1476 = vmax.xlane.f32.xlu1 %v1475_v3 }
 0x343   : > { %1479 = vmax.xlane.f32.xlu0 %v1478_v17 }
 0x36b   : > { %v1189_v27 = vpop.xlane.xlu0 %1188 }
 0x36c   : > { %v1207_v29 = vsub.f32 %v6538_v61, %v1189_v27 }
 0x36e   : > { %v1217_v30 = vmul.f32 1.442695, %v1207_v29 }
 0x36f   : > { %v1183_v34 = vpop.xlane.xlu0 %1182 }
 0x370   : > { %5795 = vpow2.f32 %v1217_v30  ;;  %v1205_v35 = vsub.f32 %v6541_v2, %v1183_v34 }
 0x371   : > { %v1186_v42 = vpop.xlane.xlu1 %1185 }
 0x372   : > { %v1213_v50 = vmul.f32 1.442695, %v1205_v35  ;;  %v1206_v51 = vsub.f32 %v6564_v23, %v1186_v42 }
 0x373   : > { %v1192_v43 = vpop.xlane.xlu0 %1191 }
 0x374   : > { %5797 = vpow2.f32 %v1213_v50  ;;  %v1208_v62 = vsub.f32 %v6561_v21, %v1192_v43  ;;  %v1215_v3 = vmul.f32 1.442695, %v1206_v51 }
 0x375   : > { %v1201_v19 = vpop.xlane.xlu1 %1200 }
 0x376   : > { %v1219_v1 = vmul.f32 1.442695, %v1208_v62  ;;  %v1211_v17 = vsub.f32 %v6569_v28, %v1201_v19 }
 0x377   : > { %v1204_v15 = vpop.xlane.xlu0 %1203 }
 0x378   : > { %5799 = vpow2.f32 %v1219_v1  ;;  %v1225_v61 = vmul.f32 1.442695, %v1211_v17  ;;  %v1212_v27 = vsub.f32 %v6594_v39, %v1204_v15 }
 0x379   : > { %5801 = vpow2.f32 %v1215_v3  ;;  %v1195_v2 = vpop.xlane.xlu1 %1194 }
 0x37a   : > { %5803 = vpow2.f32 %v1225_v61  ;;  %v1227_v29 = vmul.f32 1.442695, %v1212_v27  ;;  %v1209_v23 = vsub.f32 %v6591_v37, %v1195_v2 }
 0x37b   : > { %v1198_v30 = vpop.xlane.xlu0 %1197 }
 0x37c   : > { %v1221_v34 = vmul.f32 1.442695, %v1209_v23  ;;  %v1210_v43 = vsub.f32 %v6599_v44, %v1198_v30  ;;  %5805 = vpow2.f32 %v1227_v29 }
 0x37d   : > { %v6659_v21 = vpop.eup %5795 }
 0x37e   : > { %5807 = vpow2.f32 %v1221_v34  ;;  %v1223_v19 = vmul.f32 1.442695, %v1210_v43  ;;  %v1235_v1 = vsel %vm977_vm0, %v6659_v21, 0.0 }
 0x37f   : > { %1236 = vadd.xlane.f32.xlu1 %v1235_v1 }
 0x380   : > { %5809 = vpow2.f32 %v1223_v19 }
 0x381   : > { %v6663_v15 = vpop.eup %5797 }
 0x382   : > { %v1229_v28 = vsel %vm977_vm0, %v6663_v15, 0.0 }
 0x383   : > { %1230 = vadd.xlane.f32.xlu1 %v1229_v28 }
 0x385   : > { %v6667_v37 = vpop.eup %5799 }
 0x386   : > { %v6669_v39 = vpop.eup %5801  ;;  %v1238_v44 = vsel %vm977_vm0, %v6667_v37, 0.0 }
 0x387   : > { %v6673_v35 = vpop.eup %5803  ;;  %1239 = vadd.xlane.f32.xlu0 %v1238_v44  ;;  %v1232_v51 = vsel %vm977_vm0, %v6669_v39, 0.0 }
 0x388   : > { %v1247_v42 = vsel %vm977_vm0, %v6673_v35, 0.0 }
 0x389   : > { %1248 = vadd.xlane.f32.xlu1 %v1247_v42  ;;  %v6677_v50 = vpop.eup %5805 }
 0x38a   : > { %v1250_v2 = vsel %vm977_vm0, %v6677_v50, 0.0 }
 0x38b   : > { %v6681_v62 = vpop.eup %5807  ;;  %1233 = vadd.xlane.f32.xlu0 %v1232_v51  ;;  %v1471_v3 = vpop.xlane.xlu1 %1470 }
 0x38c   : > { %v1489_v17 = vsub.f32 %v6608_v53, %v1471_v3  ;;  %v1241_v61 = vsel %vm977_vm0, %v6681_v62, 0.0 }
 0x38d   : > { %1242 = vadd.xlane.f32.xlu1 %v1241_v61  ;;  %v6688_v29 = vpop.eup %5809 }
 0x38e   : > { %v1499_v27 = vmul.f32 1.442695, %v1489_v17  ;;  %v1244_v1 = vsel %vm977_vm0, %v6688_v29, 0.0 }
 0x38f   : > { %1251 = vadd.xlane.f32.xlu0 %v1250_v2  ;;  %v1474_v23 = vpop.xlane.xlu0 %1473  ;;  %v1465_v30 = vpop.xlane.xlu1 %1464 }
 0x390   : > { %5811 = vpow2.f32 %v1499_v27  ;;  %v1490_v34 = vsub.f32 %v6616_v9, %v1474_v23  ;;  %v1487_v43 = vsub.f32 %v6611_v56, %v1465_v30 }
 0x392   : > { %v1501_v19 = vmul.f32 1.442695, %v1490_v34  ;;  %v1495_v53 = vmul.f32 1.442695, %v1487_v43 }
 0x393   : > { %1245 = vadd.xlane.f32.xlu0 %v1244_v1  ;;  %v1468_v28 = vpop.xlane.xlu0 %1467  ;;  %v6717_v2 = vpop.permute.xlu1 %1561 }
 0x394   : > { %5813 = vpow2.f32 %v1501_v19  ;;  %v1488_v44 = vsub.f32 %v6619_v25, %v1468_v28 }
 0x395   : > { %5815 = vpow2.f32 %v1495_v53 }
 0x396   : > { %v1497_v42 = vmul.f32 1.442695, %v1488_v44 }
 0x397   : > { %v6719_v23 = vpop.permute.xlu0 %1563 }
 0x398   : > { %5817 = vpow2.f32 %v1497_v42 }
 0x39d   : > { %v6695_v51 = vpop.eup %5811 }
 0x39e   : > { %v1517_v9 = vsel %vm977_vm0, %v6695_v51, 0.0 }
 0x39f   : > { %1518 = vadd.xlane.f32.xlu1 %v1517_v9 }
 0x3a1   : > { %v6699_v56 = vpop.eup %5813 }
 0x3a2   : > { %v6701_v3 = vpop.eup %5815  ;;  %v1520_v17 = vsel %vm977_vm0, %v6699_v56, 0.0 }
 0x3a3   : > { %1521 = vadd.xlane.f32.xlu0 %v1520_v17  ;;  %v1511_v25 = vsel %vm977_vm0, %v6701_v3, 0.0 }
 0x3a4   : > { %1512 = vadd.xlane.f32.xlu1 %v1511_v25 }
 0x3a5   : > { %v6707_v61 = vpop.eup %5817 }
 0x3a6   : > { %v1514_v27 = vsel %vm977_vm0, %v6707_v61, 0.0 }
 0x3a7   : > { %1515 = vadd.xlane.f32.xlu0 %v1514_v27 }
 0x3b5   : > { %1662 = vrot.lane.b32.xlu1 %v6450_v59, %s8236_s2 }
 0x3b9   : > { %1660 = vrot.lane.b32.xlu1 %v6439_v41, %s8236_s2 }
 0x3bd   : > { %1559 = vrot.lane.b32.xlu0 %v6479_v22, %s8216_s27 }
 0x3c4   : > { %v1483_v30 = vpop.xlane.xlu1 %1482 }
 0x3c5   : > { %v1493_v34 = vsub.f32 %v6632_v40, %v1483_v30 }
 0x3c7   : > { %v1507_v43 = vmul.f32 1.442695, %v1493_v34 }
 0x3c8   : > { %v1486_v19 = vpop.xlane.xlu0 %1485  ;;  %v1477_v53 = vpop.xlane.xlu1 %1476 }
 0x3c9   : > { %v1494_v1 = vsub.f32 %v6638_v47, %v1486_v19  ;;  %v1491_v28 = vsub.f32 %v6635_v46, %v1477_v53  ;;  %5819 = vpow2.f32 %v1507_v43 }
 0x3cb   : > { %v1503_v44 = vmul.f32 1.442695, %v1491_v28  ;;  %v1509_v42 = vmul.f32 1.442695, %v1494_v1 }
 0x3cc   : > { %v1480_v9 = vpop.xlane.xlu0 %1479 }
 0x3cd   : > { %v1492_v17 = vsub.f32 %v6643_v54, %v1480_v9  ;;  %5821 = vpow2.f32 %v1503_v44 }
 0x3ce   : > { %5823 = vpow2.f32 %v1509_v42 }
 0x3cf   : > { %v1505_v25 = vmul.f32 1.442695, %v1492_v17 }
 0x3d1   : > { %5825 = vpow2.f32 %v1505_v25 }
 0x3d6   : > { %v6725_v27 = vpop.eup %5819 }
 0x3d7   : > { %v1529_v30 = vsel %vm977_vm0, %v6725_v27, 0.0 }
 0x3da   : > { %v6727_v40 = vpop.eup %5821 }
 0x3db   : > { %v1523_v46 = vsel %vm977_vm0, %v6727_v40, 0.0  ;;  %v6733_v47 = vpop.eup %5823 }
 0x3dc   : > { %1530 = vadd.xlane.f32.xlu0 %v1529_v30  ;;  %v1532_v43 = vsel %vm977_vm0, %v6733_v47, 0.0 }
 0x3dd   : > { %1524 = vadd.xlane.f32.xlu1 %v1523_v46 }
 0x3de   : > { %v6735_v34 = vpop.eup %5825 }
 0x3df   : > { %v1526_v54 = vsel %vm977_vm0, %v6735_v34, 0.0 }
 0x3e0   : > { %1527 = vadd.xlane.f32.xlu0 %v1526_v54 }
 0x3e1   : > { %1533 = vadd.xlane.f32.xlu1 %v1532_v43 }
 0x3f2   : > { %1656 = vrot.lane.b32.xlu1 %v6444_v45, %s8236_s2 }
 0x3f6   : > { %1650 = vrot.lane.b32.xlu1 %v6469_v12, %s8214_s10  ;;  %1658 = vrot.lane.b32.xlu0 %v6461_v7, %s8236_s2 }
 0x3fa   : > { %1654 = vrot.lane.b32.xlu1 %v6481_v24, %s8214_s10  ;;  %1648 = vrot.lane.b32.xlu0 %v6435_v31, %s8214_s10 }
 0x3fe   : > { %1851 = vrot.lane.b32.xlu1 %v6452_v0, %s8214_s10  ;;  %1652 = vrot.lane.b32.xlu0 %v6494_v26, %s8214_s10 }
 0x408   : > { %v1237_v19 = vpop.xlane.xlu1 %1236 }
 0x40c   : > { %v1231_v53 = vpop.xlane.xlu1 %1230 }
 0x410   : > { %v1240_v1 = vpop.xlane.xlu0 %1239 }
 0x411   : > { %5827 = vrcp.f32 %v1240_v1 }
 0x412   : > { %v1249_v28 = vpop.xlane.xlu1 %1248  ;;  %5829 = vrcp.f32 %v1231_v53 }
 0x413   : > { %5831 = vrcp.f32 %v1237_v19 }
 0x414   : > { %v1234_v44 = vpop.xlane.xlu0 %1233 }
 0x415   : > { %5833 = vrcp.f32 %v1234_v44 }
 0x416   : > { %v1243_v42 = vpop.xlane.xlu1 %1242 }
 0x418   : > { %v1252_v9 = vpop.xlane.xlu0 %1251 }
 0x419   : > { %5835 = vrcp.f32 %v1252_v9 }
 0x41a   : > { %5837 = vrcp.f32 %v1243_v42 }
 0x41b   : > { %5839 = vrcp.f32 %v1249_v28 }
 0x41c   : > { %v1246_v17 = vpop.xlane.xlu0 %1245 }
 0x41d   : > { %5841 = vrcp.f32 %v1246_v17 }
 0x41e   : > { %v5828_v25 = vpop.eup %5827 }
 0x41f   : > { %v5830_v30 = vpop.eup %5829  ;;  %v1260_v43 = vmul.f32 %v5828_v25, %v6667_v37 }
 0x420   : > { %v5832_v46 = vpop.eup %5831  ;;  %v1254_v1 = vmul.f32 %v5830_v30, %v6663_v15 }
 0x421   : > { %v1258_v19 = vmul.f32 %v5832_v46, %v6659_v21 }
 0x422   : > { %v5834_v54 = vpop.eup %5833 }
 0x423   : > { %v1256_v53 = vmul.f32 %v5834_v54, %v6669_v39  ;;  %v1270_v14 = vpack.c.bf16 %v1260_v43, %v1258_v19 }
 0x425   : > { %v1269_v44 = vpack.c.bf16 %v1256_v53, %v1254_v1 }
 0x426   : > { %v5836_v6 = vpop.eup %5835 }
 0x427   : > { %5237 = vmatprep.mubr.msk.bf16.mxu0 %vm977_vm0, %v1269_v44  ;;  %v5838_v28 = vpop.eup %5837  ;;  %v1268_v15 = vmul.f32 %v5836_v6, %v6677_v50 }
 0x428   : > { %5238 = vmatmul.mubr.msk.bf16.vlgmr.msra.gmra.mxu0 %vm977_vm0, %v1270_v14  ;;  %v1519_v42 = vpop.xlane.xlu1 %1518  ;;  %v5840_v9 = vpop.eup %5839  ;;  %v1262_v37 = vmul.f32 %v5838_v28, %v6681_v62 }
 0x429   : > { %5262 = vmatpush3.bf16.msra.mxu0 %v6503_v38  ;;  %v1266_v25 = vmul.f32 %v5840_v9, %v6673_v35 }
 0x42a   : > { %v5842_v17 = vpop.eup %5841  ;;  %5263 = vmatprep.subr.bf16.mxu0 %v6719_v23 }
 0x42b   : > { %v1264_v21 = vmul.f32 %v5842_v17, %v6688_v29  ;;  %v1272_v38 = vpack.c.bf16 %v1268_v15, %v1266_v25 }
 0x42c   : > { %v1522_v39 = vpop.xlane.xlu0 %1521 }
 0x42d   : > { %5264 = vmatpush3.bf16.msra.mxu0 %v6719_v23  ;;  %v1513_v30 = vpop.xlane.xlu1 %1512  ;;  %v1271_v14 = vpack.c.bf16 %v1264_v21, %v1262_v37  ;;  %5843 = vrcp.f32 %v1522_v39 }
 0x42e   : > { %5265 = vmatprep.subr.bf16.mxu0 %v6717_v2  ;;  %5845 = vrcp.f32 %v1513_v30 }
 0x42f   : > { %5241 = vmatprep.mubr.msk.bf16.mxu0 %vm977_vm0, %v1271_v14  ;;  %5847 = vrcp.f32 %v1519_v42 }
 0x430   : > { %v1516_v6 = vpop.xlane.xlu0 %1515  ;;  %5242 = vmatmul.mubr.msk.bf16.gmra.mxu0 %vm977_vm0, %v1272_v38 }
 0x431   : > { %5849 = vrcp.f32 %v1516_v6  ;;  %5266 = vmatpush3.bf16.msra.mxu0 %v6717_v2  ;;  %v1663_v35 = vpop.permute.xlu1 %1662 }
 0x432   : > { %v1686_v44 = vsel %vm1091_vm1, %v1663_v35, 0 }
 0x434   : > { %v1560_v50 = vpop.permute.xlu0 %1559 }
 0x435   : > { %5267 = vmatprep.subr.bf16.mxu0 %v1560_v50  ;;  %v1661_v28 = vpop.permute.xlu1 %1660 }
 0x436   : > { %5268 = vmatpush3.bf16.msra.mxu0 %v1560_v50 }
 0x437   : > { %5581 = vmatprep.subr.msk.bf16.mxu0 %vm1091_vm1, %v1663_v35 }
 0x43a   : > { %v5844_v62 = vpop.eup %5843 }
 0x43b   : > { %v5846_v29 = vpop.eup %5845  ;;  %v1542_v54 = vmul.f32 %v5844_v62, %v6699_v56  ;;  %v1683_v56 = vsel %vm1091_vm1, %v1661_v28, 0 }
 0x43c   : > { %v5848_v23 = vpop.eup %5847  ;;  %v1536_v43 = vmul.f32 %v5846_v29, %v6701_v3 }
 0x43d   : > { %v1540_v53 = vmul.f32 %v5848_v23, %v6695_v51 }
 0x43e   : > { %v5850_v46 = vpop.eup %5849 }
 0x43f   : > { %v1538_v1 = vmul.f32 %v5850_v46, %v6707_v61  ;;  %v1552_v2 = vpack.c.bf16 %v1542_v54, %v1540_v53 }
 0x441   : > { %v1551_v19 = vpack.c.bf16 %v1538_v1, %v1536_v43 }
 0x443   : > { %5269 = vmatprep.mubr.msk.bf16.mxu0 %vm977_vm0, %v1551_v19 }
 0x444   : > { %5270 = vmatmul.mubr.msk.bf16.vlgmr.msra.gmra.mxu0 %vm977_vm0, %v1552_v2 }
 0x445   : > { %5278 = vmatpush3.bf16.xpose.msra.mxu0 %v1686_v44 }
 0x446   : > { %5582 = vmatprep.subr.msk.bf16.mxu0 %vm1091_vm1, %v1661_v28 }
 0x44d   : > { %5280 = vmatpush3.bf16.xpose.msra.mxu0 %v1683_v56 }
 0x465   : > { %v1531_v3 = vpop.xlane.xlu0 %1530 }
 0x466   : > { %v1525_v42 = vpop.xlane.xlu1 %1524 }
 0x467   : > { %5851 = vrcp.f32 %v1525_v42 }
 0x468   : > { %5853 = vrcp.f32 %v1531_v3 }
 0x469   : > { %v1528_v51 = vpop.xlane.xlu0 %1527 }
 0x46a   : > { %5855 = vrcp.f32 %v1528_v51  ;;  %v1534_v61 = vpop.xlane.xlu1 %1533 }
 0x46b   : > { %5857 = vrcp.f32 %v1534_v61 }
 0x46d   : > { %v1659_v9 = vpop.permute.xlu0 %1658 }
 0x46e   : > { %v1657_v17 = vpop.permute.xlu1 %1656  ;;  %5583 = vmatprep.subr.msk.bf16.mxu0 %vm1091_vm1, %v1659_v9  ;;  %v1680_v15 = vsel %vm1091_vm1, %v1659_v9, 0 }
 0x46f   : > { %5282 = vmatpush3.bf16.xpose.msra.mxu0 %v1680_v15  ;;  %v1677_v30 = vsel %vm1091_vm1, %v1657_v17, 0 }
 0x470   : > { %5584 = vmatprep.subr.msk.bf16.mxu0 %vm1091_vm1, %v1657_v17 }
 0x471   : > { %v1649_v54 = vpop.permute.xlu0 %1648 }
 0x472   : > { %v1651_v37 = vpop.permute.xlu1 %1650 }
 0x474   : > { %v5852_v21 = vpop.eup %5851 }
 0x475   : > { %v5854_v39 = vpop.eup %5853  ;;  %v1544_v6 = vmul.f32 %v5852_v21, %v6727_v40  ;;  %v1653_v43 = vpop.permute.xlu0 %1652 }
 0x476   : > { %v1655_v25 = vpop.permute.xlu1 %1654  ;;  %v1548_v35 = vmul.f32 %v5854_v39, %v6725_v27 }
 0x477   : > { %v5856_v14 = vpop.eup %5855  ;;  %5284 = vmatpush3.bf16.xpose.msra.mxu0 %v1677_v30 }
 0x478   : > { %v5858_v38 = vpop.eup %5857  ;;  %v1546_v50 = vmul.f32 %v5856_v14, %v6735_v34 }
 0x479   : > { %v1550_v62 = vmul.f32 %v5858_v38, %v6733_v47 }
 0x47a   : > { %v1852_v29 = vpop.permute.xlu1 %1851  ;;  %v1553_v23 = vpack.c.bf16 %v1546_v50, %v1544_v6 }
 0x47b   : > { %5293 = vmatprep.subr.bf16.mxu1 %v1852_v29  ;;  %v1554_v46 = vpack.c.bf16 %v1550_v62, %v1548_v35 }
 0x47c   : > { %5294 = vmatpush3.bf16.msra.mxu1 %v1852_v29  ;;  %5273 = vmatprep.mubr.msk.bf16.mxu0 %vm977_vm0, %v1553_v23 }
 0x47d   : > { %5274 = vmatmul.mubr.msk.bf16.gmra.mxu0 %vm977_vm0, %v1554_v46 }
 0x47e   : > { %5285 = vmatprep.mubr.msk.bf16.mxu0 %vm1091_vm1, %v1649_v54 }
 0x485   : > { %5286 = vmatmul.mubr.msk.bf16.vlgmr.msra.gmra.mxu0 %vm1091_vm1, %v1651_v37 }
 0x486   : > { %5289 = vmatprep.mubr.msk.bf16.mxu0 %vm1091_vm1, %v1653_v43 }
 0x48d   : > { %5290 = vmatmul.mubr.msk.bf16.gmra.mxu0 %vm1091_vm1, %v1655_v25 }
 0x4e8   : > { %v6796_v27 = vpop.f32.mrf.mxu0 }
 0x4ea   : > { %v6798_v40 = vpop.f32.mrf.mxu0 }
 0x4ec   : > { %v6800_v47 = vpop.f32.mrf.mxu0 }
 0x4ee   : > { %v6802_v34 = vpop.f32.mrf.mxu0 }
 0x4f0   : > { %v6804_v1 = vpop.f32.mrf.mxu0 }
 0x4f1   : > { %8269 = vst [vmem:[#allocation12_spill] sm:$0xff] %v6804_v1 }
 0x4f2   : > { %v6806_v53 = vpop.f32.mrf.mxu0 }
 0x4f3   : > { %8270 = vst [vmem:[#allocation13_spill] sm:$0xff] %v6806_v53 }
 0x4f4   : > { %v6808_v19 = vpop.f32.mrf.mxu0 }
 0x4f5   : > { %8271 = vst [vmem:[#allocation14_spill] sm:$0xff] %v6808_v19 }
 0x4f6   : > { %v6810_v2 = vpop.f32.mrf.mxu0 }
 0x504   : > { %v6812_v44 = vpop.f32.mrf.mxu0 }
 0x506   : > { %v6814_v28 = vpop.f32.mrf.mxu0 }
 0x508   : > { %v6816_v56 = vpop.f32.mrf.mxu0 }
 0x50a   : > { %v6820_v42 = vpop.f32.mrf.mxu0 }
 0x53d   : > { %v6824_v61 = vpop.f32.mrf.mxu0 }
 0x53f   : > { %v6826_v9 = vpop.f32.mrf.mxu0 }
 0x541   : > { %v6828_v17 = vpop.f32.mrf.mxu0 }
 0x543   : > { %v6832_v37 = vpop.f32.mrf.mxu0 }
 0x545   : > { %v5287_v39 = vpop.f32.mrf.mxu0 }
 0x546   : > { %v1731_v25 = vadd.f32 %v5287_v39, %v6530_v55 }
 0x547   : > { %v1722_v30 = vpop.f32.mrf.mxu0 }
 0x548   : > { %v1723_v14 = vadd.f32 %v1722_v30, %v6535_v60  ;;  %v1759_v38 = vsel %vm977_vm0, %v1731_v25, -inf }
 0x549   : > { %1760 = vmax.xlane.f32.xlu0 %v1759_v38  ;;  %v5288_v6 = vpop.f32.mrf.mxu0 }
 0x54a   : > { %v1734_v35 = vadd.f32 %v5288_v6, %v6548_v8  ;;  %v1753_v29 = vsel %vm977_vm0, %v1723_v14, -inf }
 0x54b   : > { %v1725_v50 = vpop.f32.mrf.mxu0 }
 0x54c   : > { %v1726_v62 = vadd.f32 %v1725_v50, %v6553_v10  ;;  %v1762_v54 = vsel %vm977_vm0, %v1734_v35, -inf }
 0x54d   : > { %1754 = vmax.xlane.f32.xlu0 %v1753_v29  ;;  %v5291_v23 = vpop.f32.mrf.mxu0 }
 0x54e   : > { %v6843_v46 = vadd.f32 %v5291_v23, %v6558_v20  ;;  %v1756_v55 = vsel %vm977_vm0, %v1726_v62, -inf }
 0x54f   : > { %1757 = vmax.xlane.f32.xlu1 %v1756_v55  ;;  %v1738_v60 = vpop.f32.mrf.mxu0 }
 0x550   : > { %v1739_v39 = vadd.f32 %v1738_v60, %v6576_v32  ;;  %v1771_v10 = vsel %vm977_vm0, %v6843_v46, -inf }
 0x551   : > { %1763 = vmax.xlane.f32.xlu0 %v1762_v54  ;;  %v5292_v43 = vpop.f32.mrf.mxu0 }
 0x552   : > { %v1750_v8 = vadd.f32 %v5292_v43, %v6581_v33  ;;  %v1765_v6 = vsel %vm977_vm0, %v1739_v39, -inf }
 0x553   : > { %1772 = vmax.xlane.f32.xlu1 %v1771_v10  ;;  %v1741_v30 = vpop.f32.mrf.mxu0 }
 0x554   : > { %v1742_v20 = vadd.f32 %v1741_v30, %v6588_v36  ;;  %v1774_v38 = vsel %vm977_vm0, %v1750_v8, -inf }
 0x555   : > { %1775 = vmax.xlane.f32.xlu0 %v1774_v38 }
 0x556   : > { %v1768_v50 = vsel %vm977_vm0, %v1742_v20, -inf }
 0x557   : > { %1766 = vmax.xlane.f32.xlu1 %v1765_v6 }
 0x559   : > { %1769 = vmax.xlane.f32.xlu0 %v1768_v50 }
 0x568   : > { %1847 = vrot.lane.b32.xlu1 %v6471_v13, %s8214_s10 }
 0x56f   : > { %1849 = vrot.lane.b32.xlu0 %v6458_v4, %s8214_s10 }
 0x5d2   : > { %v1761_v32 = vpop.xlane.xlu0 %1760 }
 0x5d3   : > { %v1779_v33 = vsub.f32 %v1731_v25, %v1761_v32 }
 0x5d5   : > { %v1789_v29 = vmul.f32 1.442695, %v1779_v33 }
 0x5d6   : > { %v1755_v23 = vpop.xlane.xlu0 %1754 }
 0x5d7   : > { %5859 = vpow2.f32 %v1789_v29  ;;  %v1777_v36 = vsub.f32 %v1723_v14, %v1755_v23 }
 0x5d8   : > { %v1758_v55 = vpop.xlane.xlu1 %1757 }
 0x5d9   : > { %v1785_v60 = vmul.f32 1.442695, %v1777_v36  ;;  %v1778_v54 = vsub.f32 %v1726_v62, %v1758_v55 }
 0x5da   : > { %v1764_v43 = vpop.xlane.xlu0 %1763 }
 0x5db   : > { %5861 = vpow2.f32 %v1785_v60  ;;  %v1780_v10 = vsub.f32 %v1734_v35, %v1764_v43  ;;  %v1787_v38 = vmul.f32 1.442695, %v1778_v54 }
 0x5dc   : > { %v1773_v30 = vpop.xlane.xlu1 %1772 }
 0x5dd   : > { %v1791_v6 = vmul.f32 1.442695, %v1780_v10  ;;  %v1783_v60 = vsub.f32 %v6843_v46, %v1773_v30 }
 0x5de   : > { %v1776_v50 = vpop.xlane.xlu0 %1775 }
 0x5df   : > { %5863 = vpow2.f32 %v1791_v6  ;;  %v1784_v54 = vsub.f32 %v1750_v8, %v1776_v50  ;;  %v1797_v10 = vmul.f32 1.442695, %v1783_v60 }
 0x5e0   : > { %5865 = vpow2.f32 %v1787_v38  ;;  %v1767_v15 = vpop.xlane.xlu1 %1766 }
 0x5e1   : > { %v1781_v55 = vsub.f32 %v1739_v39, %v1767_v15  ;;  %v1799_v38 = vmul.f32 1.442695, %v1784_v54 }
 0x5e2   : > { %v1770_v21 = vpop.xlane.xlu0 %1769 }
 0x5e3   : > { %v1793_v43 = vmul.f32 1.442695, %v1781_v55  ;;  %v1782_v6 = vsub.f32 %v1742_v20, %v1770_v21 }
 0x5e4   : > { %v6859_v3 = vpop.eup %5859  ;;  %v1848_v32 = vpop.permute.xlu1 %1847 }
 0x5e5   : > { %v1807_v25 = vsel %vm977_vm0, %v6859_v3, 0.0  ;;  %5867 = vpow2.f32 %v1793_v43 }
 0x5e6   : > { %v1850_v14 = vpop.permute.xlu0 %1849  ;;  %1808 = vadd.xlane.f32.xlu1 %v1807_v25  ;;  %5869 = vpow2.f32 %v1797_v10  ;;  %v1795_v25 = vmul.f32 1.442695, %v1782_v6 }
 0x5e7   : > { %5295 = vmatprep.subr.bf16.mxu1 %v1850_v14  ;;  %5871 = vpow2.f32 %v1799_v38 }
 0x5e8   : > { %v6863_v62 = vpop.eup %5861  ;;  %5296 = vmatpush3.bf16.msra.mxu1 %v1850_v14  ;;  %5873 = vpow2.f32 %v1795_v25 }
 0x5e9   : > { %5297 = vmatprep.subr.bf16.mxu1 %v1848_v32  ;;  %v1801_v35 = vsel %vm977_vm0, %v6863_v62, 0.0 }
 0x5ea   : > { %1802 = vadd.xlane.f32.xlu1 %v1801_v35 }
 0x5ec   : > { %v5864_v33 = vpop.eup %5863  ;;  %5298 = vmatpush3.bf16.msra.mxu1 %v1848_v32 }
 0x5ed   : > { %v1810_v29 = vsel %vm977_vm0, %v5864_v33, 0.0  ;;  %v5866_v23 = vpop.eup %5865 }
 0x5ee   : > { %1811 = vadd.xlane.f32.xlu0 %v1810_v29  ;;  %v1804_v36 = vsel %vm977_vm0, %v5866_v23, 0.0 }
 0x5f2   : > { %1805 = vadd.xlane.f32.xlu0 %v1804_v36 }
 0x5fb   : > { %1948 = vrot.lane.b32.xlu1 %v6450_v59, %s8222_s25  ;;  %v6876_v59 = vpop.eup %5867 }
 0x5fc   : > { %v6878_v14 = vpop.eup %5869 }
 0x5fd   : > { %v6882_v15 = vpop.eup %5871  ;;  %v1819_v46 = vsel %vm977_vm0, %v6878_v14, 0.0 }
 0x5fe   : > { %v1822_v21 = vsel %vm977_vm0, %v6882_v15, 0.0  ;;  %v6888_v39 = vpop.eup %5873 }
 0x5ff   : > { %1946 = vrot.lane.b32.xlu1 %v6439_v41, %s8222_s25  ;;  %v1813_v41 = vsel %vm977_vm0, %v6876_v59, 0.0  ;;  %v1816_v8 = vsel %vm977_vm0, %v6888_v39, 0.0 }
 0x608   : > { %1845 = vrot.lane.b32.xlu0 %v6479_v22, %s8214_s10  ;;  %s8282_s10 = smov 64  }
 0x623   : > { %1814 = vadd.xlane.f32.xlu1 %v1813_v41 }
 0x627   : > { %1820 = vadd.xlane.f32.xlu0 %v1819_v46  ;;  %1823 = vadd.xlane.f32.xlu1 %v1822_v21 }
 0x62b   : > { %1817 = vadd.xlane.f32.xlu0 %v1816_v8  ;;  %v5757_v8 = vld [vmem:[%s8180_s11 + $0x34] ss:$8 sps:$4 sm:$0xff]  }
 0x638   : > { %1942 = vrot.lane.b32.xlu1 %v6444_v45, %s8222_s25 }
 0x63c   : > { %1936 = vrot.lane.b32.xlu1 %v6469_v12, %s8234_s8 }
 0x640   : > { %1940 = vrot.lane.b32.xlu1 %v6481_v24, %s8234_s8 }
 0x641   : > { %1944 = vrot.lane.b32.xlu0 %v6461_v7, %s8222_s25  ;;  %s8300_s25 = sld [smem:[#allocation25_spill]] }
 0x645   : > { %1934 = vrot.lane.b32.xlu0 %v6435_v31, %s8234_s8 }
 0x649   : > { %1938 = vrot.lane.b32.xlu0 %v6494_v26, %s8234_s8 }
 0x66f   : > { %v1809_v20 = vpop.xlane.xlu1 %1808 }
 0x673   : > { %v1803_v30 = vpop.xlane.xlu1 %1802 }
 0x677   : > { %v1812_v50 = vpop.xlane.xlu0 %1811  ;;  %v1949_v24 = vpop.permute.xlu1 %1948 }
 0x678   : > { %5875 = vrcp.f32 %v1812_v50  ;;  %v1972_v43 = vsel %vm1091_vm1, %v1949_v24, 0 }
 0x679   : > { %5877 = vrcp.f32 %v1803_v30 }
 0x67a   : > { %5879 = vrcp.f32 %v1809_v20 }
 0x67b   : > { %v1806_v45 = vpop.xlane.xlu0 %1805  ;;  %v1947_v10 = vpop.permute.xlu1 %1946 }
 0x67c   : > { %5881 = vrcp.f32 %v1806_v45  ;;  %v1969_v38 = vsel %vm1091_vm1, %v1947_v10, 0 }
 0x67f   : > { %v1846_v12 = vpop.permute.xlu0 %1845 }
 0x680   : > { %5299 = vmatprep.subr.bf16.mxu1 %v1846_v12 }
 0x681   : > { %5300 = vmatpush3.bf16.msra.mxu1 %v1846_v12 }
 0x682   : > { %5585 = vmatprep.subr.msk.bf16.mxu1 %vm1091_vm1, %v1949_v24 }
 0x685   : > { %v5876_v7 = vpop.eup %5875 }
 0x686   : > { %v5878_v32 = vpop.eup %5877  ;;  %v1832_v29 = vmul.f32 %v5876_v7, %v5864_v33 }
 0x687   : > { %v5880_v31 = vpop.eup %5879  ;;  %v1826_v26 = vmul.f32 %v5878_v32, %v6863_v62 }
 0x688   : > { %v1830_v55 = vmul.f32 %v5880_v31, %v6859_v3 }
 0x689   : > { %v5882_v35 = vpop.eup %5881 }
 0x68a   : > { %v1828_v36 = vmul.f32 %v5882_v35, %v5866_v23  ;;  %v1842_v54 = vpack.c.bf16 %v1832_v29, %v1830_v55  ;;  %v5758_v29 = vld [vmem:[%s8180_s11 + $0x20] ss:$8 sps:$4 sm:$0xff]   ;;  %v5766_v55 = vld [vmem:[%s8180_s11 + $0x4] ss:$8 sps:$4 sm:$0xff]  }
 0x68c   : > { %v1841_v60 = vpack.c.bf16 %v1828_v36, %v1826_v26  ;;  %v5763_v26 = vld [vmem:[%s8180_s11 + $0x14] ss:$8 sps:$4 sm:$0xff]   ;;  %v5761_v36 = vld [vmem:[%s8180_s11 + $0x10] ss:$8 sps:$4 sm:$0xff]  }
 0x68e   : > { %5301 = vmatprep.mubr.msk.bf16.mxu1 %vm977_vm0, %v1841_v60 }
 0x68f   : > { %5302 = vmatmul.mubr.msk.bf16.vlgmr.msra.gmra.mxu1 %vm977_vm0, %v1842_v54  ;;  %v5764_v54 = vld [vmem:[%s8180_s11] ss:$8 sps:$4 sm:$0xff]  }
 0x690   : > { %5310 = vmatpush3.bf16.xpose.msra.mxu1 %v1972_v43  ;;  %v8272_v43 = vmov 0  }
 0x691   : > { %5586 = vmatprep.subr.msk.bf16.mxu1 %vm1091_vm1, %v1947_v10 }
 0x698   : > { %5312 = vmatpush3.bf16.xpose.msra.mxu1 %v1969_v38 }
 0x6ac   : > { %v1815_v33 = vpop.xlane.xlu1 %1814 }
 0x6b0   : > { %v1821_v62 = vpop.xlane.xlu0 %1820  ;;  %v1824_v23 = vpop.xlane.xlu1 %1823 }
 0x6b1   : > { %5883 = vrcp.f32 %v1821_v62 }
 0x6b2   : > { %5885 = vrcp.f32 %v1824_v23 }
 0x6b3   : > { %5887 = vrcp.f32 %v1815_v33 }
 0x6b4   : > { %v1818_v3 = vpop.xlane.xlu0 %1817  ;;  %v1943_v41 = vpop.permute.xlu1 %1942 }
 0x6b5   : > { %5889 = vrcp.f32 %v1818_v3  ;;  %v1963_v30 = vsel %vm1091_vm1, %v1943_v41, 0 }
 0x6b8   : > { %v1945_v6 = vpop.permute.xlu0 %1944 }
 0x6b9   : > { %5587 = vmatprep.subr.msk.bf16.mxu1 %vm1091_vm1, %v1945_v6  ;;  %v1966_v25 = vsel %vm1091_vm1, %v1945_v6, 0 }
 0x6ba   : > { %5314 = vmatpush3.bf16.xpose.msra.mxu1 %v1966_v25 }
 0x6bb   : > { %5588 = vmatprep.subr.msk.bf16.mxu1 %vm1091_vm1, %v1943_v41 }
 0x6bc   : > { %v1935_v35 = vpop.permute.xlu0 %1934 }
 0x6be   : > { %v5884_v46 = vpop.eup %5883 }
 0x6bf   : > { %v5886_v21 = vpop.eup %5885  ;;  %v1838_v45 = vmul.f32 %v5884_v46, %v6878_v14  ;;  %v5755_v14 = vld [vmem:[%s8180_s11 + $0x30] ss:$8 sps:$4 sm:$0xff]  }
 0x6c0   : > { %v5888_v20 = vpop.eup %5887  ;;  %v1840_v12 = vmul.f32 %v5886_v21, %v6882_v15  ;;  %v1937_v15 = vpop.permute.xlu1 %1936  ;;  %v6099_v46 = vld [vmem:[%s8268_s29 + $0x10] sm:$0xff] }
 0x6c1   : > { %v1834_v24 = vmul.f32 %v5888_v20, %v6876_v59  ;;  %v5760_v59 = vld [vmem:[%s8180_s11 + $0x24] ss:$8 sps:$4 sm:$0xff]  }
 0x6c2   : > { %v5890_v50 = vpop.eup %5889  ;;  %5316 = vmatpush3.bf16.xpose.msra.mxu1 %v1963_v30  ;;  %v1844_v31 = vpack.c.bf16 %v1840_v12, %v1838_v45  ;;  %v6100_v20 = vld [vmem:[%s8268_s29] sm:$0xff] }
 0x6c3   : > { %v1836_v7 = vmul.f32 %v5890_v50, %v6888_v39  ;;  %2546 = vmatprep.subr.bf16.mxu1 %v5757_v8  ;;  %v1939_v39 = vpop.permute.xlu0 %1938 }
 0x6c4   : > { %v1941_v60 = vpop.permute.xlu1 %1940 }
 0x6c5   : > { %v1843_v32 = vpack.c.bf16 %v1836_v7, %v1834_v24  ;;  %v6101_v24 = vld [vmem:[%s8268_s29 + $0x18] sm:$0xff] }
 0x6c7   : > { %5305 = vmatprep.mubr.msk.bf16.mxu1 %vm977_vm0, %v1843_v32  ;;  %v6102_v32 = vld [vmem:[%s8268_s29 + $0x8] sm:$0xff] }
 0x6c8   : > { %5306 = vmatmul.mubr.msk.bf16.gmra.mxu1 %vm977_vm0, %v1844_v31 }
 0x6c9   : > { %5317 = vmatprep.mubr.msk.bf16.mxu1 %vm1091_vm1, %v1935_v35 }
 0x6d0   : > { %5318 = vmatmul.mubr.msk.bf16.vlgmr.msra.gmra.mxu1 %vm1091_vm1, %v1937_v15 }
 0x6d1   : > { %5321 = vmatprep.mubr.msk.bf16.mxu1 %vm1091_vm1, %v1939_v39  ;;  %2547 = vmatpush1.bf16.msra.mxu1 %v5755_v14 }
 0x6d2   : > { %2548 = vmatprep.subr.bf16.mxu1 %v5760_v59  ;;  %v6103_v59 = vld [vmem:[%s8268_s29 + $0x30] sm:$0xff] }
 0x6d5   : > { %2549 = vmatpush1.bf16.msra.mxu1 %v5758_v29 }
 0x6d6   : > { %2550 = vmatprep.subr.bf16.mxu1 %v5763_v26  ;;  %v2486_v26 = vld [vmem:[%s8181_s12] sm:$0x3] }
 0x6d8   : > { %5322 = vmatmul.mubr.msk.bf16.gmra.mxu1 %vm1091_vm1, %v1941_v60  ;;  %v6104_v60 = vld [vmem:[%s8268_s29 + $0x20] sm:$0xff] }
 0x6d9   : > { %2551 = vmatpush1.bf16.msra.mxu1 %v5761_v36  ;;  %2570 = vmatprep.mubr.bf16.mxu1 %v8272_v43 }
 0x6da   : > { %2552 = vmatprep.subr.bf16.mxu1 %v5766_v55 }
 0x6dd   : > { %2553 = vmatpush1.bf16.msra.mxu1 %v5764_v54 }
 0x6e0   : > { %4945 = vmatmul.mubr.msk.bf16.vlgmr.msra.gmra.mxu1 %vm977_vm0, %v6372_v52 }
 0x6e1   : > { %2580 = vmatprep.mubr.bf16.mxu1 %v8272_v43 }
 0x6e8   : > { %4946 = vmatmul.mubr.msk.bf16.gmra.mxu1 %vm977_vm0, %v6389_v63 }
 0x6e9   : > { %2590 = vmatprep.mubr.bf16.mxu1 %v8272_v43 }
 0x6f0   : > { %4947 = vmatmul.mubr.msk.bf16.gmra.mxu1 %vm977_vm0, %v6406_v11 }
 0x6f1   : > { %2600 = vmatprep.mubr.bf16.mxu1 %v8272_v43  ;;  %v6105_v43 = vld [vmem:[%s8268_s29 + $0x38] sm:$0xff] }
 0x6f8   : > { %4948 = vmatmul.mubr.msk.bf16.gmra.mxu1 %vm977_vm0, %v6423_v16 }
 0x74f   : > { %v6962_v10 = vpop.f32.mrf.mxu1 }
 0x751   : > { %v6964_v38 = vpop.f32.mrf.mxu1 }
 0x753   : > { %v6966_v52 = vpop.f32.mrf.mxu1 }
 0x755   : > { %v6970_v63 = vpop.f32.mrf.mxu1 }
 0x788   : > { %v6974_v11 = vpop.f32.mrf.mxu1 }
 0x78a   : > { %v6976_v23 = vpop.f32.mrf.mxu1 }
 0x78c   : > { %v6978_v3 = vpop.f32.mrf.mxu1 }
 0x78e   : > { %v6982_v6 = vpop.f32.mrf.mxu1 }
 0x790   : > { %v5319_v41 = vpop.f32.mrf.mxu1 }
 0x791   : > { %v6989_v21 = vadd.f32 %v6099_v46, %v5319_v41 }
 0x792   : > { %v2008_v8 = vpop.f32.mrf.mxu1 }
 0x793   : > { %v6994_v30 = vadd.f32 %v6100_v20, %v2008_v8  ;;  %v2045_v50 = vsel %vm977_vm0, %v6989_v21, -inf  ;;  %v8273_v8 = vsub.s32 0, %v6427_v18 }
 0x794   : > { %2046 = vmax.xlane.f32.xlu0 %v2045_v50  ;;  %v5320_v45 = vpop.f32.mrf.mxu1 }
 0x795   : > { %v7001_v7 = vadd.f32 %v6101_v24, %v5320_v45  ;;  %v2039_v35 = vsel %vm977_vm0, %v6994_v30, -inf  ;;  %v2491_v20 = vrot.slane %v2486_v26, %v8273_v8  ;;  %v6106_v45 = vld [vmem:[%s8268_s29 + $0x28] sm:$0xff] }
 0x796   : > { %v2011_v12 = vpop.f32.mrf.mxu1 }
 0x797   : > { %v7006_v31 = vadd.f32 %v6102_v32, %v2011_v12  ;;  %v2048_v36 = vsel %vm977_vm0, %v7001_v7, -inf }
 0x798   : > { %2040 = vmax.xlane.f32.xlu0 %v2039_v35  ;;  %v5323_v14 = vpop.f32.mrf.mxu1 }
 0x799   : > { %v7013_v15 = vadd.f32 %v6103_v59, %v5323_v14  ;;  %v2042_v39 = vsel %vm977_vm0, %v7006_v31, -inf }
 0x79a   : > { %2043 = vmax.xlane.f32.xlu1 %v2042_v39  ;;  %v2024_v29 = vpop.f32.mrf.mxu1 }
 0x79b   : > { %v7025_v54 = vadd.f32 %v6104_v60, %v2024_v29  ;;  %v2057_v46 = vsel %vm977_vm0, %v7013_v15, -inf }
 0x79c   : > { %2049 = vmax.xlane.f32.xlu0 %v2048_v36  ;;  %v5324_v55 = vpop.f32.mrf.mxu1 }
 0x79d   : > { %v7030_v41 = vadd.f32 %v6105_v43, %v5324_v55  ;;  %v2051_v14 = vsel %vm977_vm0, %v7025_v54, -inf }
 0x79e   : > { %2058 = vmax.xlane.f32.xlu1 %v2057_v46  ;;  %v2027_v50 = vpop.f32.mrf.mxu1 }
 0x79f   : > { %v7039_v12 = vadd.f32 %v6106_v45, %v2027_v50  ;;  %v2060_v24 = vsel %vm977_vm0, %v7030_v41, -inf }
 0x7a0   : > { %2061 = vmax.xlane.f32.xlu0 %v2060_v24  ;;  %v2572_v32 = vpop.f32.mrf.mxu1 }
 0x7a1   : > { %v2573_v35 = vadd.f32 %v2572_v32, %v2491_v20  ;;  %v2054_v39 = vsel %vm977_vm0, %v7039_v12, -inf }
 0x7a2   : > { %v2574_v59 = vpop.f32.mrf.mxu1  ;;  %2052 = vmax.xlane.f32.xlu1 %v2051_v14 }
 0x7a3   : > { %v2611_v60 = vmul.f32 0.25, %v2573_v35 }
 0x7a4   : > { %v2576_v29 = vpop.f32.mrf.mxu1  ;;  %2055 = vmax.xlane.f32.xlu0 %v2054_v39 }
 0x7a5   : > { %v2577_v36 = vadd.f32 %v2576_v29, %v2491_v20 }
 0x7a6   : > { %v2578_v55 = vpop.f32.mrf.mxu1 }
 0x7a7   : > { %v2612_v43 = vmul.f32 0.25, %v2577_v36  ;;  %v7047_v46 = vpack.c.bf16 %v2577_v36, %v2573_v35 }
 0x7a8   : > { %v2582_v8 = vpop.f32.mrf.mxu1 }
 0x7a9   : > { %v7049_v50 = vpack.c.bf16 %v2612_v43, %v2611_v60  ;;  %v2583_v45 = vadd.f32 %v2582_v8, %v2491_v20 }
 0x7aa   : > { %v2584_v24 = vpop.f32.mrf.mxu1 }
 0x7ab   : > { %v2613_v14 = vmul.f32 0.25, %v2583_v45 }
 0x7ac   : > { %v2586_v32 = vpop.f32.mrf.mxu1 }
 0x7ad   : > { %v2587_v16 = vadd.f32 %v2586_v32, %v2491_v20 }
 0x7ae   : > { %v2588_v25 = vpop.f32.mrf.mxu1 }
 0x7af   : > { %v2614_v33 = vmul.f32 0.25, %v2587_v16  ;;  %v7051_v51 = vpack.c.bf16 %v2587_v16, %v2583_v45 }
 0x7b0   : > { %v2592_v62 = vpop.f32.mrf.mxu1 }
 0x7b1   : > { %v7053_v39 = vpack.c.bf16 %v2614_v33, %v2613_v14  ;;  %v2593_v29 = vadd.f32 %v2592_v62, %v2491_v20  ;;  %v8274_v33 = vsub.s32 1, %v6427_v18 }
 0x7b2   : > { %v2594_v57 = vpop.f32.mrf.mxu1 }
 0x7b3   : > { %2137 = vrot.lane.b32.xlu1 %v6452_v0, %s8234_s8  ;;  %v2615_v43 = vmul.f32 0.25, %v2593_v29  ;;  %v2495_v62 = vrot.slane %v2486_v26, %v8274_v33 }
 0x7b4   : > { %v2596_v35 = vpop.f32.mrf.mxu1 }
 0x7b5   : > { %v2597_v36 = vadd.f32 %v2596_v35, %v2491_v20  ;;  %v2589_v53 = vadd.f32 %v2588_v25, %v2495_v62  ;;  %v2585_v18 = vadd.f32 %v2584_v24, %v2495_v62  ;;  %v2579_v26 = vadd.f32 %v2578_v55, %v2495_v62 }
 0x7b6   : > { %v2598_v60 = vpop.f32.mrf.mxu1 }
 0x7b7   : > { %v2616_v8 = vmul.f32 0.25, %v2597_v36  ;;  %v7057_v5 = vpack.c.bf16 %v2597_v36, %v2593_v29  ;;  %v2599_v48 = vadd.f32 %v2598_v60, %v2495_v62 }
 0x7b8   : > { %v2602_v32 = vpop.f32.mrf.mxu1 }
 0x7b9   : > { %v7059_v58 = vpack.c.bf16 %v2616_v8, %v2615_v43  ;;  %v2603_v16 = vadd.f32 %v2602_v32, %v2491_v20  ;;  %v2595_v43 = vadd.f32 %v2594_v57, %v2495_v62 }
 0x7ba   : > { %v2604_v45 = vpop.f32.mrf.mxu1  ;;  %2135 = vrot.lane.b32.xlu0 %v6458_v4, %s8234_s8 }
 0x7bb   : > { %v2617_v35 = vmul.f32 0.25, %v2603_v16  ;;  %v2605_v1 = vadd.f32 %v2604_v45, %v2495_v62  ;;  %v7071_v4 = vpack.c.bf16 %v2599_v48, %v2595_v43 }
 0x7bc   : > { %v2606_v14 = vpop.f32.mrf.mxu1 }
 0x7bd   : > { %v2607_v0 = vadd.f32 %v2606_v14, %v2491_v20  ;;  %v7076_v20 = vpack.c.bf16 %v2589_v53, %v2585_v18 }
 0x7be   : > { %v2608_v49 = vpop.f32.mrf.mxu1 }
 0x7bf   : > { %v2618_v19 = vmul.f32 0.25, %v2607_v0  ;;  %v7065_v29 = vpack.c.bf16 %v2607_v0, %v2603_v16  ;;  %v2609_v36 = vadd.f32 %v2608_v49, %v2495_v62  ;;  %v2575_v49 = vadd.f32 %v2574_v59, %v2495_v62 }
 0x7c1   : > { %v7067_v8 = vpack.c.bf16 %v2618_v19, %v2617_v35  ;;  %v7069_v32 = vpack.c.bf16 %v2609_v36, %v2605_v1  ;;  %v7080_v57 = vpack.c.bf16 %v2579_v26, %v2575_v49 }
 0x7c3   : > { %5373 = vmatprep.subr.bf16.mxu1 %v7069_v32 }
 0x7c4   : > { %5374 = vmatpush3.bf16.msra.mxu1 %v7069_v32 }
 0x7c5   : > { %5375 = vmatprep.subr.bf16.mxu1 %v7071_v4 }
 0x7c8   : > { %5376 = vmatpush3.bf16.msra.mxu1 %v7071_v4 }
 0x7c9   : > { %5377 = vmatprep.subr.bf16.mxu1 %v7076_v20 }
 0x7cc   : > { %5378 = vmatpush3.bf16.msra.mxu1 %v7076_v20 }
 0x7cd   : > { %5379 = vmatprep.subr.bf16.mxu1 %v7080_v57 }
 0x7d0   : > { %5380 = vmatpush3.bf16.msra.mxu1 %v7080_v57 }
 0x81d   : > { %v2047_v48 = vpop.xlane.xlu0 %2046 }
 0x81e   : > { %v2065_v1 = vsub.f32 %v6989_v21, %v2047_v48 }
 0x820   : > { %v2075_v19 = vmul.f32 1.442695, %v2065_v1 }
 0x821   : > { %v2041_v25 = vpop.xlane.xlu0 %2040 }
 0x822   : > { %5891 = vpow2.f32 %v2075_v19  ;;  %v2063_v53 = vsub.f32 %v6994_v30, %v2041_v25 }
 0x823   : > { %v2044_v55 = vpop.xlane.xlu1 %2043 }
 0x824   : > { %v2071_v59 = vmul.f32 1.442695, %v2063_v53  ;;  %v2064_v24 = vsub.f32 %v7006_v31, %v2044_v55 }
 0x825   : > { %v2050_v60 = vpop.xlane.xlu0 %2049 }
 0x826   : > { %5893 = vpow2.f32 %v2071_v59  ;;  %v2066_v16 = vsub.f32 %v7001_v7, %v2050_v60  ;;  %v2073_v33 = vmul.f32 1.442695, %v2064_v24 }
 0x827   : > { %v2059_v45 = vpop.xlane.xlu1 %2058 }
 0x828   : > { %v2077_v62 = vmul.f32 1.442695, %v2066_v16  ;;  %v2069_v14 = vsub.f32 %v7013_v15, %v2059_v45 }
 0x829   : > { %v2062_v0 = vpop.xlane.xlu0 %2061 }
 0x82a   : > { %5895 = vpow2.f32 %v2077_v62  ;;  %v2083_v35 = vmul.f32 1.442695, %v2069_v14  ;;  %v2070_v60 = vsub.f32 %v7030_v41, %v2062_v0  ;;  %v8277_v41 = vpack.i.bf16 %v6820_v42, %v6814_v28 }
 0x82b   : > { %v2053_v21 = vpop.xlane.xlu1 %2052  ;;  %5897 = vpow2.f32 %v2073_v33  ;;  %v8275_v33 = vpack.i.bf16 %v6970_v63, %v6964_v38  ;;  %v8279_v38 = vpack.i.bf16 %v6966_v52, %v6962_v10 }
 0x82c   : > { %5899 = vpow2.f32 %v2083_v35  ;;  %v2067_v24 = vsub.f32 %v7025_v54, %v2053_v21  ;;  %v2085_v45 = vmul.f32 1.442695, %v2070_v60 }
 0x82d   : > { %v2056_v36 = vpop.xlane.xlu0 %2055 }
 0x82e   : > { %v2068_v30 = vsub.f32 %v7039_v12, %v2056_v36  ;;  %v2079_v16 = vmul.f32 1.442695, %v2067_v24 }
 0x82f   : > { %v7091_v43 = vpop.eup %5891  ;;  %v2138_v31 = vpop.permute.xlu1 %2137 }
 0x830   : > { %v2081_v18 = vmul.f32 1.442695, %v2068_v30  ;;  %5325 = vmatprep.subr.bf16.mxu0 %v2138_v31  ;;  %v2093_v7 = vsel %vm977_vm0, %v7091_v43, 0.0 }
 0x831   : > { %v2136_v26 = vpop.permute.xlu0 %2135  ;;  %2094 = vadd.xlane.f32.xlu1 %v2093_v7  ;;  %5326 = vmatpush3.bf16.msra.mxu0 %v2138_v31 }
 0x832   : > { %5327 = vmatprep.subr.bf16.mxu0 %v2136_v26  ;;  %5901 = vpow2.f32 %v2081_v18 }
 0x833   : > { %v5894_v15 = vpop.eup %5893  ;;  %5903 = vpow2.f32 %v2079_v16 }
 0x834   : > { %v2087_v49 = vsel %vm977_vm0, %v5894_v15, 0.0  ;;  %5905 = vpow2.f32 %v2085_v45 }
 0x835   : > { %2088 = vadd.xlane.f32.xlu1 %v2087_v49  ;;  %5328 = vmatpush3.bf16.msra.mxu0 %v2136_v26 }
 0x837   : > { %v5896_v12 = vpop.eup %5895 }
 0x838   : > { %v2096_v48 = vsel %vm977_vm0, %v5896_v12, 0.0  ;;  %v5898_v1 = vpop.eup %5897 }
 0x839   : > { %2097 = vadd.xlane.f32.xlu0 %v2096_v48  ;;  %v2090_v19 = vsel %vm977_vm0, %v5898_v1, 0.0  ;;  %v7098_v25 = vpop.eup %5899 }
 0x83a   : > { %v2105_v53 = vsel %vm977_vm0, %v7098_v25, 0.0 }
 0x83d   : > { %2091 = vadd.xlane.f32.xlu0 %v2090_v19 }
 0x83f   : > { %v5902_v55 = vpop.eup %5901 }
 0x840   : > { %v2102_v59 = vsel %vm977_vm0, %v5902_v55, 0.0  ;;  %v5904_v62 = vpop.eup %5903 }
 0x841   : > { %2106 = vadd.xlane.f32.xlu0 %v2105_v53  ;;  %v2099_v14 = vsel %vm977_vm0, %v5904_v62, 0.0 }
 0x845   : > { %2103 = vadd.xlane.f32.xlu0 %v2102_v59 }
 0x846   : > { %2133 = vrot.lane.b32.xlu1 %v6471_v13, %s8234_s8  ;;  %v5906_v13 = vpop.eup %5905 }
 0x847   : > { %v2108_v54 = vsel %vm977_vm0, %v5906_v13, 0.0 }
 0x85b   : > { %2131 = vrot.lane.b32.xlu0 %v6479_v22, %s8234_s8  ;;  %v8278_v22 = vpack.i.bf16 %v6816_v56, %v6812_v44  ;;  %s8288_s8 = smov 112  }
 0x85f   : > { %5634 = vrot.lane.b32.xlu0 %v8275_v33, %s8236_s2 }
 0x86a   : > { %2100 = vadd.xlane.f32.xlu1 %v2099_v14  ;;  %v5767_v14 = vld [vmem:[%s8280_s30 + $0x18] sm:$0xff]  }
 0x86e   : > { %2109 = vadd.xlane.f32.xlu1 %v2108_v54 }
 0x87f   : > { %5624 = vrot.lane.b32.xlu1 %v8277_v41, %s8276_s0 }
 0x883   : > { %5629 = vrot.lane.b32.xlu1 %v8278_v22, %s8276_s0 }
 0x887   : > { %5639 = vrot.lane.b32.xlu1 %v8279_v38, %s8236_s2  ;;  %s8284_s2 = smov 32  }
 0x8ba   : > { %v2095_v63 = vpop.xlane.xlu1 %2094 }
 0x8be   : > { %v2089_v0 = vpop.xlane.xlu1 %2088 }
 0x8c2   : > { %v2098_v21 = vpop.xlane.xlu0 %2097  ;;  %v2134_v35 = vpop.permute.xlu1 %2133 }
 0x8c3   : > { %5329 = vmatprep.subr.bf16.mxu0 %v2134_v35  ;;  %5907 = vrcp.f32 %v2098_v21  ;;  %v8285_v21 = vpack.i.bf16 %v6982_v6, %v6976_v23 }
 0x8c4   : > { %5330 = vmatpush3.bf16.msra.mxu0 %v2134_v35  ;;  %5909 = vrcp.f32 %v2089_v0  ;;  %v8283_v0 = vpack.i.bf16 %v6832_v37, %v6826_v9  ;;  %v8286_v35 = vpack.i.bf16 %v6828_v17, %v6824_v61 }
 0x8c5   : > { %5911 = vrcp.f32 %v2095_v63 }
 0x8c6   : > { %v2092_v28 = vpop.xlane.xlu0 %2091 }
 0x8c7   : > { %5913 = vrcp.f32 %v2092_v28  ;;  %v8287_v28 = vpack.i.bf16 %v6978_v3, %v6974_v11 }
 0x8ca   : > { %v2107_v42 = vpop.xlane.xlu0 %2106 }
 0x8ce   : > { %v2104_v36 = vpop.xlane.xlu0 %2103 }
 0x8cf   : > { %5915 = vrcp.f32 %v2104_v36 }
 0x8d0   : > { %v5908_v44 = vpop.eup %5907 }
 0x8d1   : > { %v5910_v56 = vpop.eup %5909  ;;  %v2118_v52 = vmul.f32 %v5908_v44, %v5896_v12 }
 0x8d2   : > { %v2132_v30 = vpop.permute.xlu0 %2131  ;;  %v5912_v31 = vpop.eup %5911  ;;  %v2112_v18 = vmul.f32 %v5910_v56, %v5894_v15 }
 0x8d3   : > { %5331 = vmatprep.subr.bf16.mxu0 %v2132_v30  ;;  %v2116_v26 = vmul.f32 %v5912_v31, %v7091_v43 }
 0x8d4   : > { %v5914_v10 = vpop.eup %5913  ;;  %5332 = vmatpush3.bf16.msra.mxu0 %v2132_v30 }
 0x8d5   : > { %v2114_v7 = vmul.f32 %v5914_v10, %v5898_v1  ;;  %v2128_v48 = vpack.c.bf16 %v2118_v52, %v2116_v26  ;;  %5341 = vmatprep.subr.bf16.mxu0 %v5767_v14 }
 0x8d6   : > { %v5635_v6 = vpop.permute.xlu0 %5634 }
 0x8d7   : > { %v2127_v49 = vpack.c.bf16 %v2114_v7, %v2112_v18 }
 0x8d9   : > { %5333 = vmatprep.mubr.msk.bf16.mxu0 %vm977_vm0, %v2127_v49 }
 0x8da   : > { %5334 = vmatmul.mubr.msk.bf16.vlgmr.msra.gmra.mxu0 %vm977_vm0, %v2128_v48 }
 0x8db   : > { %5342 = vmatpush3.bf16.msra.mxu0 %v5767_v14 }
 0x8dc   : > { %v5916_v59 = vpop.eup %5915 }
 0x8dd   : > { %v2122_v60 = vmul.f32 %v5916_v59, %v5902_v55  ;;  %v5769_v55 = vld [vmem:[%s8280_s30 + $0x8] sm:$0xff]  }
 0x8f3   : > { %v2101_v19 = vpop.xlane.xlu1 %2100 }
 0x8f4   : > { %5917 = vrcp.f32 %v2101_v19  ;;  %v5637_v19 = vunpack.i.h.bf16 %v5635_v6 }
 0x8f5   : > { %5919 = vrcp.f32 %v2107_v42 }
 0x8f7   : > { %v2110_v53 = vpop.xlane.xlu1 %2109 }
 0x8f8   : > { %5921 = vrcp.f32 %v2110_v53  ;;  %v5636_v53 = vunpack.i.l.bf16 %v5635_v6  ;;  %v8290_v6 = vld [vmem:[#allocation14_spill] sm:$0xff] }
 0x8fb   : > { %v5625_v61 = vpop.permute.xlu1 %5624 }
 0x8fc   : > { %v5627_v11 = vunpack.i.h.bf16 %v5625_v61  ;;  %v5626_v3 = vunpack.i.l.bf16 %v5625_v61 }
 0x8fe   : > { %v2317_v18 = vsel %vm1091_vm1, %v6802_v34, %v5627_v11  ;;  %v2316_v26 = vsel %vm1091_vm1, %v6798_v40, %v5626_v3 }
 0x8ff   : > { %v5630_v17 = vpop.permute.xlu1 %5629 }
 0x900   : > { %v5632_v30 = vunpack.i.h.bf16 %v5630_v17  ;;  %v5631_v31 = vunpack.i.l.bf16 %v5630_v17 }
 0x901   : > { %v5918_v24 = vpop.eup %5917 }
 0x902   : > { %v2120_v12 = vmul.f32 %v5918_v24, %v5904_v62  ;;  %v5920_v15 = vpop.eup %5919  ;;  %v5768_v62 = vld [vmem:[%s8280_s30 + $0x10] sm:$0xff]   ;;  %v2319_v59 = vsel %vm1091_vm1, %v6800_v47, %v5632_v30  ;;  %v2318_v24 = vsel %vm1091_vm1, %v6796_v27, %v5631_v31  ;;  %v8291_v31 = vld [vmem:[#allocation12_spill] sm:$0xff] }
 0x903   : > { %v2124_v43 = vmul.f32 %v5920_v15, %v7098_v25  ;;  %5343 = vmatprep.subr.bf16.mxu0 %v5768_v62  ;;  %v5770_v25 = vld [vmem:[%s8280_s30] sm:$0xff]   ;;  %v5640_v23 = vpop.permute.xlu1 %5639 }
 0x904   : > { %v2129_v1 = vpack.c.bf16 %v2122_v60, %v2120_v12  ;;  %5344 = vmatpush3.bf16.msra.mxu0 %v5768_v62  ;;  %v5642_v10 = vunpack.i.h.bf16 %v5640_v23  ;;  %v5641_v52 = vunpack.i.l.bf16 %v5640_v23  ;;  %v8289_v23 = vld [vmem:[#allocation13_spill] sm:$0xff] }
 0x905   : > { %v5922_v16 = vpop.eup %5921  ;;  %5345 = vmatprep.subr.bf16.mxu0 %v5769_v55 }
 0x906   : > { %5337 = vmatprep.mubr.msk.bf16.mxu0 %vm977_vm0, %v2129_v1  ;;  %v2126_v45 = vmul.f32 %v5922_v16, %v5906_v13  ;;  %v2327_v60 = vsel %vm2324_vm2, %v2318_v24, %v5641_v52  ;;  %v2328_v34 = vsel %vm2324_vm2, %v2319_v59, %v5642_v10 }
 0x908   : > { %v2130_v33 = vpack.c.bf16 %v2126_v45, %v2124_v43  ;;  %5346 = vmatpush3.bf16.msra.mxu0 %v5769_v55  ;;  %v2325_v43 = vsel %vm2324_vm2, %v2316_v26, %v5636_v53  ;;  %v2326_v45 = vsel %vm2324_vm2, %v2317_v18, %v5637_v19 }
 0x909   : > { %5347 = vmatprep.subr.bf16.mxu0 %v5770_v25 }
 0x90a   : > { %5338 = vmatmul.mubr.msk.bf16.gmra.mxu0 %vm977_vm0, %v2130_v33 }
 0x90c   : > { %5348 = vmatpush3.bf16.msra.mxu0 %v5770_v25 }
 0x99a   : > { %v5335_v13 = vpop.f32.mrf.mxu0 }
 0x99c   : > { %v2189_v54 = vpop.f32.mrf.mxu0 }
 0x99e   : > { %v5336_v41 = vpop.f32.mrf.mxu0 }
 0x99f   : > { %v5643_v22 = vpack.i.bf16 %v5336_v41, %v5335_v13 }
 0x9a0   : > { %v2192_v38 = vpop.f32.mrf.mxu0 }
 0x9a1   : > { %v5648_v63 = vpack.i.bf16 %v2192_v38, %v2189_v54  ;;  %5644 = vrot.lane.b32.xlu1 %v5643_v22, %s8281_s5 }
 0x9a3   : > { %5649 = vrot.lane.b32.xlu0 %v5648_v63, %s8281_s5 }
 0x9a5   : > { %2635 = vrot.lane.b32.xlu1 %v7057_v5, %s8282_s10 }
 0x9a7   : > { %2637 = vrot.lane.b32.xlu0 %v7065_v29, %s8282_s10 }
 0x9a9   : > { %5654 = vrot.lane.b32.xlu1 %v8283_v0, %s8276_s0 }
 0x9ab   : > { %2633 = vrot.lane.b32.xlu0 %v7051_v51, %s8282_s10 }
 0x9ad   : > { %5664 = vrot.lane.b32.xlu1 %v8285_v21, %s8284_s2 }
 0x9af   : > { %5659 = vrot.lane.b32.xlu0 %v8286_v35, %s8276_s0 }
 0x9b3   : > { %5669 = vrot.lane.b32.xlu0 %v8287_v28, %s8284_s2 }
 0x9ca   : > { %v5339_v9 = vpop.f32.mrf.mxu0 }
 0x9cc   : > { %v2205_v37 = vpop.f32.mrf.mxu0 }
 0x9ce   : > { %v5340_v42 = vpop.f32.mrf.mxu0 }
 0x9cf   : > { %v5673_v36 = vpack.i.bf16 %v5340_v42, %v5339_v9 }
 0x9d0   : > { %v2208_v44 = vpop.f32.mrf.mxu0 }
 0x9d1   : > { %v5678_v56 = vpack.i.bf16 %v2208_v44, %v2205_v37  ;;  %5674 = vrot.lane.b32.xlu0 %v5673_v36, %s8281_s5 }
 0x9d3   : > { %5679 = vrot.lane.b32.xlu1 %v5678_v56, %s8281_s5 }
 0x9d5   : > { %2919 = vrot.lane.b32.xlu0 %v7065_v29, %s8281_s5 }
 0x9d7   : > { %2631 = vrot.lane.b32.xlu1 %v7047_v46, %s8282_s10 }
 0x9d9   : > { %2915 = vrot.lane.b32.xlu0 %v7051_v51, %s8281_s5 }
 0x9db   : > { %2917 = vrot.lane.b32.xlu1 %v7057_v5, %s8281_s5 }
 0x9dd   : > { %2905 = vrot.lane.b32.xlu0 %v7049_v50, %s8288_s8 }
 0x9df   : > { %2913 = vrot.lane.b32.xlu1 %v7047_v46, %s8281_s5 }
 0x9e1   : > { %2909 = vrot.lane.b32.xlu0 %v7059_v58, %s8288_s8 }
 0x9e3   : > { %2907 = vrot.lane.b32.xlu1 %v7053_v39, %s8288_s8 }
 0x9e7   : > { %2911 = vrot.lane.b32.xlu1 %v7067_v8, %s8288_s8 }
 0x9eb   : > { %3112 = vrot.lane.b32.xlu1 %v7069_v32, %s8288_s8 }
 0xa13   : > { %v5645_v7 = vpop.permute.xlu1 %5644 }
 0xa14   : > { %v5647_v49 = vunpack.i.h.bf16 %v5645_v7  ;;  %v5646_v48 = vunpack.i.l.bf16 %v5645_v7 }
 0xa15   : > { %v5650_v12 = vpop.permute.xlu0 %5649 }
 0xa16   : > { %v5652_v15 = vunpack.i.h.bf16 %v5650_v12  ;;  %v5651_v1 = vunpack.i.l.bf16 %v5650_v12  ;;  %v2336_v40 = vsel %vm2333_vm3, %v2327_v60, %v5646_v48  ;;  %v2337_v16 = vsel %vm2333_vm3, %v2328_v34, %v5647_v49 }
 0xa17   : > { %v2343_v62 = vpack.c.bf16 %v2337_v16, %v2336_v40  ;;  %v2636_v25 = vpop.permute.xlu1 %2635 }
 0xa18   : > { %v2334_v47 = vsel %vm2333_vm3, %v2325_v43, %v5651_v1  ;;  %v2335_v33 = vsel %vm2333_vm3, %v2326_v45, %v5652_v15  ;;  %v2658_v13 = vsel %vm1091_vm1, %v2636_v25, 0 }
 0xa19   : > { %v2638_v27 = vpop.permute.xlu0 %2637  ;;  %v2342_v14 = vpack.c.bf16 %v2335_v33, %v2334_v47 }
 0xa1a   : > { %5589 = vmatprep.subr.msk.bf16.mxu0 %vm1091_vm1, %v2638_v27  ;;  %v2661_v55 = vsel %vm1091_vm1, %v2638_v27, 0 }
 0xa1b   : > { %5349 = vmatprep.mubr.msk.bf16.mxu0 %vm977_vm0, %v2342_v14  ;;  %v5655_v38 = vpop.permute.xlu1 %5654 }
 0xa1c   : > { %5350 = vmatmul.mubr.msk.bf16.vlgmr.msra.gmra.mxu0 %vm977_vm0, %v2343_v62  ;;  %v5657_v21 = vunpack.i.h.bf16 %v5655_v38  ;;  %v5656_v35 = vunpack.i.l.bf16 %v5655_v38 }
 0xa1d   : > { %5358 = vmatpush3.bf16.xpose.msra.mxu0 %v2661_v55  ;;  %v2634_v54 = vpop.permute.xlu0 %2633 }
 0xa1e   : > { %5590 = vmatprep.subr.msk.bf16.mxu0 %vm1091_vm1, %v2636_v25  ;;  %v2655_v41 = vsel %vm1091_vm1, %v2634_v54, 0  ;;  %v2321_v11 = vsel %vm1091_vm1, %v6810_v2, %v5657_v21  ;;  %v2320_v3 = vsel %vm1091_vm1, %v8289_v23, %v5656_v35 }
 0xa1f   : > { %v5665_v0 = vpop.permute.xlu1 %5664 }
 0xa20   : > { %v5667_v36 = vunpack.i.h.bf16 %v5665_v0  ;;  %v5666_v44 = vunpack.i.l.bf16 %v5665_v0 }
 0xa21   : > { %v5660_v22 = vpop.permute.xlu0 %5659 }
 0xa22   : > { %v5662_v28 = vunpack.i.h.bf16 %v5660_v22  ;;  %v5661_v9 = vunpack.i.l.bf16 %v5660_v22  ;;  %v2329_v48 = vsel %vm2324_vm2, %v2320_v3, %v5666_v44  ;;  %v2330_v2 = vsel %vm2324_vm2, %v2321_v11, %v5667_v36  ;;  %v7300_v11 = vld [vmem:[%s8292_s1 + $0x8] sm:$0xff]  ;;  %v7305_v3 = vld [vmem:[%s8292_s1 + $0x30] sm:$0xff] }
 0xa24   : > { %v2323_v30 = vsel %vm1091_vm1, %v8290_v6, %v5662_v28  ;;  %v2322_v10 = vsel %vm1091_vm1, %v8291_v31, %v5661_v9  ;;  %v7277_v28 = vld [vmem:[%s8292_s1 + $0x10] sm:$0xff] }
 0xa25   : > { %5360 = vmatpush3.bf16.xpose.msra.mxu0 %v2658_v13  ;;  %v5670_v63 = vpop.permute.xlu0 %5669 }
 0xa26   : > { %5591 = vmatprep.subr.msk.bf16.mxu0 %vm1091_vm1, %v2634_v54  ;;  %v5672_v37 = vunpack.i.h.bf16 %v5670_v63  ;;  %v5671_v42 = vunpack.i.l.bf16 %v5670_v63 }
 0xa28   : > { %v2331_v18 = vsel %vm2324_vm2, %v2322_v10, %v5671_v42  ;;  %v2332_v7 = vsel %vm2324_vm2, %v2323_v30, %v5672_v37  ;;  %v7282_v37 = vld [vmem:[%s8292_s1] sm:$0xff] }
 0xa2d   : > { %5362 = vmatpush3.bf16.xpose.msra.mxu0 %v2655_v41 }
 0xa43   : > { %v5675_v56 = vpop.permute.xlu0 %5674 }
 0xa44   : > { %v5677_v61 = vunpack.i.h.bf16 %v5675_v56  ;;  %v5676_v17 = vunpack.i.l.bf16 %v5675_v56 }
 0xa45   : > { %v5680_v52 = vpop.permute.xlu1 %5679 }
 0xa46   : > { %v5682_v26 = vunpack.i.h.bf16 %v5680_v52  ;;  %v5681_v49 = vunpack.i.l.bf16 %v5680_v52  ;;  %v2341_v19 = vsel %vm2333_vm3, %v2332_v7, %v5677_v61  ;;  %v2340_v53 = vsel %vm2333_vm3, %v2331_v18, %v5676_v17  ;;  %v7295_v61 = vld [vmem:[%s8292_s1 + $0x18] sm:$0xff] }
 0xa47   : > { %v2345_v15 = vpack.c.bf16 %v2341_v19, %v2340_v53  ;;  %v2920_v1 = vpop.permute.xlu0 %2919  ;;  %v7335_v19 = vld [vmem:[%s8292_s1 + $0x28] sm:$0xff] }
 0xa48   : > { %v2338_v59 = vsel %vm2333_vm3, %v2329_v48, %v5681_v49  ;;  %v2339_v24 = vsel %vm2333_vm3, %v2330_v2, %v5682_v26  ;;  %v2943_v43 = vsel %vm1091_vm1, %v2920_v1, 0  ;;  %v7323_v26 = vld [vmem:[%s8292_s1 + $0x20] sm:$0xff]  ;;  %v7328_v49 = vld [vmem:[%s8292_s1 + $0x38] sm:$0xff] }
 0xa49   : > { %v2632_v12 = vpop.permute.xlu1 %2631  ;;  %v2344_v60 = vpack.c.bf16 %v2339_v24, %v2338_v59 }
 0xa4a   : > { %5592 = vmatprep.subr.msk.bf16.mxu0 %vm1091_vm1, %v2632_v12  ;;  %v2652_v34 = vsel %vm1091_vm1, %v2632_v12, 0 }
 0xa4b   : > { %5353 = vmatprep.mubr.msk.bf16.mxu0 %vm977_vm0, %v2344_v60  ;;  %5364 = vmatpush3.bf16.xpose.msra.mxu0 %v2652_v34  ;;  %v2916_v47 = vpop.permute.xlu0 %2915 }
 0xa4c   : > { %5354 = vmatmul.mubr.msk.bf16.gmra.mxu0 %vm977_vm0, %v2345_v15  ;;  %5593 = vmatprep.subr.msk.bf16.mxu0 %vm1091_vm1, %v2920_v1  ;;  %v2937_v55 = vsel %vm1091_vm1, %v2916_v47, 0 }
 0xa4d   : > { %v2918_v40 = vpop.permute.xlu1 %2917  ;;  %5365 = vmatprep.mubr.msk.bf16.mxu0 %vm1091_vm1, %v7049_v50 }
 0xa4e   : > { %v2940_v14 = vsel %vm1091_vm1, %v2918_v40, 0 }
 0xa4f   : > { %v2906_v27 = vpop.permute.xlu0 %2905 }
 0xa51   : > { %v2914_v16 = vpop.permute.xlu1 %2913 }
 0xa52   : > { %v2934_v25 = vsel %vm1091_vm1, %v2914_v16, 0 }
 0xa53   : > { %v2910_v13 = vpop.permute.xlu0 %2909 }
 0xa54   : > { %5366 = vmatmul.mubr.msk.bf16.vlgmr.msra.gmra.mxu0 %vm1091_vm1, %v7053_v39 }
 0xa55   : > { %5390 = vmatpush3.bf16.xpose.msra.mxu0 %v2943_v43  ;;  %v2908_v45 = vpop.permute.xlu1 %2907  ;;  %5369 = vmatprep.mubr.msk.bf16.mxu0 %vm1091_vm1, %v7059_v58 }
 0xa56   : > { %5594 = vmatprep.subr.msk.bf16.mxu0 %vm1091_vm1, %v2918_v40 }
 0xa59   : > { %v2912_v33 = vpop.permute.xlu1 %2911 }
 0xa5c   : > { %5370 = vmatmul.mubr.msk.bf16.gmra.mxu0 %vm1091_vm1, %v7067_v8 }
 0xa5d   : > { %5392 = vmatpush3.bf16.xpose.msra.mxu0 %v2940_v14  ;;  %v7247_v62 = vpop.permute.xlu1 %3112  ;;  %5397 = vmatprep.mubr.msk.bf16.mxu0 %vm1091_vm1, %v2906_v27 }
 0xa5e   : > { %5595 = vmatprep.subr.msk.bf16.mxu0 %vm1091_vm1, %v2916_v47  ;;  %5405 = vmatprep.subr.bf16.mxu1 %v7247_v62 }
 0xa65   : > { %5394 = vmatpush3.bf16.xpose.msra.mxu0 %v2937_v55 }
 0xa66   : > { %5596 = vmatprep.subr.msk.bf16.mxu0 %vm1091_vm1, %v2914_v16 }
 0xa6d   : > { %5396 = vmatpush3.bf16.xpose.msra.mxu0 %v2934_v25 }
 0xa74   : > { %5398 = vmatmul.mubr.msk.bf16.vlgmr.msra.gmra.mxu0 %vm1091_vm1, %v2908_v45 }
 0xa75   : > { %5401 = vmatprep.mubr.msk.bf16.mxu0 %vm1091_vm1, %v2910_v13 }
 0xa7c   : > { %5402 = vmatmul.mubr.msk.bf16.gmra.mxu0 %vm1091_vm1, %v2912_v33 }
 0xadc   : > { %v7258_v54 = vpop.f32.mrf.mxu0 }
 0xade   : > { %v7260_v41 = vpop.f32.mrf.mxu0 }
 0xae0   : > { %v7262_v22 = vpop.f32.mrf.mxu0 }
 0xae2   : > { %v7264_v38 = vpop.f32.mrf.mxu0 }
 0xb0c   : > { %v7266_v63 = vpop.f32.mrf.mxu0 }
 0xb0e   : > { %v7268_v0 = vpop.f32.mrf.mxu0 }
 0xb10   : > { %v7270_v21 = vpop.f32.mrf.mxu0 }
 0xb12   : > { %v7272_v35 = vpop.f32.mrf.mxu0 }
 0xb14   : > { %v5367_v9 = vpop.f32.mrf.mxu0 }
 0xb15   : > { %v7285_v42 = vadd.f32 %v5367_v9, %v7277_v28 }
 0xb16   : > { %v2697_v36 = vpop.f32.mrf.mxu0 }
 0xb17   : > { %v7288_v44 = vadd.f32 %v2697_v36, %v7282_v37  ;;  %v2734_v56 = vsel %vm977_vm0, %v7285_v42, -inf }
 0xb18   : > { %2735 = vmax.xlane.f32.xlu0 %v2734_v56  ;;  %v5368_v17 = vpop.f32.mrf.mxu0 }
 0xb19   : > { %v7308_v6 = vadd.f32 %v5368_v17, %v7295_v61  ;;  %v2728_v31 = vsel %vm977_vm0, %v7288_v44, -inf }
 0xb1a   : > { %v2700_v23 = vpop.f32.mrf.mxu0 }
 0xb1b   : > { %v7311_v30 = vadd.f32 %v2700_v23, %v7300_v11  ;;  %v2737_v48 = vsel %vm977_vm0, %v7308_v6, -inf }
 0xb1c   : > { %v5371_v10 = vpop.f32.mrf.mxu0  ;;  %2729 = vmax.xlane.f32.xlu0 %v2728_v31 }
 0xb1d   : > { %v7316_v52 = vadd.f32 %v5371_v10, %v7305_v3  ;;  %v2731_v18 = vsel %vm977_vm0, %v7311_v30, -inf }
 0xb1e   : > { %v2713_v7 = vpop.f32.mrf.mxu0  ;;  %2732 = vmax.xlane.f32.xlu1 %v2731_v18 }
 0xb1f   : > { %v7338_v53 = vadd.f32 %v2713_v7, %v7323_v26  ;;  %v2746_v24 = vsel %vm977_vm0, %v7316_v52, -inf }
 0xb20   : > { %v5372_v2 = vpop.f32.mrf.mxu0  ;;  %2738 = vmax.xlane.f32.xlu0 %v2737_v48 }
 0xb21   : > { %v7341_v59 = vadd.f32 %v5372_v2, %v7328_v49  ;;  %v2740_v15 = vsel %vm977_vm0, %v7338_v53, -inf }
 0xb22   : > { %v2716_v12 = vpop.f32.mrf.mxu0  ;;  %2747 = vmax.xlane.f32.xlu1 %v2746_v24 }
 0xb23   : > { %v7346_v60 = vadd.f32 %v2716_v12, %v7335_v19  ;;  %v2749_v34 = vsel %vm977_vm0, %v7341_v59, -inf }
 0xb24   : > { %2750 = vmax.xlane.f32.xlu0 %v2749_v34 }
 0xb25   : > { %v2743_v1 = vsel %vm977_vm0, %v7346_v60, -inf }
 0xb26   : > { %2741 = vmax.xlane.f32.xlu1 %v2740_v15 }
 0xb28   : > { %2744 = vmax.xlane.f32.xlu0 %v2743_v1 }
 0xb34   : > { %v5399_v40 = vpop.f32.mrf.mxu0 }
 0xb35   : > { %v7355_v16 = vadd.f32 %v5399_v40, %v7277_v28 }
 0xb36   : > { %v2979_v43 = vpop.f32.mrf.mxu0 }
 0xb37   : > { %v7358_v45 = vadd.f32 %v2979_v43, %v7282_v37  ;;  %v3016_v47 = vsel %vm977_vm0, %v7355_v16, -inf }
 0xb38   : > { %v5400_v33 = vpop.f32.mrf.mxu0  ;;  %3017 = vmax.xlane.f32.xlu1 %v3016_v47 }
 0xb39   : > { %v7363_v27 = vadd.f32 %v5400_v33, %v7295_v61  ;;  %v3010_v25 = vsel %vm977_vm0, %v7358_v45, -inf }
 0xb3a   : > { %v2982_v14 = vpop.f32.mrf.mxu0 }
 0xb3b   : > { %v7366_v55 = vadd.f32 %v2982_v14, %v7300_v11  ;;  %v3019_v13 = vsel %vm977_vm0, %v7363_v27, -inf }
 0xb3c   : > { %3011 = vmax.xlane.f32.xlu1 %v3010_v25  ;;  %3020 = vmax.xlane.f32.xlu0 %v3019_v13  ;;  %v5403_v36 = vpop.f32.mrf.mxu0 }
 0xb3d   : > { %v3013_v9 = vsel %vm977_vm0, %v7366_v55, -inf  ;;  %v7379_v17 = vadd.f32 %v5403_v36, %v7305_v3 }
 0xb3e   : > { %v2995_v56 = vpop.f32.mrf.mxu0 }
 0xb3f   : > { %v7382_v31 = vadd.f32 %v2995_v56, %v7323_v26  ;;  %v3028_v18 = vsel %vm977_vm0, %v7379_v17, -inf }
 0xb40   : > { %3014 = vmax.xlane.f32.xlu0 %v3013_v9  ;;  %v5404_v23 = vpop.f32.mrf.mxu0 }
 0xb41   : > { %v7385_v10 = vadd.f32 %v5404_v23, %v7328_v49  ;;  %v3022_v2 = vsel %vm977_vm0, %v7382_v31, -inf }
 0xb42   : > { %v2998_v7 = vpop.f32.mrf.mxu0 }
 0xb43   : > { %v7390_v48 = vadd.f32 %v2998_v7, %v7335_v19  ;;  %v3031_v24 = vsel %vm977_vm0, %v7385_v10, -inf }
 0xb45   : > { %v3025_v12 = vsel %vm977_vm0, %v7390_v48, -inf }
 0xb4d   : > { %3108 = vrot.lane.b32.xlu1 %v7076_v20, %s8288_s8 }
 0xb56   : > { %3110 = vrot.lane.b32.xlu0 %v7071_v4, %s8288_s8 }
 0xb71   : > { %3029 = vmax.xlane.f32.xlu1 %v3028_v18 }
 0xb75   : > { %3023 = vmax.xlane.f32.xlu1 %v3022_v2  ;;  %3032 = vmax.xlane.f32.xlu0 %v3031_v24 }
 0xb79   : > { %3026 = vmax.xlane.f32.xlu0 %v3025_v12 }
 0xba1   : > { %v2736_v34 = vpop.xlane.xlu0 %2735 }
 0xba2   : > { %v2754_v15 = vsub.f32 %v7285_v42, %v2736_v34 }
 0xba4   : > { %v2764_v1 = vmul.f32 1.442695, %v2754_v15 }
 0xba5   : > { %v2730_v40 = vpop.xlane.xlu0 %2729 }
 0xba6   : > { %5923 = vpow2.f32 %v2764_v1  ;;  %v2752_v43 = vsub.f32 %v7288_v44, %v2730_v40 }
 0xba7   : > { %v2733_v47 = vpop.xlane.xlu1 %2732 }
 0xba8   : > { %v2760_v33 = vmul.f32 1.442695, %v2752_v43  ;;  %v2753_v14 = vsub.f32 %v7311_v30, %v2733_v47 }
 0xba9   : > { %v2739_v25 = vpop.xlane.xlu0 %2738 }
 0xbaa   : > { %5925 = vpow2.f32 %v2760_v33  ;;  %v2755_v13 = vsub.f32 %v7308_v6, %v2739_v25  ;;  %v2762_v9 = vmul.f32 1.442695, %v2753_v14 }
 0xbab   : > { %v2748_v36 = vpop.xlane.xlu1 %2747 }
 0xbac   : > { %v2766_v56 = vmul.f32 1.442695, %v2755_v13  ;;  %v2758_v23 = vsub.f32 %v7316_v52, %v2748_v36 }
 0xbad   : > { %v2751_v18 = vpop.xlane.xlu0 %2750 }
 0xbae   : > { %5927 = vpow2.f32 %v2766_v56  ;;  %v2772_v42 = vmul.f32 1.442695, %v2758_v23  ;;  %v2759_v7 = vsub.f32 %v7341_v59, %v2751_v18 }
 0xbaf   : > { %5929 = vpow2.f32 %v2762_v9  ;;  %v2742_v44 = vpop.xlane.xlu1 %2741 }
 0xbb0   : > { %5931 = vpow2.f32 %v2772_v42  ;;  %v2774_v2 = vmul.f32 1.442695, %v2759_v7  ;;  %v2756_v30 = vsub.f32 %v7338_v53, %v2742_v44 }
 0xbb1   : > { %v2745_v24 = vpop.xlane.xlu0 %2744 }
 0xbb2   : > { %v2768_v12 = vmul.f32 1.442695, %v2756_v30  ;;  %v2757_v6 = vsub.f32 %v7346_v60, %v2745_v24  ;;  %5933 = vpow2.f32 %v2774_v2 }
 0xbb3   : > { %v7406_v34 = vpop.eup %5923 }
 0xbb4   : > { %5935 = vpow2.f32 %v2768_v12  ;;  %v2770_v52 = vmul.f32 1.442695, %v2757_v6  ;;  %v2782_v15 = vsel %vm977_vm0, %v7406_v34, 0.0 }
 0xbb5   : > { %2783 = vadd.xlane.f32.xlu1 %v2782_v15 }
 0xbb6   : > { %5937 = vpow2.f32 %v2770_v52 }
 0xbb7   : > { %v7410_v59 = vpop.eup %5925 }
 0xbb8   : > { %v2776_v1 = vsel %vm977_vm0, %v7410_v59, 0.0 }
 0xbb9   : > { %2777 = vadd.xlane.f32.xlu1 %v2776_v1 }
 0xbbb   : > { %v7414_v53 = vpop.eup %5927 }
 0xbbc   : > { %v7416_v40 = vpop.eup %5929  ;;  %v2785_v60 = vsel %vm977_vm0, %v7414_v53, 0.0 }
 0xbbd   : > { %v7420_v43 = vpop.eup %5931  ;;  %2786 = vadd.xlane.f32.xlu0 %v2785_v60  ;;  %v2779_v14 = vsel %vm977_vm0, %v7416_v40, 0.0 }
 0xbbe   : > { %v2794_v47 = vsel %vm977_vm0, %v7420_v43, 0.0 }
 0xbbf   : > { %2795 = vadd.xlane.f32.xlu1 %v2794_v47  ;;  %v7424_v33 = vpop.eup %5933 }
 0xbc0   : > { %v2797_v23 = vsel %vm977_vm0, %v7424_v33, 0.0 }
 0xbc1   : > { %v7428_v25 = vpop.eup %5935  ;;  %v3018_v13 = vpop.xlane.xlu1 %3017  ;;  %2780 = vadd.xlane.f32.xlu0 %v2779_v14 }
 0xbc2   : > { %v3036_v9 = vsub.f32 %v7355_v16, %v3018_v13  ;;  %v2788_v36 = vsel %vm977_vm0, %v7428_v25, 0.0 }
 0xbc3   : > { %2789 = vadd.xlane.f32.xlu1 %v2788_v36  ;;  %v7435_v18 = vpop.eup %5937 }
 0xbc4   : > { %v3046_v56 = vmul.f32 1.442695, %v3036_v9  ;;  %v2791_v24 = vsel %vm977_vm0, %v7435_v18, 0.0 }
 0xbc5   : > { %v3012_v42 = vpop.xlane.xlu1 %3011  ;;  %v3021_v7 = vpop.xlane.xlu0 %3020  ;;  %2798 = vadd.xlane.f32.xlu0 %v2797_v23 }
 0xbc6   : > { %5939 = vpow2.f32 %v3046_v56  ;;  %v3034_v44 = vsub.f32 %v7358_v45, %v3012_v42  ;;  %v3037_v2 = vsub.f32 %v7363_v27, %v3021_v7 }
 0xbc8   : > { %v3042_v30 = vmul.f32 1.442695, %v3034_v44  ;;  %v3048_v16 = vmul.f32 1.442695, %v3037_v2 }
 0xbc9   : > { %v3015_v12 = vpop.xlane.xlu0 %3014  ;;  %2792 = vadd.xlane.f32.xlu0 %v2791_v24  ;;  %v7464_v13 = vpop.permute.xlu1 %3108 }
 0xbca   : > { %5941 = vpow2.f32 %v3042_v30  ;;  %v3035_v6 = vsub.f32 %v7366_v55, %v3015_v12 }
 0xbcb   : > { %5943 = vpow2.f32 %v3048_v16 }
 0xbcc   : > { %v3044_v52 = vmul.f32 1.442695, %v3035_v6 }
 0xbcd   : > { %v7466_v9 = vpop.permute.xlu0 %3110 }
 0xbce   : > { %5945 = vpow2.f32 %v3044_v52 }
 0xbd3   : > { %v7442_v15 = vpop.eup %5939 }
 0xbd4   : > { %v3064_v45 = vsel %vm977_vm0, %v7442_v15, 0.0 }
 0xbd5   : > { %3065 = vadd.xlane.f32.xlu1 %v3064_v45 }
 0xbd7   : > { %v7446_v27 = vpop.eup %5941 }
 0xbd8   : > { %v7448_v1 = vpop.eup %5943  ;;  %v3058_v60 = vsel %vm977_vm0, %v7446_v27, 0.0 }
 0xbd9   : > { %3059 = vadd.xlane.f32.xlu1 %v3058_v60  ;;  %v3067_v55 = vsel %vm977_vm0, %v7448_v1, 0.0 }
 0xbda   : > { %3068 = vadd.xlane.f32.xlu0 %v3067_v55 }
 0xbdb   : > { %v7454_v47 = vpop.eup %5945 }
 0xbdc   : > { %v3061_v14 = vsel %vm977_vm0, %v7454_v47, 0.0 }
 0xbde   : > { %3062 = vadd.xlane.f32.xlu0 %v3061_v14 }
 0xbea   : > { %3209 = vrot.lane.b32.xlu1 %v7065_v29, %s8284_s2 }
 0xbee   : > { %3207 = vrot.lane.b32.xlu1 %v7057_v5, %s8284_s2 }
 0xbf4   : > { %3106 = vrot.lane.b32.xlu0 %v7080_v57, %s8288_s8  ;;  %s8293_s8 = smov 96  }
 0xbfa   : > { %v3030_v36 = vpop.xlane.xlu1 %3029 }
 0xbfb   : > { %v3040_v56 = vsub.f32 %v7379_v17, %v3030_v36 }
 0xbfd   : > { %v3054_v23 = vmul.f32 1.442695, %v3040_v56 }
 0xbfe   : > { %v3024_v42 = vpop.xlane.xlu1 %3023  ;;  %v3033_v7 = vpop.xlane.xlu0 %3032 }
 0xbff   : > { %v3038_v44 = vsub.f32 %v7382_v31, %v3024_v42  ;;  %v3041_v2 = vsub.f32 %v7385_v10, %v3033_v7  ;;  %5947 = vpow2.f32 %v3054_v23 }
 0xc01   : > { %v3050_v30 = vmul.f32 1.442695, %v3038_v44  ;;  %v3056_v16 = vmul.f32 1.442695, %v3041_v2 }
 0xc02   : > { %v3027_v24 = vpop.xlane.xlu0 %3026 }
 0xc03   : > { %5949 = vpow2.f32 %v3050_v30  ;;  %v3039_v12 = vsub.f32 %v7390_v48, %v3027_v24 }
 0xc04   : > { %5951 = vpow2.f32 %v3056_v16 }
 0xc05   : > { %v3052_v6 = vmul.f32 1.442695, %v3039_v12 }
 0xc07   : > { %5953 = vpow2.f32 %v3052_v6 }
 0xc0c   : > { %v7472_v52 = vpop.eup %5947 }
 0xc0d   : > { %v3076_v10 = vsel %vm977_vm0, %v7472_v52, 0.0 }
 0xc10   : > { %v7474_v17 = vpop.eup %5949 }
 0xc11   : > { %v3070_v45 = vsel %vm977_vm0, %v7474_v17, 0.0  ;;  %v7478_v31 = vpop.eup %5951 }
 0xc12   : > { %3071 = vadd.xlane.f32.xlu1 %v3070_v45  ;;  %v3079_v48 = vsel %vm977_vm0, %v7478_v31, 0.0 }
 0xc13   : > { %3077 = vadd.xlane.f32.xlu0 %v3076_v10 }
 0xc14   : > { %v7482_v60 = vpop.eup %5953 }
 0xc15   : > { %v3073_v55 = vsel %vm977_vm0, %v7482_v60, 0.0 }
 0xc16   : > { %3080 = vadd.xlane.f32.xlu1 %v3079_v48 }
 0xc17   : > { %3074 = vadd.xlane.f32.xlu0 %v3073_v55 }
 0xc27   : > { %3203 = vrot.lane.b32.xlu1 %v7047_v46, %s8284_s2 }
 0xc2b   : > { %3197 = vrot.lane.b32.xlu1 %v7053_v39, %s8293_s8 }
 0xc2d   : > { %3205 = vrot.lane.b32.xlu0 %v7051_v51, %s8284_s2 }
 0xc2f   : > { %3201 = vrot.lane.b32.xlu1 %v7067_v8, %s8293_s8 }
 0xc31   : > { %3195 = vrot.lane.b32.xlu0 %v7049_v50, %s8293_s8 }
 0xc33   : > { %3398 = vrot.lane.b32.xlu1 %v7069_v32, %s8293_s8 }
 0xc35   : > { %3199 = vrot.lane.b32.xlu0 %v7059_v58, %s8293_s8 }
 0xc3e   : > { %v2784_v14 = vpop.xlane.xlu1 %2783 }
 0xc42   : > { %v2778_v36 = vpop.xlane.xlu1 %2777 }
 0xc46   : > { %v2787_v56 = vpop.xlane.xlu0 %2786 }
 0xc47   : > { %5955 = vrcp.f32 %v2787_v56 }
 0xc48   : > { %v2796_v23 = vpop.xlane.xlu1 %2795  ;;  %5957 = vrcp.f32 %v2778_v36 }
 0xc49   : > { %5959 = vrcp.f32 %v2784_v14 }
 0xc4a   : > { %v2781_v42 = vpop.xlane.xlu0 %2780 }
 0xc4b   : > { %5961 = vrcp.f32 %v2781_v42 }
 0xc4c   : > { %v2790_v7 = vpop.xlane.xlu1 %2789 }
 0xc4e   : > { %v2799_v44 = vpop.xlane.xlu0 %2798 }
 0xc4f   : > { %5963 = vrcp.f32 %v2799_v44 }
 0xc50   : > { %5965 = vrcp.f32 %v2790_v7 }
 0xc51   : > { %5967 = vrcp.f32 %v2796_v23 }
 0xc52   : > { %v2793_v2 = vpop.xlane.xlu0 %2792 }
 0xc53   : > { %5969 = vrcp.f32 %v2793_v2 }
 0xc54   : > { %v5956_v30 = vpop.eup %5955 }
 0xc55   : > { %v5958_v16 = vpop.eup %5957  ;;  %v2807_v6 = vmul.f32 %v5956_v30, %v7414_v53 }
 0xc56   : > { %v5960_v24 = vpop.eup %5959  ;;  %v2801_v45 = vmul.f32 %v5958_v16, %v7410_v59 }
 0xc57   : > { %v2805_v48 = vmul.f32 %v5960_v24, %v7406_v34 }
 0xc58   : > { %v5962_v12 = vpop.eup %5961 }
 0xc59   : > { %v2803_v10 = vmul.f32 %v5962_v12, %v7416_v40  ;;  %v2817_v14 = vpack.c.bf16 %v2807_v6, %v2805_v48 }
 0xc5b   : > { %v2816_v55 = vpack.c.bf16 %v2803_v10, %v2801_v45 }
 0xc5c   : > { %v5964_v36 = vpop.eup %5963 }
 0xc5d   : > { %5381 = vmatprep.mubr.msk.bf16.mxu1 %vm977_vm0, %v2816_v55  ;;  %v5966_v56 = vpop.eup %5965  ;;  %v2815_v59 = vmul.f32 %v5964_v36, %v7424_v33 }
 0xc5e   : > { %v3066_v23 = vpop.xlane.xlu1 %3065  ;;  %5382 = vmatmul.mubr.msk.bf16.vlgmr.msra.gmra.mxu1 %vm977_vm0, %v2817_v14  ;;  %v5968_v42 = vpop.eup %5967  ;;  %v2809_v53 = vmul.f32 %v5966_v56, %v7428_v25 }
 0xc5f   : > { %5406 = vmatpush3.bf16.msra.mxu1 %v7247_v62  ;;  %v2813_v40 = vmul.f32 %v5968_v42, %v7420_v43 }
 0xc60   : > { %v5970_v7 = vpop.eup %5969  ;;  %5407 = vmatprep.subr.bf16.mxu1 %v7466_v9 }
 0xc61   : > { %v2811_v34 = vmul.f32 %v5970_v7, %v7435_v18  ;;  %v2819_v16 = vpack.c.bf16 %v2815_v59, %v2813_v40 }
 0xc62   : > { %v3060_v44 = vpop.xlane.xlu1 %3059 }
 0xc63   : > { %v3069_v2 = vpop.xlane.xlu0 %3068  ;;  %5408 = vmatpush3.bf16.msra.mxu1 %v7466_v9  ;;  %v2818_v30 = vpack.c.bf16 %v2811_v34, %v2809_v53 }
 0xc64   : > { %5409 = vmatprep.subr.bf16.mxu1 %v7464_v13  ;;  %5971 = vrcp.f32 %v3069_v2 }
 0xc65   : > { %5385 = vmatprep.mubr.msk.bf16.mxu1 %vm977_vm0, %v2818_v30  ;;  %5973 = vrcp.f32 %v3060_v44 }
 0xc66   : > { %5386 = vmatmul.mubr.msk.bf16.gmra.mxu1 %vm977_vm0, %v2819_v16  ;;  %5975 = vrcp.f32 %v3066_v23  ;;  %v3210_v33 = vpop.permute.xlu1 %3209 }
 0xc67   : > { %v3063_v62 = vpop.xlane.xlu0 %3062  ;;  %5410 = vmatpush3.bf16.msra.mxu1 %v7464_v13  ;;  %v3233_v55 = vsel %vm1091_vm1, %v3210_v33, 0 }
 0xc68   : > { %5977 = vrcp.f32 %v3063_v62 }
 0xc6a   : > { %v3208_v14 = vpop.permute.xlu1 %3207 }
 0xc6b   : > { %v3107_v43 = vpop.permute.xlu0 %3106 }
 0xc6c   : > { %5411 = vmatprep.subr.bf16.mxu1 %v3107_v43 }
 0xc6d   : > { %5412 = vmatpush3.bf16.msra.mxu1 %v3107_v43 }
 0xc6e   : > { %5597 = vmatprep.subr.msk.bf16.mxu1 %vm1091_vm1, %v3210_v33 }
 0xc71   : > { %v5972_v25 = vpop.eup %5971 }
 0xc72   : > { %v5974_v18 = vpop.eup %5973  ;;  %v3089_v12 = vmul.f32 %v5972_v25, %v7448_v1  ;;  %v3230_v1 = vsel %vm1091_vm1, %v3208_v14, 0 }
 0xc73   : > { %v5976_v9 = vpop.eup %5975  ;;  %v3083_v6 = vmul.f32 %v5974_v18, %v7446_v27 }
 0xc74   : > { %v3087_v10 = vmul.f32 %v5976_v9, %v7442_v15 }
 0xc75   : > { %v5978_v24 = vpop.eup %5977 }
 0xc76   : > { %v3085_v45 = vmul.f32 %v5978_v24, %v7454_v47  ;;  %v3099_v48 = vpack.c.bf16 %v3089_v12, %v3087_v10 }
 0xc78   : > { %v3098_v13 = vpack.c.bf16 %v3085_v45, %v3083_v6 }
 0xc7a   : > { %5413 = vmatprep.mubr.msk.bf16.mxu1 %vm977_vm0, %v3098_v13 }
 0xc7b   : > { %5414 = vmatmul.mubr.msk.bf16.vlgmr.msra.gmra.mxu1 %vm977_vm0, %v3099_v48 }
 0xc7c   : > { %5422 = vmatpush3.bf16.xpose.msra.mxu1 %v3233_v55 }
 0xc7d   : > { %5598 = vmatprep.subr.msk.bf16.mxu1 %vm1091_vm1, %v3208_v14 }
 0xc84   : > { %5424 = vmatpush3.bf16.xpose.msra.mxu1 %v3230_v1 }
 0xc9b   : > { %v3072_v27 = vpop.xlane.xlu1 %3071 }
 0xc9c   : > { %v3078_v36 = vpop.xlane.xlu0 %3077 }
 0xc9d   : > { %5979 = vrcp.f32 %v3078_v36 }
 0xc9e   : > { %5981 = vrcp.f32 %v3072_v27 }
 0xc9f   : > { %v3081_v15 = vpop.xlane.xlu1 %3080 }
 0xca0   : > { %5983 = vrcp.f32 %v3081_v15  ;;  %v3075_v47 = vpop.xlane.xlu0 %3074 }
 0xca1   : > { %5985 = vrcp.f32 %v3075_v47 }
 0xca3   : > { %v3204_v56 = vpop.permute.xlu1 %3203 }
 0xca4   : > { %v3206_v23 = vpop.permute.xlu0 %3205  ;;  %v3224_v44 = vsel %vm1091_vm1, %v3204_v56, 0 }
 0xca5   : > { %v3227_v42 = vsel %vm1091_vm1, %v3206_v23, 0  ;;  %5599 = vmatprep.subr.msk.bf16.mxu1 %vm1091_vm1, %v3206_v23 }
 0xca6   : > { %5426 = vmatpush3.bf16.xpose.msra.mxu1 %v3227_v42 }
 0xca7   : > { %5600 = vmatprep.subr.msk.bf16.mxu1 %vm1091_vm1, %v3204_v56  ;;  %v3198_v7 = vpop.permute.xlu1 %3197 }
 0xca8   : > { %v3196_v9 = vpop.permute.xlu0 %3195 }
 0xcaa   : > { %v5980_v59 = vpop.eup %5979 }
 0xcab   : > { %v3202_v53 = vpop.permute.xlu1 %3201  ;;  %v5982_v34 = vpop.eup %5981  ;;  %v3095_v30 = vmul.f32 %v5980_v59, %v7472_v52 }
 0xcac   : > { %v3091_v43 = vmul.f32 %v5982_v34, %v7474_v17  ;;  %v3200_v24 = vpop.permute.xlu0 %3199 }
 0xcad   : > { %v5984_v40 = vpop.eup %5983 }
 0xcae   : > { %v5986_v2 = vpop.eup %5985  ;;  %5428 = vmatpush3.bf16.xpose.msra.mxu1 %v3224_v44  ;;  %v3097_v16 = vmul.f32 %v5984_v40, %v7478_v31 }
 0xcaf   : > { %v3399_v62 = vpop.permute.xlu1 %3398  ;;  %v3093_v33 = vmul.f32 %v5986_v2, %v7482_v60 }
 0xcb0   : > { %5437 = vmatprep.subr.bf16.mxu0 %v3399_v62  ;;  %v3101_v25 = vpack.c.bf16 %v3097_v16, %v3095_v30 }
 0xcb1   : > { %5438 = vmatpush3.bf16.msra.mxu0 %v3399_v62  ;;  %v3100_v18 = vpack.c.bf16 %v3093_v33, %v3091_v43 }
 0xcb3   : > { %5417 = vmatprep.mubr.msk.bf16.mxu1 %vm977_vm0, %v3100_v18 }
 0xcb4   : > { %5418 = vmatmul.mubr.msk.bf16.gmra.mxu1 %vm977_vm0, %v3101_v25 }
 0xcb5   : > { %5429 = vmatprep.mubr.msk.bf16.mxu1 %vm1091_vm1, %v3196_v9 }
 0xcbc   : > { %5430 = vmatmul.mubr.msk.bf16.vlgmr.msra.gmra.mxu1 %vm1091_vm1, %v3198_v7 }
 0xcbd   : > { %5433 = vmatprep.mubr.msk.bf16.mxu1 %vm1091_vm1, %v3200_v24 }
 0xcc4   : > { %5434 = vmatmul.mubr.msk.bf16.gmra.mxu1 %vm1091_vm1, %v3202_v53 }
 0xd1e   : > { %v7543_v52 = vpop.f32.mrf.mxu1 }
 0xd20   : > { %v7545_v17 = vpop.f32.mrf.mxu1 }
 0xd22   : > { %v7547_v31 = vpop.f32.mrf.mxu1 }
 0xd24   : > { %v7549_v60 = vpop.f32.mrf.mxu1 }
 0xd26   : > { %v7551_v12 = vpop.f32.mrf.mxu1 }
 0xd28   : > { %v7553_v6 = vpop.f32.mrf.mxu1 }
 0xd2a   : > { %v7555_v45 = vpop.f32.mrf.mxu1 }
 0xd2c   : > { %v7557_v10 = vpop.f32.mrf.mxu1 }
 0xd3b   : > { %v7559_v13 = vpop.f32.mrf.mxu1 }
 0xd3d   : > { %v7561_v48 = vpop.f32.mrf.mxu1 }
 0xd3f   : > { %v7563_v55 = vpop.f32.mrf.mxu1 }
 0xd40   : > { %v5688_v14 = vpack.i.bf16 %v7563_v55, %v7559_v13 }
 0xd41   : > { %v7567_v1 = vpop.f32.mrf.mxu1 }
 0xd42   : > { %v5683_v27 = vpack.i.bf16 %v7567_v1, %v7561_v48 }
 0xd74   : > { %v7571_v36 = vpop.f32.mrf.mxu1 }
 0xd76   : > { %v7573_v15 = vpop.f32.mrf.mxu1 }
 0xd78   : > { %v7575_v47 = vpop.f32.mrf.mxu1 }
 0xd7a   : > { %v7579_v23 = vpop.f32.mrf.mxu1 }
 0xd7c   : > { %v5431_v7 = vpop.f32.mrf.mxu1 }
 0xd7d   : > { %v3278_v59 = vadd.f32 %v5431_v7, %v7277_v28 }
 0xd7e   : > { %v3269_v53 = vpop.f32.mrf.mxu1 }
 0xd7f   : > { %v3270_v34 = vadd.f32 %v3269_v53, %v7282_v37  ;;  %v3306_v40 = vsel %vm977_vm0, %v3278_v59, -inf }
 0xd80   : > { %3307 = vmax.xlane.f32.xlu0 %v3306_v40  ;;  %v5432_v44 = vpop.f32.mrf.mxu1 }
 0xd81   : > { %v3281_v30 = vadd.f32 %v5432_v44, %v7295_v61  ;;  %v3300_v62 = vsel %vm977_vm0, %v3270_v34, -inf }
 0xd82   : > { %v3272_v2 = vpop.f32.mrf.mxu1 }
 0xd83   : > { %v3273_v16 = vadd.f32 %v3272_v2, %v7300_v11  ;;  %v3309_v25 = vsel %vm977_vm0, %v3281_v30, -inf }
 0xd84   : > { %3301 = vmax.xlane.f32.xlu0 %v3300_v62  ;;  %v5435_v43 = vpop.f32.mrf.mxu1 }
 0xd85   : > { %v7590_v33 = vadd.f32 %v5435_v43, %v7305_v3  ;;  %v3303_v28 = vsel %vm977_vm0, %v3273_v16, -inf }
 0xd86   : > { %3304 = vmax.xlane.f32.xlu1 %v3303_v28  ;;  %v3285_v37 = vpop.f32.mrf.mxu1 }
 0xd87   : > { %v3286_v9 = vadd.f32 %v3285_v37, %v7323_v26  ;;  %v3318_v11 = vsel %vm977_vm0, %v7590_v33, -inf }
 0xd88   : > { %3310 = vmax.xlane.f32.xlu0 %v3309_v25  ;;  %v5436_v18 = vpop.f32.mrf.mxu1 }
 0xd89   : > { %v3297_v61 = vadd.f32 %v5436_v18, %v7328_v49  ;;  %v3312_v53 = vsel %vm977_vm0, %v3286_v9, -inf }
 0xd8a   : > { %3319 = vmax.xlane.f32.xlu1 %v3318_v11  ;;  %v3288_v24 = vpop.f32.mrf.mxu1 }
 0xd8b   : > { %v3289_v3 = vadd.f32 %v3288_v24, %v7335_v19  ;;  %v3321_v7 = vsel %vm977_vm0, %v3297_v61, -inf }
 0xd8c   : > { %3322 = vmax.xlane.f32.xlu0 %v3321_v7 }
 0xd8d   : > { %v3315_v40 = vsel %vm977_vm0, %v3289_v3, -inf }
 0xd8e   : > { %3313 = vmax.xlane.f32.xlu1 %v3312_v53 }
 0xd90   : > { %3316 = vmax.xlane.f32.xlu0 %v3315_v40 }
 0xd9f   : > { %3394 = vrot.lane.b32.xlu1 %v7076_v20, %s8293_s8 }
 0xda6   : > { %3396 = vrot.lane.b32.xlu0 %v7071_v4, %s8293_s8 }
 0xe09   : > { %v3308_v26 = vpop.xlane.xlu0 %3307 }
 0xe0a   : > { %v3326_v49 = vsub.f32 %v3278_v59, %v3308_v26 }
 0xe0c   : > { %v3336_v44 = vmul.f32 1.442695, %v3326_v49 }
 0xe0d   : > { %v3302_v2 = vpop.xlane.xlu0 %3301 }
 0xe0e   : > { %5987 = vpow2.f32 %v3336_v44  ;;  %v3324_v19 = vsub.f32 %v3270_v34, %v3302_v2 }
 0xe0f   : > { %v3305_v62 = vpop.xlane.xlu1 %3304 }
 0xe10   : > { %v3332_v43 = vmul.f32 1.442695, %v3324_v19  ;;  %v3325_v28 = vsub.f32 %v3273_v16, %v3305_v62 }
 0xe11   : > { %v3311_v37 = vpop.xlane.xlu0 %3310 }
 0xe12   : > { %5989 = vpow2.f32 %v3332_v43  ;;  %v3327_v25 = vsub.f32 %v3281_v30, %v3311_v37  ;;  %v3334_v11 = vmul.f32 1.442695, %v3325_v28 }
 0xe13   : > { %v3320_v18 = vpop.xlane.xlu1 %3319 }
 0xe14   : > { %v3338_v24 = vmul.f32 1.442695, %v3327_v25  ;;  %v3330_v43 = vsub.f32 %v7590_v33, %v3320_v18 }
 0xe15   : > { %v3323_v7 = vpop.xlane.xlu0 %3322 }
 0xe16   : > { %5991 = vpow2.f32 %v3338_v24  ;;  %v3331_v28 = vsub.f32 %v3297_v61, %v3323_v7  ;;  %v3344_v25 = vmul.f32 1.442695, %v3330_v43 }
 0xe17   : > { %5993 = vpow2.f32 %v3334_v11  ;;  %v3314_v53 = vpop.xlane.xlu1 %3313 }
 0xe18   : > { %v3328_v62 = vsub.f32 %v3286_v9, %v3314_v53  ;;  %v3346_v11 = vmul.f32 1.442695, %v3331_v28 }
 0xe19   : > { %v3317_v40 = vpop.xlane.xlu0 %3316 }
 0xe1a   : > { %v3340_v37 = vmul.f32 1.442695, %v3328_v62  ;;  %v3329_v24 = vsub.f32 %v3289_v3, %v3317_v40 }
 0xe1b   : > { %v7606_v42 = vpop.eup %5987  ;;  %v3395_v26 = vpop.permute.xlu1 %3394 }
 0xe1c   : > { %v3354_v59 = vsel %vm977_vm0, %v7606_v42, 0.0  ;;  %5995 = vpow2.f32 %v3340_v37 }
 0xe1d   : > { %3355 = vadd.xlane.f32.xlu1 %v3354_v59  ;;  %v3397_v34 = vpop.permute.xlu0 %3396  ;;  %5997 = vpow2.f32 %v3344_v25  ;;  %v3342_v59 = vmul.f32 1.442695, %v3329_v24 }
 0xe1e   : > { %5439 = vmatprep.subr.bf16.mxu0 %v3397_v34  ;;  %5999 = vpow2.f32 %v3346_v11 }
 0xe1f   : > { %v7610_v16 = vpop.eup %5989  ;;  %5440 = vmatpush3.bf16.msra.mxu0 %v3397_v34  ;;  %6001 = vpow2.f32 %v3342_v59 }
 0xe20   : > { %5441 = vmatprep.subr.bf16.mxu0 %v3395_v26  ;;  %v3348_v30 = vsel %vm977_vm0, %v7610_v16, 0.0 }
 0xe21   : > { %3349 = vadd.xlane.f32.xlu1 %v3348_v30 }
 0xe23   : > { %v5992_v49 = vpop.eup %5991  ;;  %5442 = vmatpush3.bf16.msra.mxu0 %v3395_v26 }
 0xe24   : > { %v3357_v44 = vsel %vm977_vm0, %v5992_v49, 0.0  ;;  %v5994_v2 = vpop.eup %5993 }
 0xe25   : > { %3358 = vadd.xlane.f32.xlu0 %v3357_v44  ;;  %v3351_v19 = vsel %vm977_vm0, %v5994_v2, 0.0 }
 0xe29   : > { %3352 = vadd.xlane.f32.xlu0 %v3351_v19 }
 0xe32   : > { %3495 = vrot.lane.b32.xlu1 %v7065_v29, %s8276_s0  ;;  %v7623_v29 = vpop.eup %5995 }
 0xe33   : > { %v7625_v34 = vpop.eup %5997 }
 0xe34   : > { %v7629_v9 = vpop.eup %5999  ;;  %v3366_v33 = vsel %vm977_vm0, %v7625_v34, 0.0 }
 0xe35   : > { %v3369_v61 = vsel %vm977_vm0, %v7629_v9, 0.0  ;;  %v7635_v3 = vpop.eup %6001 }
 0xe36   : > { %3493 = vrot.lane.b32.xlu1 %v7057_v5, %s8276_s0  ;;  %v3360_v5 = vsel %vm977_vm0, %v7623_v29, 0.0  ;;  %v3363_v18 = vsel %vm977_vm0, %v7635_v3, 0.0 }
 0xe3f   : > { %3392 = vrot.lane.b32.xlu0 %v7080_v57, %s8293_s8 }
 0xe5a   : > { %3361 = vadd.xlane.f32.xlu1 %v3360_v5 }
 0xe5e   : > { %3367 = vadd.xlane.f32.xlu0 %v3366_v33  ;;  %3370 = vadd.xlane.f32.xlu1 %v3369_v61 }
 0xe62   : > { %3364 = vadd.xlane.f32.xlu0 %v3363_v18 }
 0xe6f   : > { %3489 = vrot.lane.b32.xlu1 %v7047_v46, %s8276_s0 }
 0xe73   : > { %3483 = vrot.lane.b32.xlu1 %v7053_v39, %s8294_s4 }
 0xe77   : > { %3487 = vrot.lane.b32.xlu1 %v7067_v8, %s8294_s4 }
 0xe78   : > { %3491 = vrot.lane.b32.xlu0 %v7051_v51, %s8276_s0 }
 0xe7c   : > { %3481 = vrot.lane.b32.xlu0 %v7049_v50, %s8294_s4 }
 0xe80   : > { %3485 = vrot.lane.b32.xlu0 %v7059_v58, %s8294_s4 }
 0xea6   : > { %v3356_v7 = vpop.xlane.xlu1 %3355 }
 0xeaa   : > { %v3350_v53 = vpop.xlane.xlu1 %3349 }
 0xeae   : > { %v3359_v40 = vpop.xlane.xlu0 %3358  ;;  %v3496_v8 = vpop.permute.xlu1 %3495 }
 0xeaf   : > { %6003 = vrcp.f32 %v3359_v40  ;;  %v3519_v37 = vsel %vm1091_vm1, %v3496_v8, 0 }
 0xeb0   : > { %6005 = vrcp.f32 %v3350_v53 }
 0xeb1   : > { %6007 = vrcp.f32 %v3356_v7 }
 0xeb2   : > { %v3353_v46 = vpop.xlane.xlu0 %3352  ;;  %v3494_v25 = vpop.permute.xlu1 %3493 }
 0xeb3   : > { %6009 = vrcp.f32 %v3353_v46  ;;  %v3516_v11 = vsel %vm1091_vm1, %v3494_v25, 0 }
 0xeb6   : > { %v3393_v39 = vpop.permute.xlu0 %3392 }
 0xeb7   : > { %5443 = vmatprep.subr.bf16.mxu0 %v3393_v39 }
 0xeb8   : > { %5444 = vmatpush3.bf16.msra.mxu0 %v3393_v39 }
 0xeb9   : > { %5601 = vmatprep.subr.msk.bf16.mxu0 %vm1091_vm1, %v3496_v8 }
 0xebc   : > { %v6004_v51 = vpop.eup %6003 }
 0xebd   : > { %v6006_v26 = vpop.eup %6005  ;;  %v3379_v44 = vmul.f32 %v6004_v51, %v5992_v49 }
 0xebe   : > { %v6008_v50 = vpop.eup %6007  ;;  %v3373_v58 = vmul.f32 %v6006_v26, %v7610_v16 }
 0xebf   : > { %v3377_v62 = vmul.f32 %v6008_v50, %v7606_v42 }
 0xec0   : > { %v6010_v30 = vpop.eup %6009 }
 0xec1   : > { %v3375_v19 = vmul.f32 %v6010_v30, %v5994_v2  ;;  %v3389_v28 = vpack.c.bf16 %v3379_v44, %v3377_v62 }
 0xec3   : > { %v3388_v43 = vpack.c.bf16 %v3375_v19, %v3373_v58 }
 0xec5   : > { %5445 = vmatprep.mubr.msk.bf16.mxu0 %vm977_vm0, %v3388_v43 }
 0xec6   : > { %5446 = vmatmul.mubr.msk.bf16.vlgmr.msra.gmra.mxu0 %vm977_vm0, %v3389_v28 }
 0xec7   : > { %5454 = vmatpush3.bf16.xpose.msra.mxu0 %v3519_v37 }
 0xec8   : > { %5602 = vmatprep.subr.msk.bf16.mxu0 %vm1091_vm1, %v3494_v25 }
 0xecf   : > { %5456 = vmatpush3.bf16.xpose.msra.mxu0 %v3516_v11 }
 0xee3   : > { %v3362_v49 = vpop.xlane.xlu1 %3361 }
 0xee7   : > { %v3371_v16 = vpop.xlane.xlu1 %3370  ;;  %v3368_v2 = vpop.xlane.xlu0 %3367 }
 0xee8   : > { %6011 = vrcp.f32 %v3371_v16 }
 0xee9   : > { %6013 = vrcp.f32 %v3368_v2 }
 0xeea   : > { %6015 = vrcp.f32 %v3362_v49 }
 0xeeb   : > { %v3365_v42 = vpop.xlane.xlu0 %3364  ;;  %v3490_v5 = vpop.permute.xlu1 %3489 }
 0xeec   : > { %6017 = vrcp.f32 %v3365_v42  ;;  %v3510_v7 = vsel %vm1091_vm1, %v3490_v5, 0  ;;  %v6107_v42 = vld [vmem:[%s8292_s1] sm:$0xff] }
 0xeef   : > { %v3492_v24 = vpop.permute.xlu0 %3491  ;;  %v3484_v30 = vpop.permute.xlu1 %3483 }
 0xef0   : > { %v3513_v59 = vsel %vm1091_vm1, %v3492_v24, 0  ;;  %5603 = vmatprep.subr.msk.bf16.mxu0 %vm1091_vm1, %v3492_v24 }
 0xef1   : > { %5458 = vmatpush3.bf16.xpose.msra.mxu0 %v3513_v59 }
 0xef2   : > { %5604 = vmatprep.subr.msk.bf16.mxu0 %vm1091_vm1, %v3490_v5  ;;  %v6108_v5 = vld [vmem:[%s8292_s1 + $0x10] sm:$0xff] }
 0xef3   : > { %v3482_v50 = vpop.permute.xlu0 %3481 }
 0xef5   : > { %v6012_v33 = vpop.eup %6011 }
 0xef6   : > { %v6014_v61 = vpop.eup %6013  ;;  %v3387_v46 = vmul.f32 %v6012_v33, %v7629_v9 }
 0xef7   : > { %v6016_v18 = vpop.eup %6015  ;;  %v3385_v40 = vmul.f32 %v6014_v61, %v7625_v34  ;;  %v3486_v44 = vpop.permute.xlu0 %3485 }
 0xef8   : > { %v3381_v39 = vmul.f32 %v6016_v18, %v7623_v29  ;;  %v3488_v34 = vpop.permute.xlu1 %3487 }
 0xef9   : > { %v6018_v53 = vpop.eup %6017  ;;  %5460 = vmatpush3.bf16.xpose.msra.mxu0 %v3510_v7  ;;  %v3391_v26 = vpack.c.bf16 %v3387_v46, %v3385_v40  ;;  %v6109_v7 = vld [vmem:[%s8292_s1 + $0x8] sm:$0xff]  ;;  %v6110_v46 = vld [vmem:[%s8292_s1 + $0x18] sm:$0xff] }
 0xefa   : > { %v3383_v8 = vmul.f32 %v6018_v53, %v7635_v3 }
 0xefc   : > { %v3390_v51 = vpack.c.bf16 %v3383_v8, %v3381_v39 }
 0xefe   : > { %5449 = vmatprep.mubr.msk.bf16.mxu0 %vm977_vm0, %v3390_v51 }
 0xeff   : > { %5450 = vmatmul.mubr.msk.bf16.gmra.mxu0 %vm977_vm0, %v3391_v26 }
 0xf00   : > { %5461 = vmatprep.mubr.msk.bf16.mxu0 %vm1091_vm1, %v3482_v50  ;;  %v6111_v50 = vld [vmem:[%s8292_s1 + $0x20] sm:$0xff] }
 0xf07   : > { %5462 = vmatmul.mubr.msk.bf16.vlgmr.msra.gmra.mxu0 %vm1091_vm1, %v3484_v30 }
 0xf08   : > { %5465 = vmatprep.mubr.msk.bf16.mxu0 %vm1091_vm1, %v3486_v44 }
 0xf0f   : > { %5466 = vmatmul.mubr.msk.bf16.gmra.mxu0 %vm1091_vm1, %v3488_v34  ;;  %v6112_v34 = vld [vmem:[%s8292_s1 + $0x30] sm:$0xff] }
 0xf86   : > { %v7673_v29 = vpop.f32.mrf.mxu0 }
 0xf88   : > { %v7675_v9 = vpop.f32.mrf.mxu0 }
 0xf8a   : > { %v7677_v3 = vpop.f32.mrf.mxu0 }
 0xf8b   : > { %v5698_v58 = vpack.i.bf16 %v7677_v3, %v7673_v29 }
 0xf8c   : > { %v7681_v19 = vpop.f32.mrf.mxu0 }
 0xfbf   : > { %v7685_v43 = vpop.f32.mrf.mxu0 }
 0xfc1   : > { %v7687_v28 = vpop.f32.mrf.mxu0 }
 0xfc3   : > { %v7689_v37 = vpop.f32.mrf.mxu0 }
 0xfc5   : > { %v7693_v11 = vpop.f32.mrf.mxu0 }
 0xfc7   : > { %v5463_v16 = vpop.f32.mrf.mxu0 }
 0xfc8   : > { %v3564_v33 = vadd.f32 %v6108_v5, %v5463_v16  ;;  %v6113_v5 = vld [vmem:[%s8292_s1 + $0x28] sm:$0xff] }
 0xfc9   : > { %v3555_v2 = vpop.f32.mrf.mxu0 }
 0xfca   : > { %v3556_v24 = vadd.f32 %v6107_v42, %v3555_v2  ;;  %v3592_v51 = vsel %vm977_vm0, %v3564_v33, -inf }
 0xfcb   : > { %v5464_v59 = vpop.f32.mrf.mxu0 }
 0xfcc   : > { %v3586_v61 = vsel %vm977_vm0, %v3556_v24, -inf  ;;  %v3567_v39 = vadd.f32 %v6110_v46, %v5464_v59 }
 0xfcd   : > { %v3558_v18 = vpop.f32.mrf.mxu0  ;;  %3587 = vmax.xlane.f32.xlu0 %v3586_v61 }
 0xfce   : > { %v3559_v53 = vadd.f32 %v6109_v7, %v3558_v18  ;;  %v3595_v2 = vsel %vm977_vm0, %v3567_v39, -inf  ;;  %v6114_v18 = vld [vmem:[%s8292_s1 + $0x38] sm:$0xff] }
 0xfcf   : > { %v5467_v40 = vpop.f32.mrf.mxu0 }
 0xfd0   : > { %v3589_v8 = vsel %vm977_vm0, %v3559_v53, -inf  ;;  %v3580_v16 = vadd.f32 %v6112_v34, %v5467_v40 }
 0xfd1   : > { %3590 = vmax.xlane.f32.xlu1 %v3589_v8  ;;  %3593 = vmax.xlane.f32.xlu0 %v3592_v51  ;;  %v3571_v26 = vpop.f32.mrf.mxu0 }
 0xfd2   : > { %v3572_v30 = vadd.f32 %v6111_v50, %v3571_v26  ;;  %v3604_v40 = vsel %vm977_vm0, %v3580_v16, -inf }
 0xfd3   : > { %v5468_v44 = vpop.f32.mrf.mxu0 }
 0xfd4   : > { %v3598_v42 = vsel %vm977_vm0, %v3572_v30, -inf  ;;  %v3583_v7 = vadd.f32 %v6114_v18, %v5468_v44 }
 0xfd5   : > { %3596 = vmax.xlane.f32.xlu0 %v3595_v2  ;;  %v3574_v59 = vpop.f32.mrf.mxu0  ;;  %3599 = vmax.xlane.f32.xlu1 %v3598_v42 }
 0xfd6   : > { %v3575_v61 = vadd.f32 %v6113_v5, %v3574_v59  ;;  %v3607_v8 = vsel %vm977_vm0, %v3583_v7, -inf }
 0xfd8   : > { %v3601_v46 = vsel %vm977_vm0, %v3575_v61, -inf }
 0xfd9   : > { %3602 = vmax.xlane.f32.xlu0 %v3601_v46  ;;  %3605 = vmax.xlane.f32.xlu1 %v3604_v40 }
 0xfdd   : > { %3608 = vmax.xlane.f32.xlu0 %v3607_v8 }
 0xfea   : > { %3684 = vrot.lane.b32.xlu1 %v7069_v32, %s8294_s4 }
0x1056   : > { %v3588_v51 = vpop.xlane.xlu0 %3587 }
0x1057   : > { %v3610_v26 = vsub.f32 %v3556_v24, %v3588_v51 }
0x1059   : > { %v3618_v59 = vmul.f32 1.442695, %v3610_v26 }
0x105a   : > { %v3591_v50 = vpop.xlane.xlu1 %3590  ;;  %v3594_v34 = vpop.xlane.xlu0 %3593 }
0x105b   : > { %v3612_v2 = vsub.f32 %v3564_v33, %v3594_v34  ;;  %v3611_v44 = vsub.f32 %v3559_v53, %v3591_v50 }
0x105d   : > { %v3622_v42 = vmul.f32 1.442695, %v3612_v2  ;;  %v3620_v40 = vmul.f32 1.442695, %v3611_v44 }
0x105e   : > { %v3600_v5 = vpop.xlane.xlu1 %3599  ;;  %v3597_v18 = vpop.xlane.xlu0 %3596 }
0x105f   : > { %v3613_v49 = vsub.f32 %v3567_v39, %v3597_v18  ;;  %6019 = vpow2.f32 %v3622_v42  ;;  %v3614_v25 = vsub.f32 %v3572_v30, %v3600_v5 }
0x1060   : > { %6021 = vpow2.f32 %v3618_v59 }
0x1061   : > { %v3624_v46 = vmul.f32 1.442695, %v3613_v49  ;;  %v3626_v24 = vmul.f32 1.442695, %v3614_v25 }
0x1062   : > { %v3606_v8 = vpop.xlane.xlu1 %3605  ;;  %v3603_v62 = vpop.xlane.xlu0 %3602 }
0x1063   : > { %v3616_v56 = vsub.f32 %v3580_v16, %v3606_v8  ;;  %6023 = vpow2.f32 %v3624_v46  ;;  %v3615_v51 = vsub.f32 %v3575_v61, %v3603_v62 }
0x1064   : > { %6025 = vpow2.f32 %v3620_v40 }
0x1065   : > { %v3630_v32 = vmul.f32 1.442695, %v3616_v56  ;;  %v3628_v49 = vmul.f32 1.442695, %v3615_v51 }
0x1066   : > { %v3685_v33 = vpop.permute.xlu1 %3684  ;;  %v3609_v34 = vpop.xlane.xlu0 %3608 }
0x1067   : > { %6027 = vpow2.f32 %v3630_v32  ;;  %v3617_v53 = vsub.f32 %v3583_v7, %v3609_v34  ;;  %5469 = vmatprep.subr.bf16.mxu1 %v3685_v33 }
0x1068   : > { %5470 = vmatpush3.bf16.msra.mxu1 %v3685_v33  ;;  %6029 = vpow2.f32 %v3626_v24 }
0x1069   : > { %v3632_v39 = vmul.f32 1.442695, %v3617_v53 }
0x106b   : > { %6031 = vpow2.f32 %v3632_v39 }
0x106c   : > { %v7731_v26 = vpop.eup %6019  ;;  %6033 = vpow2.f32 %v3628_v49 }
0x106d   : > { %v3640_v30 = vsel %vm977_vm0, %v7731_v26, 0.0  ;;  %v6022_v56 = vpop.eup %6021 }
0x106e   : > { %3641 = vadd.xlane.f32.xlu1 %v3640_v30  ;;  %v3634_v62 = vsel %vm977_vm0, %v6022_v56, 0.0 }
0x1070   : > { %v6024_v25 = vpop.eup %6023 }
0x1071   : > { %v3643_v16 = vsel %vm977_vm0, %v6024_v25, 0.0  ;;  %v6026_v61 = vpop.eup %6025 }
0x1072   : > { %3635 = vadd.xlane.f32.xlu1 %v3634_v62  ;;  %3644 = vadd.xlane.f32.xlu0 %v3643_v16  ;;  %v3637_v2 = vsel %vm977_vm0, %v6026_v61, 0.0 }
0x1074   : > { %v7737_v7 = vpop.eup %6027 }
0x1075   : > { %v3652_v50 = vsel %vm977_vm0, %v7737_v7, 0.0  ;;  %v6030_v42 = vpop.eup %6029 }
0x1076   : > { %3653 = vadd.xlane.f32.xlu1 %v3652_v50  ;;  %3638 = vadd.xlane.f32.xlu0 %v3637_v2  ;;  %v3646_v5 = vsel %vm977_vm0, %v6030_v42, 0.0  ;;  %v5772_v50 = vld [vmem:[%s8182_s13 + $0x10] sm:$0xff]   ;;  %v5773_v2 = vld [vmem:[%s8182_s13 + $0x8] sm:$0xff]  }
0x1078   : > { %v6032_v59 = vpop.eup %6031 }
0x1079   : > { %v3655_v44 = vsel %vm977_vm0, %v6032_v59, 0.0  ;;  %v6034_v18 = vpop.eup %6033 }
0x107a   : > { %3647 = vadd.xlane.f32.xlu1 %v3646_v5  ;;  %3656 = vadd.xlane.f32.xlu0 %v3655_v44  ;;  %v3649_v46 = vsel %vm977_vm0, %v6034_v18, 0.0 }
0x107e   : > { %3650 = vadd.xlane.f32.xlu0 %v3649_v46 }
0x108b   : > { %3680 = vrot.lane.b32.xlu1 %v7076_v20, %s8294_s4  ;;  %v8295_v20 = vpack.i.bf16 %v7575_v47, %v7571_v36 }
0x108f   : > { %3678 = vrot.lane.b32.xlu1 %v7080_v57, %s8294_s4  ;;  %v8296_v57 = vpack.i.bf16 %v7681_v19, %v7675_v9 }
0x1093   : > { %5689 = vrot.lane.b32.xlu1 %v5688_v14, %s8276_s0 }
0x1094   : > { %3682 = vrot.lane.b32.xlu0 %v7071_v4, %s8294_s4  ;;  %v8297_v4 = vpack.i.bf16 %v7579_v23, %v7573_v15  ;;  %s8309_s4 = sshll.u32 %s8312_s28, 6 }
0x1097   : > { %5699 = vrot.lane.b32.xlu1 %v5698_v58, %s8284_s2 }
0x1098   : > { %5684 = vrot.lane.b32.xlu0 %v5683_v27, %s8276_s0 }
0x109b   : > { %5709 = vrot.lane.b32.xlu1 %v8295_v20, %s8276_s0 }
0x109c   : > { %5694 = vrot.lane.b32.xlu0 %v8296_v57, %s8284_s2 }
0x10a0   : > { %5704 = vrot.lane.b32.xlu0 %v8297_v4, %s8276_s0 }
0x10f7   : > { %v3642_v13 = vpop.xlane.xlu1 %3641 }
0x10fb   : > { %v3636_v55 = vpop.xlane.xlu1 %3635  ;;  %v3645_v14 = vpop.xlane.xlu0 %3644 }
0x10fc   : > { %6035 = vrcp.f32 %v3636_v55 }
0x10ff   : > { %v3654_v48 = vpop.xlane.xlu1 %3653  ;;  %v3639_v1 = vpop.xlane.xlu0 %3638 }
0x1100   : > { %6037 = vrcp.f32 %v3639_v1 }
0x1101   : > { %6039 = vrcp.f32 %v3645_v14 }
0x1102   : > { %6041 = vrcp.f32 %v3642_v13  ;;  %v8298_v13 = vpack.i.bf16 %v7689_v37, %v7685_v43 }
0x1103   : > { %v3657_v27 = vpop.xlane.xlu0 %3656  ;;  %v3648_v36 = vpop.xlane.xlu1 %3647 }
0x1104   : > { %6043 = vrcp.f32 %v3648_v36  ;;  %v5779_v36 = vld [vmem:[%s8185_s16 + $0x18] sm:$0xff]  }
0x1105   : > { %5501 = vmatprep.subr.bf16.mxu0 %v5779_v36 }
0x1106   : > { %5502 = vmatpush3.bf16.msra.mxu0 %v5779_v36 }
0x1107   : > { %v3651_v47 = vpop.xlane.xlu0 %3650  ;;  %v3681_v29 = vpop.permute.xlu1 %3680 }
0x1108   : > { %6045 = vrcp.f32 %v3651_v47 }
0x1109   : > { %6047 = vrcp.f32 %v3657_v27  ;;  %v6036_v3 = vpop.eup %6035 }
0x110a   : > { %6049 = vrcp.f32 %v3654_v48  ;;  %v3659_v58 = vmul.f32 %v6036_v3, %v6022_v56  ;;  %v8299_v48 = vpack.i.bf16 %v7693_v11, %v7687_v28 }
0x110b   : > { %v3683_v9 = vpop.permute.xlu0 %3682  ;;  %v3679_v8 = vpop.permute.xlu1 %3678 }
0x110c   : > { %5471 = vmatprep.subr.bf16.mxu1 %v3683_v9 }
0x110d   : > { %5472 = vmatpush3.bf16.msra.mxu1 %v3683_v9  ;;  %v6038_v15 = vpop.eup %6037 }
0x110e   : > { %5473 = vmatprep.subr.bf16.mxu1 %v3681_v29  ;;  %v6040_v23 = vpop.eup %6039  ;;  %v3661_v19 = vmul.f32 %v6038_v15, %v6026_v61 }
0x110f   : > { %v6042_v40 = vpop.eup %6041  ;;  %v3665_v24 = vmul.f32 %v6040_v23, %v6024_v25  ;;  %v5690_v43 = vpop.permute.xlu1 %5689 }
0x1110   : > { %v3674_v32 = vpack.c.bf16 %v3661_v19, %v3659_v58  ;;  %v3663_v33 = vmul.f32 %v6042_v40, %v7731_v26  ;;  %v5771_v26 = vld [vmem:[%s8182_s13 + $0x18] sm:$0xff]   ;;  %v5685_v37 = vpop.permute.xlu0 %5684  ;;  %v5692_v3 = vunpack.i.h.bf16 %v5690_v43  ;;  %v5691_v28 = vunpack.i.l.bf16 %v5690_v43 }
0x1111   : > { %5474 = vmatpush3.bf16.msra.mxu1 %v3681_v29  ;;  %v6044_v51 = vpop.eup %6043  ;;  %v5687_v11 = vunpack.i.h.bf16 %v5685_v37  ;;  %v5686_v15 = vunpack.i.l.bf16 %v5685_v37 }
0x1112   : > { %5475 = vmatprep.subr.bf16.mxu1 %v3679_v8  ;;  %5477 = vmatprep.mubr.msk.bf16.mxu1 %vm977_vm0, %v3674_v32  ;;  %v3675_v53 = vpack.c.bf16 %v3665_v24, %v3663_v33  ;;  %v3667_v49 = vmul.f32 %v6044_v51, %v6030_v42  ;;  %v3866_v33 = vsel %vm1091_vm1, %v7547_v31, %v5692_v3  ;;  %v7827_v31 = vld [vmem:[%s8300_s25] ss:$0 sm:$0xff] }
0x1113   : > { %v5700_v47 = vpop.permute.xlu1 %5699 }
0x1114   : > { %v5695_v29 = vpop.permute.xlu0 %5694  ;;  %v5702_v58 = vunpack.i.h.bf16 %v5700_v47  ;;  %v5701_v19 = vunpack.i.l.bf16 %v5700_v47 }
0x1115   : > { %v6046_v34 = vpop.eup %6045  ;;  %5476 = vmatpush3.bf16.msra.mxu1 %v3679_v8  ;;  %v5697_v40 = vunpack.i.h.bf16 %v5695_v29  ;;  %v5696_v8 = vunpack.i.l.bf16 %v5695_v29 }
0x1116   : > { %v6048_v39 = vpop.eup %6047  ;;  %v3669_v30 = vmul.f32 %v6046_v34, %v6034_v18  ;;  %5485 = vmatprep.subr.bf16.mxu1 %v5771_v26  ;;  %v3865_v34 = vsel %vm1091_vm1, %v7543_v52, %v5691_v28 }
0x1117   : > { %v6050_v56 = vpop.eup %6049  ;;  %v3673_v16 = vmul.f32 %v6048_v39, %v6032_v59  ;;  %v7796_v59 = vld [vmem:[%s8184_s15 + $0x18] sm:$0xff]   ;;  %v5710_v9 = vpop.permute.xlu1 %5709  ;;  %v3863_v39 = vsel %vm1091_vm1, %v7545_v17, %v5686_v15 }
0x1118   : > { %5478 = vmatmul.mubr.msk.bf16.vlgmr.msra.gmra.mxu1 %vm977_vm0, %v3675_v53  ;;  %v3676_v62 = vpack.c.bf16 %v3669_v30, %v3667_v49  ;;  %v3671_v25 = vmul.f32 %v6050_v56, %v7737_v7  ;;  %v5774_v7 = vld [vmem:[%s8182_s13] sm:$0xff]   ;;  %v5705_v23 = vpop.permute.xlu0 %5704  ;;  %v3864_v53 = vsel %vm1091_vm1, %v7549_v60, %v5687_v11  ;;  %v3873_v30 = vsel %vm2324_vm2, %v3865_v34, %v5701_v19 }
0x1119   : > { %5486 = vmatpush3.bf16.msra.mxu1 %v5771_v26  ;;  %v3874_v56 = vsel %vm2324_vm2, %v3866_v33, %v5702_v58  ;;  %v3871_v52 = vsel %vm2324_vm2, %v3863_v39, %v5696_v8  ;;  %v2435_v26 = vadd.f32 %v7827_v31, %v7264_v38  ;;  %v8302_v19 = vld [vmem:[#allocation4_spill] sm:$0xff]  ;;  %v2451_v34 = vadd.f32 %v7827_v31, %v7272_v35  ;;  %v8303_v39 = vld [vmem:[#allocation7_spill] sm:$0xff]  ;;  %v8305_v35 = vld [vmem:[#allocation6_spill] sm:$0xff] }
0x111a   : > { %5481 = vmatprep.mubr.msk.bf16.mxu1 %vm977_vm0, %v3676_v62  ;;  %v3677_v61 = vpack.c.bf16 %v3673_v16, %v3671_v25  ;;  %5487 = vmatprep.subr.bf16.mxu1 %v5772_v50  ;;  %v3872_v25 = vsel %vm2324_vm2, %v3864_v53, %v5697_v40  ;;  %v2440_v53 = vadd.f32 %v7258_v54, %v7827_v31 }
0x111d   : > { %5488 = vmatpush3.bf16.msra.mxu1 %v5772_v50  ;;  %v5712_v50 = vunpack.i.h.bf16 %v5710_v9 }
0x111e   : > { %5489 = vmatprep.subr.bf16.mxu1 %v5773_v2 }
0x111f   : > { %v3870_v37 = vsel %vm1091_vm1, %v7555_v45, %v5712_v50 }
0x1120   : > { %5482 = vmatmul.mubr.msk.bf16.gmra.mxu1 %vm977_vm0, %v3677_v61 }
0x1121   : > { %5490 = vmatpush3.bf16.msra.mxu1 %v5773_v2 }
0x1122   : > { %5491 = vmatprep.subr.bf16.mxu1 %v5774_v7 }
0x1125   : > { %5492 = vmatpush3.bf16.msra.mxu1 %v5774_v7 }
0x1126   : > { %5517 = vmatprep.subr.bf16.mxu1 %v7796_v59 }
0x11d8   : > { %v5479_v42 = vpop.f32.mrf.mxu1 }
0x11da   : > { %v3736_v44 = vpop.f32.mrf.mxu1 }
0x11dc   : > { %v5480_v5 = vpop.f32.mrf.mxu1 }
0x11dd   : > { %v5713_v18 = vpack.i.bf16 %v5480_v5, %v5479_v42  ;;  %v5711_v42 = vunpack.i.l.bf16 %v5710_v9  ;;  %v5706_v5 = vunpack.i.l.bf16 %v5705_v23 }
0x11de   : > { %v3739_v46 = vpop.f32.mrf.mxu1 }
0x11df   : > { %v5718_v20 = vpack.i.bf16 %v3739_v46, %v3736_v44  ;;  %5714 = vrot.lane.b32.xlu1 %v5713_v18, %s8281_s5  ;;  %v5707_v44 = vunpack.i.h.bf16 %v5705_v23  ;;  %v3869_v47 = vsel %vm1091_vm1, %v7551_v12, %v5711_v42  ;;  %v3867_v9 = vsel %vm1091_vm1, %v7553_v6, %v5706_v5  ;;  %v5777_v12 = vld [vmem:[%s8184_s15 + $0x8] sm:$0xff]  }
0x11e0   : > { %v5483_v57 = vpop.f32.mrf.mxu1 }
0x11e1   : > { %5719 = vrot.lane.b32.xlu0 %v5718_v20, %s8281_s5  ;;  %v3868_v29 = vsel %vm1091_vm1, %v7557_v10, %v5707_v44  ;;  %v4981_v44 = vld [vmem:[%s8183_s14] ss:$0 sm:$0xff] }
0x11e2   : > { %v3752_v4 = vpop.f32.mrf.mxu1 }
0x11e3   : > { %5729 = vrot.lane.b32.xlu1 %v8298_v13, %s8284_s2  ;;  %v5776_v13 = vld [vmem:[%s8184_s15 + $0x10] sm:$0xff]  }
0x11e4   : > { %v5484_v55 = vpop.f32.mrf.mxu1 }
0x11e5   : > { %v5738_v14 = vpack.i.bf16 %v5484_v55, %v5483_v57  ;;  %5724 = vrot.lane.b32.xlu0 %v8299_v48, %s8284_s2  ;;  %v2432_v48 = vadd.f32 %v7827_v31, %v7260_v41  ;;  %s8140_s2 = scalar_lea.vmem %s8195_s26, %s8309_s4 }
0x11e6   : > { %v3755_v1 = vpop.f32.mrf.mxu1 }
0x11e7   : > { %v5733_v27 = vpack.i.bf16 %v3755_v1, %v3752_v4  ;;  %5739 = vrot.lane.b32.xlu1 %v5738_v14, %s8281_s5  ;;  %v8301_v1 = vld [vmem:[#allocation5_spill] sm:$0xff]  ;;  %v7868_v40 = vadd.f32 %v2432_v48, %v8302_v19 }
0x11e9   : > { %5734 = vrot.lane.b32.xlu0 %v5733_v27, %s8281_s5  ;;  %v7844_v27 = vadd.f32 %v2435_v26, %v8301_v1  ;;  %v8308_v26 = vld [vmem:[#allocation11_spill] sm:$0xff] }
0x11eb   : > { %v4015_v33 = vpack.c.bf16 %v7844_v27, %v7868_v40 }
0x1251   : > { %v5715_v32 = vpop.permute.xlu1 %5714 }
0x1252   : > { %v5717_v24 = vunpack.i.h.bf16 %v5715_v32  ;;  %v5716_v51 = vunpack.i.l.bf16 %v5715_v32  ;;  %v2443_v32 = vadd.f32 %v7262_v22, %v7827_v31  ;;  %v2448_v22 = vadd.f32 %v7827_v31, %v7268_v0 }
0x1253   : > { %v5720_v49 = vpop.permute.xlu0 %5719 }
0x1254   : > { %v5722_v62 = vunpack.i.h.bf16 %v5720_v49  ;;  %v5721_v16 = vunpack.i.l.bf16 %v5720_v49  ;;  %v3882_v60 = vsel %vm2333_vm3, %v3874_v56, %v5717_v24  ;;  %v3881_v17 = vsel %vm2333_vm3, %v3873_v30, %v5716_v51  ;;  %v5778_v51 = vld [vmem:[%s8184_s15] sm:$0xff]  }
0x1255   : > { %v5730_v61 = vpop.permute.xlu1 %5729  ;;  %v3888_v20 = vpack.c.bf16 %v3882_v60, %v3881_v17  ;;  %v7887_v49 = vadd.f32 %v2443_v32, %v8303_v39  ;;  %v8304_v30 = vld [vmem:[#allocation8_spill] sm:$0xff]  ;;  %v2456_v60 = vadd.f32 %v7266_v63, %v7827_v31  ;;  %v8307_v17 = vld [vmem:[#allocation10_spill] sm:$0xff] }
0x1256   : > { %v3879_v2 = vsel %vm2333_vm3, %v3871_v52, %v5721_v16  ;;  %v3880_v7 = vsel %vm2333_vm3, %v3872_v25, %v5722_v62  ;;  %v5732_v57 = vunpack.i.h.bf16 %v5730_v61  ;;  %v5731_v4 = vunpack.i.l.bf16 %v5730_v61  ;;  %v8306_v16 = vld [vmem:[#allocation9_spill] sm:$0xff] }
0x1257   : > { %v3887_v18 = vpack.c.bf16 %v3880_v7, %v3879_v2  ;;  %v5725_v46 = vpop.permute.xlu0 %5724  ;;  %v7890_v56 = vadd.f32 %v2451_v34, %v8304_v30  ;;  %v7893_v62 = vadd.f32 %v2440_v53, %v8305_v35  ;;  %v7896_v54 = vadd.f32 %v2448_v22, %v8306_v16  ;;  %v5781_v63 = vld [vmem:[%s8185_s16 + $0x8] sm:$0xff]  }
0x1258   : > { %v5727_v55 = vunpack.i.h.bf16 %v5725_v46  ;;  %v5726_v14 = vunpack.i.l.bf16 %v5725_v46  ;;  %v3878_v3 = vsel %vm2324_vm2, %v3870_v37, %v5732_v57  ;;  %v3877_v28 = vsel %vm2324_vm2, %v3869_v47, %v5731_v4  ;;  %v5789_v32 = vld [vmem:[%s8189_s20 + $0x28] sm:$0xff]  }
0x1259   : > { %v5740_v38 = vpop.permute.xlu1 %5739  ;;  %5493 = vmatprep.mubr.msk.bf16.mxu1 %vm977_vm0, %v3887_v18  ;;  %v4016_v0 = vpack.c.bf16 %v7887_v49, %v7893_v62  ;;  %v2459_v52 = vadd.f32 %v7270_v21, %v7827_v31  ;;  %v4017_v25 = vpack.c.bf16 %v7890_v56, %v7896_v54  ;;  %v7912_v50 = vadd.f32 %v2456_v60, %v8308_v26  ;;  %v5780_v21 = vld [vmem:[%s8185_s16 + $0x10] sm:$0xff]   ;;  %v5782_v31 = vld [vmem:[%s8185_s16] sm:$0xff]  }
0x125a   : > { %v5742_v36 = vunpack.i.h.bf16 %v5740_v38  ;;  %v5741_v43 = vunpack.i.l.bf16 %v5740_v38  ;;  %5494 = vmatmul.mubr.msk.bf16.vlgmr.msra.gmra.mxu1 %vm977_vm0, %v3888_v20  ;;  %v3875_v45 = vsel %vm2324_vm2, %v3867_v9, %v5726_v14  ;;  %v3876_v10 = vsel %vm2324_vm2, %v3868_v29, %v5727_v55  ;;  %5503 = vmatprep.subr.bf16.mxu0 %v5780_v21 }
0x125b   : > { %v5735_v41 = vpop.permute.xlu0 %5734  ;;  %5518 = vmatpush3.bf16.msra.mxu1 %v7796_v59  ;;  %v7909_v61 = vadd.f32 %v2459_v52, %v8307_v17  ;;  %5504 = vmatpush3.bf16.msra.mxu0 %v5780_v21 }
0x125c   : > { %v5737_v11 = vunpack.i.h.bf16 %v5735_v41  ;;  %v5736_v15 = vunpack.i.l.bf16 %v5735_v41  ;;  %5519 = vmatprep.subr.bf16.mxu1 %v5776_v13  ;;  %v3886_v6 = vsel %vm2333_vm3, %v3878_v3, %v5742_v36  ;;  %v3885_v23 = vsel %vm2333_vm3, %v3877_v28, %v5741_v43  ;;  %5505 = vmatprep.subr.bf16.mxu0 %v5781_v63 }
0x125d   : > { %v3890_v24 = vpack.c.bf16 %v3886_v6, %v3885_v23  ;;  %v4018_v2 = vpack.c.bf16 %v7909_v61, %v7912_v50  ;;  %v5783_v6 = vld [vmem:[%s8187_s18 + $0x18] sm:$0xff]   ;;  %v5784_v23 = vld [vmem:[%s8187_s18 + $0x10] sm:$0xff]  }
0x125e   : > { %v3883_v59 = vsel %vm2333_vm3, %v3875_v45, %v5736_v15  ;;  %v3884_v58 = vsel %vm2333_vm3, %v3876_v10, %v5737_v11 }
0x125f   : > { %v3889_v8 = vpack.c.bf16 %v3884_v58, %v3883_v59  ;;  %5520 = vmatpush3.bf16.msra.mxu1 %v5776_v13  ;;  %5506 = vmatpush3.bf16.msra.mxu0 %v5781_v63  ;;  %v5785_v59 = vld [vmem:[%s8187_s18 + $0x8] sm:$0xff]   ;;  %v5786_v58 = vld [vmem:[%s8187_s18] sm:$0xff]  }
0x1260   : > { %5521 = vmatprep.subr.bf16.mxu1 %v5777_v12  ;;  %5507 = vmatprep.subr.bf16.mxu0 %v5782_v31 }
0x1261   : > { %5497 = vmatprep.mubr.msk.bf16.mxu1 %vm977_vm0, %v3889_v8  ;;  %v5788_v8 = vld [vmem:[%s8189_s20 + $0x30] sm:$0xff]  }
0x1262   : > { %5498 = vmatmul.mubr.msk.bf16.gmra.mxu1 %vm977_vm0, %v3890_v24  ;;  %v5790_v24 = vld [vmem:[%s8189_s20 + $0x20] sm:$0xff]  }
0x1263   : > { %5522 = vmatpush3.bf16.msra.mxu1 %v5777_v12  ;;  %5525 = vmatprep.mubr.msk.bf16.mxu1 %vm977_vm0, %v4015_v33 }
0x1264   : > { %5523 = vmatprep.subr.bf16.mxu1 %v5778_v51  ;;  %5508 = vmatpush3.bf16.msra.mxu0 %v5782_v31 }
0x1265   : > { %5533 = vmatprep.subr.bf16.mxu0 %v5783_v6 }
0x1267   : > { %5524 = vmatpush3.bf16.msra.mxu1 %v5778_v51  ;;  %v5791_v51 = vld [vmem:[%s8189_s20 + $0x18] sm:$0xff]  }
0x126a   : > { %5526 = vmatmul.mubr.msk.bf16.vlgmr.msra.gmra.mxu1 %vm977_vm0, %v4016_v0 }
0x126b   : > { %5529 = vmatprep.mubr.msk.bf16.mxu1 %vm977_vm0, %v4017_v25 }
0x1272   : > { %5530 = vmatmul.mubr.msk.bf16.gmra.mxu1 %vm977_vm0, %v4018_v2 }
0x131a   : > { %v5495_v7 = vpop.f32.mrf.mxu1 }
0x131b   : > { %v3985_v20 = vadd.f32 %v5495_v7, %v4981_v44 }
0x131c   : > { %v3976_v42 = vpop.f32.mrf.mxu1 }
0x131d   : > { %v3977_v18 = vadd.f32 %v4981_v44, %v3976_v42  ;;  %v7939_v48 = vadd.f32 %v3985_v20, %v8305_v35 }
0x131e   : > { %v5496_v5 = vpop.f32.mrf.mxu1 }
0x131f   : > { %v3988_v46 = vadd.f32 %v5496_v5, %v4981_v44  ;;  %v7933_v14 = vadd.f32 %v3977_v18, %v8302_v19  ;;  %v5787_v19 = vld [vmem:[%s8189_s20 + $0x38] sm:$0xff]  }
0x1320   : > { %v3979_v57 = vpop.f32.mrf.mxu1  ;;  %5549 = vmatprep.subr.bf16.mxu1 %v5787_v19 }
0x1321   : > { %v3980_v4 = vadd.f32 %v4981_v44, %v3979_v57  ;;  %v7930_v13 = vadd.f32 %v3988_v46, %v8303_v39  ;;  %5550 = vmatpush3.bf16.msra.mxu1 %v5787_v19 }
0x1322   : > { %v5499_v55 = vpop.f32.mrf.mxu1  ;;  %5551 = vmatprep.subr.bf16.mxu1 %v5788_v8 }
0x1323   : > { %v7936_v38 = vadd.f32 %v3980_v4, %v8301_v1  ;;  %v4028_v37 = vpack.c.bf16 %v7930_v13, %v7939_v48  ;;  %v4001_v41 = vadd.f32 %v5499_v55, %v4981_v44 }
0x1324   : > { %v3992_v36 = vpop.f32.mrf.mxu1 }
0x1325   : > { %v4027_v43 = vpack.c.bf16 %v7936_v38, %v7933_v14  ;;  %v3993_v29 = vadd.f32 %v4981_v44, %v3992_v36  ;;  %v7957_v12 = vadd.f32 %v4001_v41, %v8308_v26  ;;  %5552 = vmatpush3.bf16.msra.mxu1 %v5788_v8 }
0x1326   : > { %v5500_v47 = vpop.f32.mrf.mxu1  ;;  %5553 = vmatprep.subr.bf16.mxu1 %v5789_v32 }
0x1327   : > { %v4004_v9 = vadd.f32 %v5500_v47, %v4981_v44  ;;  %5509 = vmatprep.mubr.msk.bf16.mxu0 %vm977_vm0, %v4027_v43  ;;  %v7951_v11 = vadd.f32 %v3993_v29, %v8306_v16 }
0x1328   : > { %v3995_v3 = vpop.f32.mrf.mxu1  ;;  %5510 = vmatmul.mubr.msk.bf16.vlgmr.msra.gmra.mxu0 %vm977_vm0, %v4028_v37 }
0x1329   : > { %v3996_v1 = vadd.f32 %v4981_v44, %v3995_v3  ;;  %v7948_v28 = vadd.f32 %v4004_v9, %v8307_v17  ;;  %5534 = vmatpush3.bf16.msra.mxu0 %v5783_v6  ;;  %5554 = vmatpush3.bf16.msra.mxu1 %v5789_v32 }
0x132a   : > { %5535 = vmatprep.subr.bf16.mxu0 %v5784_v23  ;;  %5555 = vmatprep.subr.bf16.mxu1 %v5790_v24  ;;  %v5527_v33 = vpop.f32.mrf.mxu1 }
0x132b   : > { %v7954_v15 = vadd.f32 %v3996_v1, %v8304_v30  ;;  %v4030_v10 = vpack.c.bf16 %v7948_v28, %v7957_v12  ;;  %v5006_v30 = vld [vmem:[%s8186_s17] ss:$0 sm:$0xff] }
0x132c   : > { %v4210_v34 = vpop.f32.mrf.mxu1 }
0x132d   : > { %v4029_v45 = vpack.c.bf16 %v7954_v15, %v7951_v11  ;;  %5536 = vmatpush3.bf16.msra.mxu0 %v5784_v23  ;;  %5556 = vmatpush3.bf16.msra.mxu1 %v5790_v24 }
0x132e   : > { %5537 = vmatprep.subr.bf16.mxu0 %v5785_v59  ;;  %5557 = vmatprep.subr.bf16.mxu1 %v5791_v51  ;;  %v5528_v53 = vpop.f32.mrf.mxu1 }
0x132f   : > { %5513 = vmatprep.mubr.msk.bf16.mxu0 %vm977_vm0, %v4029_v45 }
0x1330   : > { %5514 = vmatmul.mubr.msk.bf16.gmra.mxu0 %vm977_vm0, %v4030_v10  ;;  %v4213_v22 = vpop.f32.mrf.mxu1 }
0x1331   : > { %5538 = vmatpush3.bf16.msra.mxu0 %v5785_v59  ;;  %5558 = vmatpush3.bf16.msra.mxu1 %v5791_v51 }
0x1332   : > { %5539 = vmatprep.subr.bf16.mxu0 %v5786_v58  ;;  %v5531_v16 = vpop.f32.mrf.mxu1 }
0x1334   : > { %v4226_v21 = vpop.f32.mrf.mxu1 }
0x1335   : > { %5540 = vmatpush3.bf16.msra.mxu0 %v5786_v58 }
0x1336   : > { %v5532_v57 = vpop.f32.mrf.mxu1 }
0x1338   : > { %v4229_v1 = vpop.f32.mrf.mxu1 }
0x13e8   : > { %v5511_v39 = vpop.f32.mrf.mxu0 }
0x13e9   : > { %v4219_v35 = vadd.f32 %v5527_v33, %v5511_v39 }
0x13ea   : > { %v4109_v0 = vpop.f32.mrf.mxu0 }
0x13eb   : > { %v4250_v52 = vadd.f32 %v5006_v30, %v4219_v35  ;;  %v4211_v25 = vadd.f32 %v4210_v34, %v4109_v0 }
0x13ec   : > { %v5512_v60 = vpop.f32.mrf.mxu0 }
0x13ed   : > { %v4258_v17 = vsub.f32 0.0, %v4250_v52  ;;  %v4248_v26 = vadd.f32 %v5006_v30, %v4211_v25  ;;  %v4222_v2 = vadd.f32 %v5528_v53, %v5512_v60 }
0x13ee   : > { %v4112_v63 = vpop.f32.mrf.mxu0 }
0x13ef   : > { %v4268_v31 = vmul.f32 1.442695, %v4258_v17  ;;  %v4256_v7 = vsub.f32 0.0, %v4248_v26  ;;  %v4251_v42 = vadd.f32 %v5006_v30, %v4222_v2  ;;  %v4214_v44 = vadd.f32 %v4213_v22, %v4112_v63 }
0x13f0   : > { %v5515_v5 = vpop.f32.mrf.mxu0 }
0x13f1   : > { %6051 = vpow2.f32 %v4268_v31  ;;  %v4264_v18 = vmul.f32 1.442695, %v4256_v7  ;;  %v4259_v46 = vsub.f32 0.0, %v4251_v42  ;;  %v4249_v20 = vadd.f32 %v5006_v30, %v4214_v44 }
0x13f2   : > { %v4235_v4 = vadd.f32 %v5531_v16, %v5515_v5  ;;  %v4125_v55 = vpop.f32.mrf.mxu0 }
0x13f3   : > { %6053 = vpow2.f32 %v4264_v18  ;;  %v4270_v36 = vmul.f32 1.442695, %v4259_v46  ;;  %v4257_v43 = vsub.f32 0.0, %v4249_v20  ;;  %v4227_v37 = vadd.f32 %v4226_v21, %v4125_v55 }
0x13f4   : > { %v4254_v47 = vadd.f32 %v5006_v30, %v4235_v4  ;;  %v5516_v29 = vpop.f32.mrf.mxu0 }
0x13f5   : > { %6055 = vpow2.f32 %v4270_v36  ;;  %v4266_v9 = vmul.f32 1.442695, %v4257_v43  ;;  %v4252_v41 = vadd.f32 %v5006_v30, %v4227_v37  ;;  %v4238_v3 = vadd.f32 %v5532_v57, %v5516_v29 }
0x13f6   : > { %v4262_v45 = vsub.f32 0.0, %v4254_v47  ;;  %v4128_v10 = vpop.f32.mrf.mxu0 }
0x13f7   : > { %6057 = vpow2.f32 %v4266_v9  ;;  %v4260_v6 = vsub.f32 0.0, %v4252_v41  ;;  %v4255_v23 = vadd.f32 %v5006_v30, %v4238_v3  ;;  %v4230_v59 = vadd.f32 %v4229_v1, %v4128_v10 }
0x13f8   : > { %v4276_v58 = vmul.f32 1.442695, %v4262_v45 }
0x13f9   : > { %v4272_v19 = vmul.f32 1.442695, %v4260_v6  ;;  %v4263_v8 = vsub.f32 0.0, %v4255_v23  ;;  %v4253_v32 = vadd.f32 %v5006_v30, %v4230_v59 }
0x13fa   : > { %6059 = vpow2.f32 %v4276_v58 }
0x13fb   : > { %6061 = vpow2.f32 %v4272_v19  ;;  %v4278_v24 = vmul.f32 1.442695, %v4263_v8  ;;  %v4261_v51 = vsub.f32 0.0, %v4253_v32 }
0x13fd   : > { %6063 = vpow2.f32 %v4278_v24  ;;  %v4274_v33 = vmul.f32 1.442695, %v4261_v51 }
0x13fe   : > { %v6052_v34 = vpop.eup %6051 }
0x13ff   : > { %v4282_v53 = vadd.f32 1.0, %v6052_v34  ;;  %6065 = vpow2.f32 %v4274_v33 }
0x1400   : > { %v6054_v22 = vpop.eup %6053 }
0x1401   : > { %v4280_v39 = vadd.f32 1.0, %v6054_v22  ;;  %6067 = vrcp.f32 %v4282_v53  ;;  %v5007_v53 = vld [vmem:[%s8188_s19] ss:$0 sm:$0xff] }
0x1402   : > { %v6056_v35 = vpop.eup %6055 }
0x1403   : > { %6069 = vrcp.f32 %v4280_v39  ;;  %v4283_v16 = vadd.f32 1.0, %v6056_v35 }
0x1404   : > { %v6058_v0 = vpop.eup %6057 }
0x1405   : > { %6071 = vrcp.f32 %v4283_v16  ;;  %v4281_v52 = vadd.f32 1.0, %v6058_v0 }
0x1407   : > { %v6060_v25 = vpop.eup %6059  ;;  %6073 = vrcp.f32 %v4281_v52 }
0x1408   : > { %v6062_v30 = vpop.eup %6061  ;;  %v4286_v60 = vadd.f32 1.0, %v6060_v25 }
0x1409   : > { %v4284_v17 = vadd.f32 1.0, %v6062_v30 }
0x140a   : > { %v6064_v26 = vpop.eup %6063  ;;  %6075 = vrcp.f32 %v4286_v60 }
0x140b   : > { %6077 = vrcp.f32 %v4284_v17  ;;  %v4287_v2 = vadd.f32 1.0, %v6064_v26 }
0x140c   : > { %v6066_v21 = vpop.eup %6065 }
0x140d   : > { %6079 = vrcp.f32 %v4287_v2  ;;  %v4285_v63 = vadd.f32 1.0, %v6066_v21 }
0x140e   : > { %v6068_v31 = vpop.eup %6067 }
0x140f   : > { %6081 = vrcp.f32 %v4285_v63  ;;  %v4314_v5 = vsub.f32 1.0, %v6068_v31  ;;  %v4306_v41 = vmul.f32 %v6068_v31, %v7893_v62 }
0x1410   : > { %v6070_v7 = vpop.eup %6069 }
0x1411   : > { %v4312_v42 = vsub.f32 1.0, %v6070_v7  ;;  %v4322_v36 = vmul.f32 %v4314_v5, %v7939_v48  ;;  %v4304_v37 = vmul.f32 %v6070_v7, %v7868_v40 }
0x1412   : > { %v6072_v44 = vpop.eup %6071 }
0x1413   : > { %v4315_v18 = vsub.f32 1.0, %v6072_v44  ;;  %v4320_v57 = vmul.f32 %v4312_v42, %v7933_v14  ;;  %v4307_v55 = vmul.f32 %v6072_v44, %v7887_v49  ;;  %v8009_v45 = vadd.f32 %v4322_v36, %v4306_v41 }
0x1414   : > { %v6074_v46 = vpop.eup %6073 }
0x1415   : > { %v4313_v20 = vsub.f32 1.0, %v6074_v46  ;;  %v4323_v4 = vmul.f32 %v4315_v18, %v7930_v13  ;;  %v4305_v47 = vmul.f32 %v6074_v46, %v7844_v27  ;;  %v8005_v1 = vadd.f32 %v4320_v57, %v4304_v37 }
0x1417   : > { %v6076_v43 = vpop.eup %6075  ;;  %v4321_v29 = vmul.f32 %v4313_v20, %v7936_v38  ;;  %v8003_v3 = vadd.f32 %v4323_v4, %v4307_v55 }
0x1418   : > { %v6078_v9 = vpop.eup %6077  ;;  %v4318_v48 = vsub.f32 1.0, %v6076_v43  ;;  %v4310_v24 = vmul.f32 %v6076_v43, %v7912_v50  ;;  %v5793_v50 = vld [vmem:[%s8189_s20 + $0x8] sm:$0xff]   ;;  %v5016_v43 = vld [vmem:[%s8190_s21] ss:$0 sm:$0xff] }
0x1419   : > { %v8007_v14 = vadd.f32 %v4321_v29, %v4305_v47  ;;  %v4316_v13 = vsub.f32 1.0, %v6078_v9  ;;  %v4337_v38 = vpack.c.bf16 %v8003_v3, %v8009_v45  ;;  %v4308_v19 = vmul.f32 %v6078_v9, %v7896_v54 }
0x141a   : > { %v6080_v49 = vpop.eup %6079  ;;  %v4326_v58 = vmul.f32 %v4318_v48, %v7957_v12 }
0x141b   : > { %v4336_v40 = vpack.c.bf16 %v8007_v14, %v8005_v1  ;;  %v4319_v27 = vsub.f32 1.0, %v6080_v49  ;;  %v4324_v6 = vmul.f32 %v4316_v13, %v7951_v11  ;;  %v4311_v59 = vmul.f32 %v6080_v49, %v7909_v61 }
0x141c   : > { %v6082_v10 = vpop.eup %6081 }
0x141d   : > { %5541 = vmatprep.mubr.msk.bf16.mxu0 %vm977_vm0, %v4336_v40  ;;  %v4317_v62 = vsub.f32 1.0, %v6082_v10  ;;  %v4327_v23 = vmul.f32 %v4319_v27, %v7948_v28  ;;  %v4309_v8 = vmul.f32 %v6082_v10, %v7890_v56  ;;  %v8027_v33 = vadd.f32 %v4324_v6, %v4308_v19  ;;  %v5792_v56 = vld [vmem:[%s8189_s20 + $0x10] sm:$0xff]  }
0x141e   : > { %5542 = vmatmul.mubr.msk.bf16.vlgmr.msra.gmra.mxu0 %vm977_vm0, %v4337_v38  ;;  %v8031_v28 = vadd.f32 %v4326_v58, %v4310_v24  ;;  %5559 = vmatprep.subr.bf16.mxu1 %v5792_v56 }
0x141f   : > { %v4325_v32 = vmul.f32 %v4317_v62, %v7954_v15  ;;  %v8025_v51 = vadd.f32 %v4327_v23, %v4311_v59  ;;  %5560 = vmatpush3.bf16.msra.mxu1 %v5792_v56  ;;  %v5794_v15 = vld [vmem:[%s8189_s20] sm:$0xff]  }
0x1420   : > { %5561 = vmatprep.subr.bf16.mxu1 %v5793_v50 }
0x1421   : > { %v8029_v11 = vadd.f32 %v4325_v32, %v4309_v8  ;;  %v4339_v54 = vpack.c.bf16 %v8025_v51, %v8031_v28 }
0x1423   : > { %v4338_v61 = vpack.c.bf16 %v8029_v11, %v8027_v33  ;;  %5562 = vmatpush3.bf16.msra.mxu1 %v5793_v50 }
0x1424   : > { %5563 = vmatprep.subr.bf16.mxu1 %v5794_v15 }
0x1425   : > { %5545 = vmatprep.mubr.msk.bf16.mxu0 %vm977_vm0, %v4338_v61 }
0x1426   : > { %5546 = vmatmul.mubr.msk.bf16.gmra.mxu0 %vm977_vm0, %v4339_v54 }
0x1427   : > { %5564 = vmatpush3.bf16.msra.mxu1 %v5794_v15 }
0x14de   : > { %v5543_v12 = vpop.f32.mrf.mxu0 }
0x14df   : > { %v4434_v16 = vadd.f32 %v5543_v12, %v5007_v53 }
0x14e0   : > { %v4425_v34 = vpop.f32.mrf.mxu0 }
0x14e1   : > { %v4426_v39 = vadd.f32 %v5007_v53, %v4425_v34  ;;  %v4458_v26 = vmax.f32 %v4434_v16, 0.0 }
0x14e2   : > { %v5544_v22 = vpop.f32.mrf.mxu0 }
0x14e3   : > { %v4437_v35 = vadd.f32 %v5544_v22, %v5007_v53  ;;  %v4456_v60 = vmax.f32 %v4426_v39, 0.0 }
0x14e4   : > { %v4428_v0 = vpop.f32.mrf.mxu0 }
0x14e5   : > { %v4429_v52 = vadd.f32 %v5007_v53, %v4428_v0  ;;  %v4459_v25 = vmax.f32 %v4437_v35, 0.0 }
0x14e6   : > { %v5547_v30 = vpop.f32.mrf.mxu0 }
0x14e7   : > { %v4457_v17 = vmax.f32 %v4429_v52, 0.0  ;;  %v4465_v63 = vpack.c.bf16 %v4459_v25, %v4458_v26  ;;  %v4450_v44 = vadd.f32 %v5547_v30, %v5007_v53 }
0x14e8   : > { %v4441_v2 = vpop.f32.mrf.mxu0 }
0x14e9   : > { %v4464_v21 = vpack.c.bf16 %v4457_v17, %v4456_v60  ;;  %v4442_v7 = vadd.f32 %v5007_v53, %v4441_v2  ;;  %v4462_v4 = vmax.f32 %v4450_v44, 0.0 }
0x14ea   : > { %v5548_v31 = vpop.f32.mrf.mxu0 }
0x14eb   : > { %v4453_v42 = vadd.f32 %v5548_v31, %v5007_v53  ;;  %5565 = vmatprep.mubr.bf16.mxu1 %v4464_v21  ;;  %v4460_v20 = vmax.f32 %v4442_v7, 0.0 }
0x14ec   : > { %v4444_v5 = vpop.f32.mrf.mxu0  ;;  %5566 = vmatmul.mubr.bf16.vlgmr.msra.gmra.mxu1 %v4465_v63 }
0x14ed   : > { %v4445_v18 = vadd.f32 %v5007_v53, %v4444_v5  ;;  %v4463_v46 = vmax.f32 %v4453_v42, 0.0 }
0x14ef   : > { %v4461_v57 = vmax.f32 %v4445_v18, 0.0  ;;  %v4467_v36 = vpack.c.bf16 %v4463_v46, %v4462_v4 }
0x14f1   : > { %v4466_v55 = vpack.c.bf16 %v4461_v57, %v4460_v20 }
0x14f3   : > { %5569 = vmatprep.mubr.bf16.mxu1 %v4466_v55 }
0x14f4   : > { %5570 = vmatmul.mubr.bf16.gmra.mxu1 %v4467_v36 }
0x15ac   : > { %v5567_v37 = vpop.f32.mrf.mxu1 }
0x15ad   : > { %v4582_v47 = vadd.f32 %v5567_v37, %v5016_v43 }
0x15ae   : > { %v4573_v29 = vpop.f32.mrf.mxu1 }
0x15af   : > { %v4606_v9 = vadd.f32 %v4582_v47, %v8009_v45  ;;  %v4574_v41 = vadd.f32 %v5016_v43, %v4573_v29 }
0x15b0   : > { %v5568_v13 = vpop.f32.mrf.mxu1 }
0x15b1   : > { %v4604_v49 = vadd.f32 %v4574_v41, %v8005_v1  ;;  %v4585_v48 = vadd.f32 %v5568_v13, %v5016_v43  ;;  %v4618_v40 = vsel %vm977_vm0, %v4606_v9, 0.0 }
0x15b2   : > { %4619 = vadd.xlane.f32.xlu0 %v4618_v40  ;;  %v4576_v27 = vpop.f32.mrf.mxu1 }
0x15b3   : > { %v4577_v10 = vadd.f32 %v5016_v43, %v4576_v27  ;;  %v4607_v62 = vadd.f32 %v4585_v48, %v8003_v3  ;;  %v4612_v23 = vsel %vm977_vm0, %v4604_v49, 0.0 }
0x15b4   : > { %v5571_v38 = vpop.f32.mrf.mxu1 }
0x15b5   : > { %v4605_v6 = vadd.f32 %v4577_v10, %v8007_v14  ;;  %v4598_v45 = vadd.f32 %v5571_v38, %v5016_v43  ;;  %v4621_v32 = vsel %vm977_vm0, %v4607_v62, 0.0 }
0x15b6   : > { %v4589_v59 = vpop.f32.mrf.mxu1  ;;  %4613 = vadd.xlane.f32.xlu0 %v4612_v23 }
0x15b7   : > { %v4590_v58 = vadd.f32 %v5016_v43, %v4589_v59  ;;  %v4615_v19 = vsel %vm977_vm0, %v4605_v6, 0.0  ;;  %v4610_v3 = vadd.f32 %v4598_v45, %v8031_v28 }
0x15b8   : > { %v5572_v1 = vpop.f32.mrf.mxu1  ;;  %4616 = vadd.xlane.f32.xlu1 %v4615_v19 }
0x15b9   : > { %v4608_v8 = vadd.f32 %v4590_v58, %v8027_v33  ;;  %v4601_v61 = vadd.f32 %v5572_v1, %v5016_v43  ;;  %v4630_v15 = vsel %vm977_vm0, %v4610_v3, 0.0 }
0x15ba   : > { %v4592_v24 = vpop.f32.mrf.mxu1  ;;  %4622 = vadd.xlane.f32.xlu0 %v4621_v32 }
0x15bb   : > { %v4593_v14 = vadd.f32 %v5016_v43, %v4592_v24  ;;  %v4624_v54 = vsel %vm977_vm0, %v4608_v8, 0.0  ;;  %v4611_v50 = vadd.f32 %v4601_v61, %v8025_v51 }
0x15bc   : > { %4625 = vadd.xlane.f32.xlu1 %v4624_v54 }
0x15bd   : > { %v4609_v56 = vadd.f32 %v4593_v14, %v8029_v11  ;;  %v4633_v33 = vsel %vm977_vm0, %v4611_v50, 0.0 }
0x15bf   : > { %v4627_v12 = vsel %vm977_vm0, %v4609_v56, 0.0 }
0x15c0   : > { %4631 = vadd.xlane.f32.xlu1 %v4630_v15  ;;  %4628 = vadd.xlane.f32.xlu0 %v4627_v12  ;;  %v5025_v15 = vld [vmem:[%s8191_s22] ss:$0 sm:$0xff] }
0x15c4   : > { %4634 = vadd.xlane.f32.xlu0 %v4633_v33 }
0x163b   : > { %v4620_v34 = vpop.xlane.xlu0 %4619 }
0x163c   : > { %v4639_v28 = vmul.f32 0.015625, %v4620_v34 }
0x163e   : > { %v8070_v53 = vsub.f32 %v4606_v9, %v4639_v28  ;;  %v5026_v28 = vld [vmem:[%s8192_s23] ss:$0 sm:$0xff] }
0x163f   : > { %v4614_v22 = vpop.xlane.xlu0 %4613 }
0x1640   : > { %v4637_v39 = vmul.f32 0.015625, %v4614_v22  ;;  %v4655_v11 = vmul.f32 %v8070_v53, %v8070_v53 }
0x1641   : > { %v4617_v35 = vpop.xlane.xlu1 %4616 }
0x1642   : > { %v8074_v51 = vsub.f32 %v4604_v49, %v4637_v39  ;;  %v4638_v16 = vmul.f32 0.015625, %v4617_v35  ;;  %v4667_v0 = vsel %vm977_vm0, %v4655_v11, 0.0  ;;  %v5027_v35 = vld [vmem:[%s8193_s24] ss:$0 sm:$0xff] }
0x1643   : > { %4668 = vadd.xlane.f32.xlu1 %v4667_v0  ;;  %v4623_v52 = vpop.xlane.xlu0 %4622 }
0x1644   : > { %v4640_v25 = vmul.f32 0.015625, %v4623_v52  ;;  %v4653_v30 = vmul.f32 %v8074_v51, %v8074_v51  ;;  %v8079_v60 = vsub.f32 %v4605_v6, %v4638_v16 }
0x1645   : > { %v4626_v17 = vpop.xlane.xlu1 %4625 }
0x1646   : > { %v8081_v26 = vsub.f32 %v4607_v62, %v4640_v25  ;;  %v4641_v2 = vmul.f32 0.015625, %v4626_v17  ;;  %v4661_v21 = vsel %vm977_vm0, %v4653_v30, 0.0  ;;  %v4654_v44 = vmul.f32 %v8079_v60, %v8079_v60 }
0x1647   : > { %4662 = vadd.xlane.f32.xlu1 %v4661_v21 }
0x1648   : > { %v8084_v63 = vsub.f32 %v4608_v8, %v4641_v2  ;;  %v4656_v31 = vmul.f32 %v8081_v26, %v8081_v26  ;;  %v4664_v37 = vsel %vm977_vm0, %v4654_v44, 0.0 }
0x1649   : > { %v4632_v7 = vpop.xlane.xlu1 %4631  ;;  %v4629_v42 = vpop.xlane.xlu0 %4628 }
0x164a   : > { %v4643_v5 = vmul.f32 0.015625, %v4632_v7  ;;  %v4642_v18 = vmul.f32 0.015625, %v4629_v42  ;;  %v4670_v46 = vsel %vm977_vm0, %v4656_v31, 0.0  ;;  %v4657_v20 = vmul.f32 %v8084_v63, %v8084_v63 }
0x164b   : > { %4671 = vadd.xlane.f32.xlu0 %v4670_v46 }
0x164c   : > { %v8093_v57 = vsub.f32 %v4610_v3, %v4643_v5  ;;  %v8095_v4 = vsub.f32 %v4609_v56, %v4642_v18  ;;  %v4673_v55 = vsel %vm977_vm0, %v4657_v20, 0.0 }
0x164d   : > { %4674 = vadd.xlane.f32.xlu1 %v4673_v55  ;;  %v4635_v36 = vpop.xlane.xlu0 %4634 }
0x164e   : > { %v4644_v43 = vmul.f32 0.015625, %v4635_v36  ;;  %v4659_v47 = vmul.f32 %v8093_v57, %v8093_v57  ;;  %v4658_v29 = vmul.f32 %v8095_v4, %v8095_v4 }
0x164f   : > { %4665 = vadd.xlane.f32.xlu0 %v4664_v37 }
0x1650   : > { %v8103_v9 = vsub.f32 %v4611_v50, %v4644_v43  ;;  %v4679_v41 = vsel %vm977_vm0, %v4659_v47, 0.0  ;;  %v4676_v13 = vsel %vm977_vm0, %v4658_v29, 0.0 }
0x1651   : > { %4680 = vadd.xlane.f32.xlu1 %v4679_v41 }
0x1652   : > { %v4660_v49 = vmul.f32 %v8103_v9, %v8103_v9 }
0x1653   : > { %4677 = vadd.xlane.f32.xlu0 %v4676_v13 }
0x1654   : > { %v4682_v48 = vsel %vm977_vm0, %v4660_v49, 0.0 }
0x1657   : > { %4683 = vadd.xlane.f32.xlu0 %v4682_v48 }
0x16cc   : > { %v4669_v40 = vpop.xlane.xlu1 %4668 }
0x16cd   : > { %v4687_v27 = vmul.f32 0.015625, %v4669_v40 }
0x16cf   : > { %v4695_v10 = vadd.f32 1e-05, %v4687_v27 }
0x16d0   : > { %v4663_v38 = vpop.xlane.xlu1 %4662 }
0x16d1   : > { %6083 = vrsqrt.f32 %v4695_v10  ;;  %v4685_v62 = vmul.f32 0.015625, %v4663_v38 }
0x16d3   : > { %v4693_v6 = vadd.f32 1e-05, %v4685_v62 }
0x16d4   : > { %v4672_v23 = vpop.xlane.xlu0 %4671 }
0x16d5   : > { %6085 = vrsqrt.f32 %v4693_v6  ;;  %v4688_v59 = vmul.f32 0.015625, %v4672_v23 }
0x16d6   : > { %v4675_v45 = vpop.xlane.xlu1 %4674 }
0x16d7   : > { %v4696_v58 = vadd.f32 1e-05, %v4688_v59  ;;  %v4689_v19 = vmul.f32 0.015625, %v4675_v45 }
0x16d8   : > { %v4666_v1 = vpop.xlane.xlu0 %4665 }
0x16d9   : > { %6087 = vrsqrt.f32 %v4696_v58  ;;  %v4697_v8 = vadd.f32 1e-05, %v4689_v19  ;;  %v4686_v32 = vmul.f32 0.015625, %v4666_v1 }
0x16da   : > { %v4681_v24 = vpop.xlane.xlu1 %4680 }
0x16db   : > { %6089 = vrsqrt.f32 %v4697_v8  ;;  %v4694_v3 = vadd.f32 1e-05, %v4686_v32  ;;  %v4691_v61 = vmul.f32 0.015625, %v4681_v24  ;;  %v5028_v8 = vld [vmem:[#allocation2] ss:$0 sm:$0xff]  ;;  %v6115_v24 = vld [vmem:[%s6314_s7 + $0x10] sm:$0xff] }
0x16dc   : > { %v4678_v14 = vpop.xlane.xlu0 %4677 }
0x16dd   : > { %6091 = vrsqrt.f32 %v4694_v3  ;;  %v4699_v54 = vadd.f32 1e-05, %v4691_v61  ;;  %v4690_v56 = vmul.f32 0.015625, %v4678_v14 }
0x16de   : > { %v6084_v50 = vpop.eup %6083 }
0x16df   : > { %6093 = vrsqrt.f32 %v4699_v54  ;;  %v4698_v12 = vadd.f32 1e-05, %v4690_v56  ;;  %v4711_v33 = vmul.f32 %v6084_v50, %v8070_v53  ;;  %v6116_v54 = vld [vmem:[%s6314_s7] sm:$0xff] }
0x16e0   : > { %v4684_v34 = vpop.xlane.xlu0 %4683 }
0x16e1   : > { %6095 = vrsqrt.f32 %v4698_v12  ;;  %v4692_v22 = vmul.f32 0.015625, %v4684_v34  ;;  %v4726_v39 = vmul.f32 %v5025_v15, %v4711_v33  ;;  %v6117_v33 = vld [vmem:[%s6314_s7 + $0x18] sm:$0xff] }
0x16e2   : > { %v6086_v11 = vpop.eup %6085 }
0x16e3   : > { %v4700_v16 = vadd.f32 1e-05, %v4692_v22  ;;  %v4741_v0 = vadd.f32 %v5026_v28, %v4726_v39  ;;  %v4709_v52 = vmul.f32 %v6086_v11, %v8074_v51  ;;  %v6118_v39 = vld [vmem:[%s6314_s7 + $0x20] sm:$0xff] }
0x16e5   : > { %6097 = vrsqrt.f32 %v4700_v16  ;;  %v4756_v25 = vmul.f32 %v5027_v35, %v4741_v0  ;;  %v4724_v53 = vmul.f32 %v5025_v15, %v4709_v52  ;;  %v6119_v0 = vld [vmem:[%s6314_s7 + $0x8] sm:$0xff] }
0x16e6   : > { %v6088_v30 = vpop.eup %6087 }
0x16e7   : > { %v4768_v17 = vsel %vm977_vm0, %v4756_v25, 0.0  ;;  %v4739_v2 = vadd.f32 %v5026_v28, %v4724_v53  ;;  %v4712_v21 = vmul.f32 %v6088_v30, %v8081_v26  ;;  %v6120_v53 = vld [vmem:[%s6314_s7 + $0x30] sm:$0xff] }
0x16e8   : > { %v6090_v31 = vpop.eup %6089  ;;  %4769 = vadd.xlane.f32.xlu1 %v4768_v17 }
0x16e9   : > { %v4754_v7 = vmul.f32 %v5027_v35, %v4739_v2  ;;  %v4727_v42 = vmul.f32 %v5025_v15, %v4712_v21  ;;  %v4713_v44 = vmul.f32 %v6090_v31, %v8084_v63  ;;  %v6121_v21 = vld [vmem:[%s6314_s7 + $0x28] sm:$0xff] }
0x16ea   : > { %v6092_v5 = vpop.eup %6091 }
0x16eb   : > { %v4762_v18 = vsel %vm977_vm0, %v4754_v7, 0.0  ;;  %v4742_v46 = vadd.f32 %v5026_v28, %v4727_v42  ;;  %v4728_v51 = vmul.f32 %v5025_v15, %v4713_v44  ;;  %v4710_v20 = vmul.f32 %v6092_v5, %v8079_v60  ;;  %v6122_v44 = vld [vmem:[%s6314_s7 + $0x38] sm:$0xff] }
0x16ec   : > { %v6094_v55 = vpop.eup %6093  ;;  %4763 = vadd.xlane.f32.xlu1 %v4762_v18 }
0x16ed   : > { %v4757_v36 = vmul.f32 %v5027_v35, %v4742_v46  ;;  %v4743_v43 = vadd.f32 %v5026_v28, %v4728_v51  ;;  %v4725_v37 = vmul.f32 %v5025_v15, %v4710_v20  ;;  %v4715_v26 = vmul.f32 %v6094_v55, %v8093_v57 }
0x16ee   : > { %v6096_v47 = vpop.eup %6095 }
0x16ef   : > { %v4771_v29 = vsel %vm977_vm0, %v4757_v36, 0.0  ;;  %v4758_v41 = vmul.f32 %v5027_v35, %v4743_v43  ;;  %v4740_v13 = vadd.f32 %v5026_v28, %v4725_v37  ;;  %v4730_v63 = vmul.f32 %v5025_v15, %v4715_v26 }
0x16f0   : > { %4772 = vadd.xlane.f32.xlu0 %v4771_v29  ;;  %v4714_v49 = vmul.f32 %v6096_v47, %v8095_v4 }
0x16f1   : > { %v4774_v48 = vsel %vm977_vm0, %v4758_v41, 0.0  ;;  %v4755_v40 = vmul.f32 %v5027_v35, %v4740_v13  ;;  %v4745_v60 = vadd.f32 %v5026_v28, %v4730_v63 }
0x16f2   : > { %v6098_v27 = vpop.eup %6097  ;;  %4775 = vadd.xlane.f32.xlu1 %v4774_v48  ;;  %v4729_v10 = vmul.f32 %v5025_v15, %v4714_v49 }
0x16f3   : > { %v4765_v38 = vsel %vm977_vm0, %v4755_v40, 0.0  ;;  %v4760_v62 = vmul.f32 %v5027_v35, %v4745_v60  ;;  %v4716_v57 = vmul.f32 %v6098_v27, %v8103_v9 }
0x16f4   : > { %4766 = vadd.xlane.f32.xlu0 %v4765_v38  ;;  %v4744_v6 = vadd.f32 %v5026_v28, %v4729_v10 }
0x16f5   : > { %v4780_v23 = vsel %vm977_vm0, %v4760_v62, 0.0  ;;  %v4731_v59 = vmul.f32 %v5025_v15, %v4716_v57 }
0x16f6   : > { %4781 = vadd.xlane.f32.xlu1 %v4780_v23  ;;  %v4759_v4 = vmul.f32 %v5027_v35, %v4744_v6 }
0x16f7   : > { %v4746_v45 = vadd.f32 %v5026_v28, %v4731_v59 }
0x16f8   : > { %v4777_v58 = vsel %vm977_vm0, %v4759_v4, 0.0 }
0x16f9   : > { %4778 = vadd.xlane.f32.xlu0 %v4777_v58  ;;  %v4761_v19 = vmul.f32 %v5027_v35, %v4746_v45 }
0x16fb   : > { %v4783_v1 = vsel %vm977_vm0, %v4761_v19, 0.0 }
0x16fd   : > { %4784 = vadd.xlane.f32.xlu0 %v4783_v1 }
0x1771   : > { %v4770_v9 = vpop.xlane.xlu1 %4769 }
0x1772   : > { %v4795_v32 = vadd.f32 %v5028_v8, %v4770_v9 }
0x1774   : > { %v4803_v3 = vadd.f32 %v6115_v24, %v4795_v32 }
0x1775   : > { %v4764_v61 = vpop.xlane.xlu1 %4763 }
0x1776   : > { %4812 = vst.msk [vmem:[%s8140_s2 + $0x10] sm:$0xff] %vm4809_vm4, %v4803_v3  ;;  %v4793_v14 = vadd.f32 %v5028_v8, %v4764_v61 }
0x1778   : > { %v4801_v56 = vadd.f32 %v6116_v54, %v4793_v14 }
0x1779   : > { %v4773_v50 = vpop.xlane.xlu0 %4772 }
0x177a   : > { %4810 = vst.msk [vmem:[%s8140_s2] sm:$0xff] %vm4809_vm4, %v4801_v56  ;;  %v4796_v15 = vadd.f32 %v5028_v8, %v4773_v50 }
0x177b   : > { %v4776_v12 = vpop.xlane.xlu1 %4775 }
0x177c   : > { %v4804_v34 = vadd.f32 %v6117_v33, %v4796_v15  ;;  %v4797_v28 = vadd.f32 %v5028_v8, %v4776_v12 }
0x177d   : > { %v4767_v22 = vpop.xlane.xlu0 %4766 }
0x177e   : > { %4813 = vst.msk [vmem:[%s8140_s2 + $0x18] sm:$0xff] %vm4809_vm4, %v4804_v34  ;;  %v4805_v11 = vadd.f32 %v6118_v39, %v4797_v28  ;;  %v4794_v35 = vadd.f32 %v5028_v8, %v4767_v22 }
0x177f   : > { %v4782_v16 = vpop.xlane.xlu1 %4781 }
0x1780   : > { %4814 = vst.msk [vmem:[%s8140_s2 + $0x20] sm:$0xff] %vm4809_vm4, %v4805_v11  ;;  %v4802_v52 = vadd.f32 %v6119_v0, %v4794_v35  ;;  %v4799_v25 = vadd.f32 %v5028_v8, %v4782_v16 }
0x1782   : > { %4811 = vst.msk [vmem:[%s8140_s2 + $0x8] sm:$0xff] %vm4809_vm4, %v4802_v52  ;;  %v4807_v30 = vadd.f32 %v6120_v53, %v4799_v25  ;;  %v4779_v17 = vpop.xlane.xlu0 %4778 }
0x1783   : > { %v4798_v2 = vadd.f32 %v5028_v8, %v4779_v17 }
0x1784   : > { %4816 = vst.msk [vmem:[%s8140_s2 + $0x30] sm:$0xff] %vm4809_vm4, %v4807_v30 }
0x1785   : > { %v4806_v31 = vadd.f32 %v6121_v21, %v4798_v2 }
0x1786   : > { %v4785_v7 = vpop.xlane.xlu0 %4784 }
0x1787   : > { %4815 = vst.msk [vmem:[%s8140_s2 + $0x28] sm:$0xff] %vm4809_vm4, %v4806_v31  ;;  %v4800_v42 = vadd.f32 %v5028_v8, %v4785_v7 }
0x1789   : > { %v4808_v5 = vadd.f32 %v6122_v44, %v4800_v42 }
0x178b   : > { %4817 = vst.msk [vmem:[%s8140_s2 + $0x38] sm:$0xff] %vm4809_vm4, %v4808_v5 }
0x178c PF: > { %s8310_s28 = sld [smem:[#allocation3_spill]] }
0x1792   : > { %s38_s7 = sadd.s32 1, %s8310_s28  }
0x1793   : > { %p35_p4 = scmp.ge.s32.totalorder %s38_s7, 4  }
0x1795   :  { %37 = sbr.rel (!%p35_p4) target bundleno = 12 (0xc), region = 154 }

</bundles_post_ra>
